<compile_context>
chip_gen: v5e
topology: v5e:2x2
jax: 0.10.0
libtpu: 0.0.40
codegen_flags: <defaults>
</compile_context>

<pallas_src>
import functools

import numpy as np
import jax
import jax.numpy as jnp
from jax.experimental import pallas as pl
from jax.experimental.pallas import tpu as pltpu


# ----------------------------- Pallas kernels ------------------------------

def _win_attn_kernel(x_ref, g_ref, b_ref, wqkv_ref, bqkv_ref, bm_ref,
                     wproj_ref, bproj_ref, o_ref):
    """Fused: norm1 -> qkv -> per-(window,head) attention -> proj -> +residual.

    Block shapes:
      x_ref    : (1, nW*N, C)    raw (un-normalized) windowed patches
      bm_ref   : (nh, nW, N, N)  rel-pos bias + shift mask, pre-combined
      wqkv_ref : (C, 3C)         softmax scale already folded into q columns
    """
    nh, nW, N, _ = bm_ref.shape
    x = x_ref[0]                                   # (nW*N, C) raw input
    C = x.shape[-1]
    hd = C // nh

    # --- norm1 (fused; LayerNorm is per-token, permutation-invariant) ---
    mu = jnp.mean(x, axis=-1, keepdims=True)
    var = jnp.mean((x - mu) ** 2, axis=-1, keepdims=True)
    xn = (x - mu) * jax.lax.rsqrt(var + 1e-5) * g_ref[...] + b_ref[...]

    # --- single wide qkv projection for all windows of this batch elem ---
    qkv = jnp.dot(xn, wqkv_ref[...], preferred_element_type=jnp.float32)
    qkv = qkv + bqkv_ref[...]                      # (nW*N, 3C)
    qkv = qkv.reshape(nW, N, 3 * C)                # split rows -> (window, tok)

    bm = bm_ref[...]                               # (nh, nW, N, N)
    wp = wproj_ref[...]                            # (C, C)

    acc = jnp.zeros((nW * N, C), jnp.float32)
    for h in range(nh):                            # short unrolled head loop
        q = qkv[:, :, h * hd:(h + 1) * hd]                  # (nW, N, hd) pre-scaled
        k = qkv[:, :, C + h * hd:C + (h + 1) * hd]          # (nW, N, hd)
        v = qkv[:, :, 2 * C + h * hd:2 * C + (h + 1) * hd]  # (nW, N, hd)
        # window-batched scores + softmax
        s = jnp.einsum('wnd,wmd->wnm', q, k,
                       preferred_element_type=jnp.float32)  # (nW, N, N)
        s = s + bm[h]
        s = s - jnp.max(s, axis=-1, keepdims=True)
        p = jnp.exp(s)
        p = p * pl.reciprocal(jnp.sum(p, axis=-1, keepdims=True), approx=True)
        oh = jnp.einsum('wnm,wmd->wnd', p, v,
                        preferred_element_type=jnp.float32)  # (nW, N, hd)
        # K-split output projection (replaces head concat)
        acc = acc + jnp.dot(oh.reshape(nW * N, hd),
                            wp[h * hd:(h + 1) * hd, :],
                            preferred_element_type=jnp.float32)

    # proj bias + fused residual (shortcut is the raw windowed input)
    o_ref[0] = (acc + bproj_ref[...] + x).astype(o_ref.dtype)


def window_attention_fused(x_windows, g1, b1, wqkv_s, bqkv_s, bias_mask,
                           wproj, bproj):
    B, WN, C = x_windows.shape
    nh, nW, N, _ = bias_mask.shape
    return pl.pallas_call(
        _win_attn_kernel,
        out_shape=jax.ShapeDtypeStruct((B, WN, C), x_windows.dtype),
        grid=(B,),
        in_specs=[
            pl.BlockSpec((1, WN, C), lambda i: (i, 0, 0)),
            pl.BlockSpec((1, C), lambda i: (0, 0)),
            pl.BlockSpec((1, C), lambda i: (0, 0)),
            pl.BlockSpec((C, 3 * C), lambda i: (0, 0)),
            pl.BlockSpec((1, 3 * C), lambda i: (0, 0)),
            pl.BlockSpec((nh, nW, N, N), lambda i: (0, 0, 0, 0)),
            pl.BlockSpec((C, C), lambda i: (0, 0)),
            pl.BlockSpec((1, C), lambda i: (0, 0)),
        ],
        out_specs=pl.BlockSpec((1, WN, C), lambda i: (i, 0, 0)),
        compiler_params=pltpu.CompilerParams(dimension_semantics=("parallel",)),
    )(x_windows, g1.reshape(1, C), b1.reshape(1, C), wqkv_s,
      bqkv_s.reshape(1, 3 * C), bias_mask, wproj, bproj.reshape(1, C))


def _norm2_mlp_kernel(x_ref, g_ref, b_ref, w1_ref, b1_ref, w2_ref, b2_ref,
                      o_ref):
    x = x_ref[0]                                   # (L, C)
    mu = jnp.mean(x, axis=-1, keepdims=True)
    var = jnp.mean((x - mu) ** 2, axis=-1, keepdims=True)
    y = (x - mu) * jax.lax.rsqrt(var + 1e-5) * g_ref[...] + b_ref[...]  # norm2
    h = jnp.dot(y, w1_ref[...], preferred_element_type=jnp.float32) + b1_ref[...]
    h = 0.5 * h * (1.0 + jax.lax.erf(h * 0.7071067811865476))           # GELU
    z = jnp.dot(h, w2_ref[...], preferred_element_type=jnp.float32) + b2_ref[...]
    # Matches the PyTorch module: x = norm2(x); x = x + mlp(x)
    o_ref[0] = (y + z).astype(o_ref.dtype)


def norm2_mlp(x, gamma, beta, w1, b1, w2, b2):
    B, L, C = x.shape
    Hm = w1.shape[1]
    return pl.pallas_call(
        _norm2_mlp_kernel,
        out_shape=jax.ShapeDtypeStruct((B, L, C), x.dtype),
        grid=(B,),
        in_specs=[
            pl.BlockSpec((1, L, C), lambda i: (i, 0, 0)),
            pl.BlockSpec((1, C), lambda i: (0, 0)),
            pl.BlockSpec((1, C), lambda i: (0, 0)),
            pl.BlockSpec((C, Hm), lambda i: (0, 0)),
            pl.BlockSpec((1, Hm), lambda i: (0, 0)),
            pl.BlockSpec((Hm, C), lambda i: (0, 0)),
            pl.BlockSpec((1, C), lambda i: (0, 0)),
        ],
        out_specs=pl.BlockSpec((1, L, C), lambda i: (i, 0, 0)),
        compiler_params=pltpu.CompilerParams(dimension_semantics=("parallel",)),
    )(x, gamma.reshape(1, C), beta.reshape(1, C), w1, b1.reshape(1, Hm),
      w2, b2.reshape(1, C))


# ------------------------------ JAX glue -----------------------------------
# TODO(synk): the cyclic shift + window partition/reverse permutations stay as
# XLA roll/reshape/transpose glue; folding them into the kernel's index_map
# would need per-window Element offsets / manual DMA.

def window_partition(x, ws):
    B, H, W, C = x.shape
    x = x.reshape(B, H // ws, ws, W // ws, ws, C)
    return jnp.transpose(x, (0, 1, 3, 2, 4, 5)).reshape(-1, ws, ws, C)


def window_reverse(windows, ws, H, W):
    B = windows.shape[0] // ((H // ws) * (W // ws))
    x = windows.reshape(B, H // ws, W // ws, ws, ws, -1)
    return jnp.transpose(x, (0, 1, 3, 2, 4, 5)).reshape(B, H, W, -1)


def relative_position_index(ws):
    coords = np.stack(np.meshgrid(np.arange(ws), np.arange(ws), indexing="ij"))
    cf = coords.reshape(2, -1)
    rel = cf[:, :, None] - cf[:, None, :]
    rel = rel.transpose(1, 2, 0).astype(np.int64)
    rel[:, :, 0] += ws - 1
    rel[:, :, 1] += ws - 1
    rel[:, :, 0] *= 2 * ws - 1
    return rel.sum(-1)                              # (N, N)


def build_attn_mask(H, W, ws, ss):
    nW = (H // ws) * (W // ws)
    N = ws * ws
    if ss == 0:
        return np.zeros((nW, N, N), np.float32)
    img_mask = np.zeros((1, H, W, 1), np.float32)
    cnt = 0
    for hs in (slice(0, -ws), slice(-ws, -ss), slice(-ss, None)):
        for wsl in (slice(0, -ws), slice(-ws, -ss), slice(-ss, None)):
            img_mask[:, hs, wsl, :] = cnt
            cnt += 1
    m = img_mask.reshape(1, H // ws, ws, W // ws, ws, 1)
    m = m.transpose(0, 1, 3, 2, 4, 5).reshape(-1, N)
    am = m[:, None, :] - m[:, :, None]
    return np.where(am != 0, -100.0, 0.0).astype(np.float32)


@functools.partial(jax.jit, static_argnames=("H", "W", "ws", "ss", "num_heads"))
def swin_block_forward(x, p, H, W, ws, ss, num_heads):
    B, L, C = x.shape
    N = ws * ws
    nW = (H // ws) * (W // ws)

    time_token = x[:, :1, :]
    img = x[:, 1:, :].reshape(B, H, W, C)

    if ss > 0:
        shifted = jnp.roll(img, shift=(-ss, -ss), axis=(1, 2))
    else:
        shifted = img
    xw = window_partition(shifted, ws).reshape(B, nW * N, C)

    # Fold softmax scale into the q columns of the fused qkv weight / bias,
    # and pre-combine rel-pos bias + shift mask into one (nh, nW, N, N) const.
    # (Tiny one-time ops inside the jitted program.)
    wqkv_s = p["wqkv"].at[:, :C].multiply(p["scale"])
    bqkv_s = p["bqkv"].at[:C].multiply(p["scale"])
    bias_mask = p["rel_bias"][:, None, :, :] + p["attn_mask"][None, :, :, :]

    # Fused: norm1 + window attention + residual (in windowed coordinates).
    y = window_attention_fused(xw, p["g1"], p["b1"], wqkv_s, bqkv_s,
                               bias_mask, p["wproj"], p["bproj"])

    y = window_reverse(y.reshape(B * nW, ws, ws, C), ws, H, W)
    if ss > 0:
        y = jnp.roll(y, shift=(ss, ss), axis=(1, 2))
    img_out = y.reshape(B, H * W, C)                # == shortcut + attn_out

    xc = jnp.concatenate([time_token, img_out], axis=1)   # (B, L, C)
    return norm2_mlp(xc, p["g2"], p["b2"], p["w1"], p["b1m"], p["w2"], p["b2m"])


# --------------------------- pure-JAX reference -----------------------------

def reference_forward(x, p, H, W, ws, ss, nh):
    def ln(v, g, b):
        mu = jnp.mean(v, -1, keepdims=True)
        var = jnp.mean((v - mu) ** 2, -1, keepdims=True)
        return (v - mu) / jnp.sqrt(var + 1e-5) * g + b

    B, L, C = x.shape
    tt, img = x[:, :1], x[:, 1:]
    shortcut = img
    y = ln(img, p["g1"], p["b1"]).reshape(B, H, W, C)
    if ss > 0:
        y = jnp.roll(y, (-ss, -ss), (1, 2))
    xw = window_partition(y, ws).reshape(-1, ws * ws, C)
    NWt, N, _ = xw.shape
    hd = C // nh
    qkv = xw @ p["wqkv"] + p["bqkv"]
    qkv = qkv.reshape(NWt, N, 3, nh, hd).transpose(2, 0, 3, 1, 4)
    q, k, v = qkv[0] * p["scale"], qkv[1], qkv[2]
    attn = q @ jnp.swapaxes(k, -2, -1)
    attn = attn + p["rel_bias"][None]
    mask = jnp.tile(p["attn_mask"], (B, 1, 1))
    attn = attn + mask[:, None]
    attn = jax.nn.softmax(attn, axis=-1)
    o = (attn @ v).transpose(0, 2, 1, 3).reshape(NWt, N, C)
    o = o @ p["wproj"] + p["bproj"]
    y = window_reverse(o.reshape(-1, ws, ws, C), ws, H, W)
    if ss > 0:
        y = jnp.roll(y, (ss, ss), (1, 2))
    img = shortcut + y.reshape(B, H * W, C)
    xc = jnp.concatenate([tt, img], 1)
    xn = ln(xc, p["g2"], p["b2"])
    h = xn @ p["w1"] + p["b1m"]
    h = 0.5 * h * (1.0 + jax.lax.erf(h * 0.7071067811865476))
    return xn + (h @ p["w2"] + p["b2m"])


# --------------------------------- main -------------------------------------

if __name__ == "__main__":
    B = 2
    H = W = 8
    dim = 32
    num_heads = 4
    window_size = 4
    shift_size = 2
    mlp_ratio = 4.0
    mlp_hidden = int(dim * mlp_ratio)
    head_dim = dim // num_heads
    N = window_size * window_size

    key = jax.random.PRNGKey(0)
    ks = jax.random.split(key, 8)

    table = 0.02 * jax.random.normal(
        ks[1], ((2 * window_size - 1) ** 2, num_heads), jnp.float32)
    rel_idx = relative_position_index(window_size).reshape(-1)
    rel_bias = jnp.take(table, jnp.asarray(rel_idx), axis=0)
    rel_bias = rel_bias.reshape(N, N, num_heads).transpose(2, 0, 1)  # (nh, N, N)

    params = {
        "g1": jnp.ones((dim,), jnp.float32),
        "b1": jnp.zeros((dim,), jnp.float32),
        "wqkv": 0.02 * jax.random.normal(ks[0], (dim, 3 * dim), jnp.float32),
        "bqkv": jnp.zeros((3 * dim,), jnp.float32),
        "rel_bias": rel_bias,
        "wproj": 0.02 * jax.random.normal(ks[2], (dim, dim), jnp.float32),
        "bproj": jnp.zeros((dim,), jnp.float32),
        "g2": jnp.ones((dim,), jnp.float32),
        "b2": jnp.zeros((dim,), jnp.float32),
        "w1": 0.02 * jax.random.normal(ks[3], (dim, mlp_hidden), jnp.float32),
        "b1m": 0.02 * jax.random.normal(ks[4], (mlp_hidden,), jnp.float32),
        "w2": 0.02 * jax.random.normal(ks[5], (mlp_hidden, dim), jnp.float32),
        "b2m": 0.02 * jax.random.normal(ks[6], (dim,), jnp.float32),
        "attn_mask": jnp.asarray(build_attn_mask(H, W, window_size, shift_size)),
        "scale": head_dim ** (-0.5),
    }

    x = jax.random.normal(ks[7], (B, 1 + H * W, dim), jnp.float32)

    out = swin_block_forward(x, params, H, W, window_size, shift_size, num_heads)
    out = jax.block_until_ready(out)

    ref = reference_forward(x, params, H, W, window_size, shift_size, num_heads)
    ref = jax.block_until_ready(ref)

    assert out.shape == (B, 1 + H * W, dim)
    # Tolerance slightly looser than bitwise because the softmax denominator
    # uses the EUP approximate reciprocal (pl.reciprocal(..., approx=True)).
    if not jnp.allclose(out, ref, rtol=2e-3, atol=2e-3):
        err = float(jnp.max(jnp.abs(out - ref)))
        raise AssertionError(f"Pallas output does not match reference (max err {err})")
    print("KERNEL_OK")
</pallas_src>

<mosaic_0001>
module attributes {stable_mosaic.version = 11 : i64} {
  func.func @_win_attn_kernel(%arg0: i32, %arg1: memref<1x64x32xf32, #tpu.memory_space<vmem>>, %arg2: memref<1x32xf32, #tpu.memory_space<vmem>>, %arg3: memref<1x32xf32, #tpu.memory_space<vmem>>, %arg4: memref<32x96xf32, #tpu.memory_space<vmem>>, %arg5: memref<1x96xf32, #tpu.memory_space<vmem>>, %arg6: memref<4x4x16x16xf32, #tpu.memory_space<vmem>>, %arg7: memref<32x32xf32, #tpu.memory_space<vmem>>, %arg8: memref<1x32xf32, #tpu.memory_space<vmem>>, %arg9: memref<1x64x32xf32, #tpu.memory_space<vmem>>) attributes {dimension_semantics = [#tpu.dimension_semantics<parallel>], iteration_bounds = array<i64: 2>, scalar_prefetch = 0 : i64, scratch_operands = 0 : i64, tpu.core_type = #tpu.core_type<tc>, window_params = [{transform_indices = @transform_0, window_bounds = array<i64: 1, 64, 32>}, {pipeline_mode = #tpu.pipeline_mode<synchronous>, transform_indices = @transform_1, window_bounds = array<i64: 1, 32>}, {pipeline_mode = #tpu.pipeline_mode<synchronous>, transform_indices = @transform_2, window_bounds = array<i64: 1, 32>}, {pipeline_mode = #tpu.pipeline_mode<synchronous>, transform_indices = @transform_3, window_bounds = array<i64: 32, 96>}, {pipeline_mode = #tpu.pipeline_mode<synchronous>, transform_indices = @transform_4, window_bounds = array<i64: 1, 96>}, {pipeline_mode = #tpu.pipeline_mode<synchronous>, transform_indices = @transform_5, window_bounds = array<i64: 4, 4, 16, 16>}, {pipeline_mode = #tpu.pipeline_mode<synchronous>, transform_indices = @transform_6, window_bounds = array<i64: 32, 32>}, {pipeline_mode = #tpu.pipeline_mode<synchronous>, transform_indices = @transform_7, window_bounds = array<i64: 1, 32>}, {transform_indices = @transform_8, window_bounds = array<i64: 1, 64, 32>}]} {
    %c0 = arith.constant 0 : index
    %c0_0 = arith.constant 0 : index
    %c0_1 = arith.constant 0 : index
    %0 = vector.load %arg1[%c0, %c0_0, %c0_1] : memref<1x64x32xf32, #tpu.memory_space<vmem>>, vector<1x64x32xf32>
    %1 = vector.shape_cast %0 : vector<1x64x32xf32> to vector<64x32xf32>
    %cst = arith.constant dense<0.000000e+00> : vector<64xf32>
    %2 = vector.multi_reduction <add>, %1, %cst [1] : vector<64x32xf32> to vector<64xf32>
    %3 = vector.shape_cast %2 : vector<64xf32> to vector<64x1xf32>
    %cst_2 = arith.constant 3.200000e+01 : f32
    %4 = vector.broadcast %cst_2 : f32 to vector<64x1xf32>
    %5 = arith.divf %3, %4 : vector<64x1xf32>
    %6 = vector.broadcast %5 : vector<64x1xf32> to vector<64x32xf32>
    %7 = arith.subf %1, %6 : vector<64x32xf32>
    %8 = arith.mulf %7, %7 : vector<64x32xf32>
    %cst_3 = arith.constant dense<0.000000e+00> : vector<64xf32>
    %9 = vector.multi_reduction <add>, %8, %cst_3 [1] : vector<64x32xf32> to vector<64xf32>
    %10 = vector.shape_cast %9 : vector<64xf32> to vector<64x1xf32>
    %cst_4 = arith.constant 3.200000e+01 : f32
    %11 = vector.broadcast %cst_4 : f32 to vector<64x1xf32>
    %12 = arith.divf %10, %11 : vector<64x1xf32>
    %13 = vector.broadcast %5 : vector<64x1xf32> to vector<64x32xf32>
    %14 = arith.subf %1, %13 : vector<64x32xf32>
    %cst_5 = arith.constant 9.99999974E-6 : f32
    %15 = vector.broadcast %cst_5 : f32 to vector<64x1xf32>
    %16 = arith.addf %12, %15 : vector<64x1xf32>
    %17 = math.rsqrt %16 : vector<64x1xf32>
    %18 = vector.broadcast %17 : vector<64x1xf32> to vector<64x32xf32>
    %19 = arith.mulf %14, %18 : vector<64x32xf32>
    %c0_6 = arith.constant 0 : index
    %c0_7 = arith.constant 0 : index
    %20 = vector.load %arg2[%c0_6, %c0_7] : memref<1x32xf32, #tpu.memory_space<vmem>>, vector<1x32xf32>
    %21 = vector.broadcast %20 : vector<1x32xf32> to vector<64x32xf32>
    %22 = arith.mulf %19, %21 : vector<64x32xf32>
    %c0_8 = arith.constant 0 : index
    %c0_9 = arith.constant 0 : index
    %23 = vector.load %arg3[%c0_8, %c0_9] : memref<1x32xf32, #tpu.memory_space<vmem>>, vector<1x32xf32>
    %24 = vector.broadcast %23 : vector<1x32xf32> to vector<64x32xf32>
    %25 = arith.addf %22, %24 : vector<64x32xf32>
    %c0_10 = arith.constant 0 : index
    %c0_11 = arith.constant 0 : index
    %26 = vector.load %arg4[%c0_10, %c0_11] : memref<32x96xf32, #tpu.memory_space<vmem>>, vector<32x96xf32>
    %cst_12 = arith.constant dense<0.000000e+00> : vector<64x96xf32>
    %27 = tpu.matmul %25, %26, %cst_12 {dimension_numbers = #tpu.dot_dimension_numbers<[1], [0], [0], [1], [0, 0, 1, 1], [], []>} : vector<64x32xf32>, vector<32x96xf32>, vector<64x96xf32> -> vector<64x96xf32>
    %c0_13 = arith.constant 0 : index
    %c0_14 = arith.constant 0 : index
    %28 = vector.load %arg5[%c0_13, %c0_14] : memref<1x96xf32, #tpu.memory_space<vmem>>, vector<1x96xf32>
    %29 = vector.broadcast %28 : vector<1x96xf32> to vector<64x96xf32>
    %30 = arith.addf %27, %29 : vector<64x96xf32>
    %31 = vector.shape_cast %30 : vector<64x96xf32> to vector<4x16x96xf32>
    %c0_15 = arith.constant 0 : index
    %c0_16 = arith.constant 0 : index
    %c0_17 = arith.constant 0 : index
    %c0_18 = arith.constant 0 : index
    %32 = vector.load %arg6[%c0_15, %c0_16, %c0_17, %c0_18] : memref<4x4x16x16xf32, #tpu.memory_space<vmem>>, vector<4x4x16x16xf32>
    %c0_19 = arith.constant 0 : index
    %c0_20 = arith.constant 0 : index
    %33 = vector.load %arg7[%c0_19, %c0_20] : memref<32x32xf32, #tpu.memory_space<vmem>>, vector<32x32xf32>
    %cst_21 = arith.constant 0.000000e+00 : f32
    %34 = vector.broadcast %cst_21 : f32 to vector<64x32xf32>
    %35 = vector.extract_strided_slice %31 {offsets = [0, 0, 0], sizes = [4, 16, 8], strides = [1, 1, 1]} : vector<4x16x96xf32> to vector<4x16x8xf32>
    %36 = vector.extract_strided_slice %31 {offsets = [0, 0, 32], sizes = [4, 16, 8], strides = [1, 1, 1]} : vector<4x16x96xf32> to vector<4x16x8xf32>
    %37 = vector.extract_strided_slice %31 {offsets = [0, 0, 64], sizes = [4, 16, 8], strides = [1, 1, 1]} : vector<4x16x96xf32> to vector<4x16x8xf32>
    "tpu.trace_start"() <{level = 10 : i32, message = "wnd,wmd->wnm"}> : () -> ()
    %cst_22 = arith.constant dense<0.000000e+00> : vector<4x16x16xf32>
    %38 = tpu.matmul %35, %36, %cst_22 {dimension_numbers = #tpu.dot_dimension_numbers<[2], [2], [1], [1], [0, 0, 0, 1, 1, 1], [0], [0]>} : vector<4x16x8xf32>, vector<4x16x8xf32>, vector<4x16x16xf32> -> vector<4x16x16xf32>
    "tpu.trace_stop"() : () -> ()
    %39 = vector.extract_strided_slice %32 {offsets = [0, 0, 0, 0], sizes = [1, 4, 16, 16], strides = [1, 1, 1, 1]} : vector<4x4x16x16xf32> to vector<1x4x16x16xf32>
    %40 = vector.shape_cast %39 : vector<1x4x16x16xf32> to vector<4x16x16xf32>
    %41 = arith.addf %38, %40 : vector<4x16x16xf32>
    %cst_23 = arith.constant dense<0xFF800000> : vector<4x16xf32>
    %42 = vector.multi_reduction <maximumf>, %41, %cst_23 [2] : vector<4x16x16xf32> to vector<4x16xf32>
    %43 = vector.shape_cast %42 : vector<4x16xf32> to vector<4x16x1xf32>
    %44 = vector.broadcast %43 : vector<4x16x1xf32> to vector<4x16x16xf32>
    %45 = arith.subf %41, %44 : vector<4x16x16xf32>
    %46 = math.exp %45 : vector<4x16x16xf32>
    %cst_24 = arith.constant dense<0.000000e+00> : vector<4x16xf32>
    %47 = vector.multi_reduction <add>, %46, %cst_24 [2] : vector<4x16x16xf32> to vector<4x16xf32>
    %48 = vector.shape_cast %47 : vector<4x16xf32> to vector<4x16x1xf32>
    %49 = tpu.reciprocal %48 {approx = true} : vector<4x16x1xf32> -> vector<4x16x1xf32>
    %50 = vector.broadcast %49 : vector<4x16x1xf32> to vector<4x16x16xf32>
    %51 = arith.mulf %46, %50 : vector<4x16x16xf32>
    "tpu.trace_start"() <{level = 10 : i32, message = "wnm,wmd->wnd"}> : () -> ()
    %cst_25 = arith.constant dense<0.000000e+00> : vector<4x16x8xf32>
    %52 = tpu.matmul %51, %37, %cst_25 {dimension_numbers = #tpu.dot_dimension_numbers<[2], [1], [1], [2], [0, 0, 0, 1, 1, 2], [0], [0]>} : vector<4x16x16xf32>, vector<4x16x8xf32>, vector<4x16x8xf32> -> vector<4x16x8xf32>
    "tpu.trace_stop"() : () -> ()
    %53 = vector.shape_cast %52 : vector<4x16x8xf32> to vector<64x8xf32>
    %54 = vector.extract_strided_slice %33 {offsets = [0, 0], sizes = [8, 32], strides = [1, 1]} : vector<32x32xf32> to vector<8x32xf32>
    %cst_26 = arith.constant dense<0.000000e+00> : vector<64x32xf32>
    %55 = tpu.matmul %53, %54, %cst_26 {dimension_numbers = #tpu.dot_dimension_numbers<[1], [0], [0], [1], [0, 0, 1, 1], [], []>} : vector<64x8xf32>, vector<8x32xf32>, vector<64x32xf32> -> vector<64x32xf32>
    %56 = arith.addf %34, %55 : vector<64x32xf32>
    %57 = vector.extract_strided_slice %31 {offsets = [0, 0, 8], sizes = [4, 16, 8], strides = [1, 1, 1]} : vector<4x16x96xf32> to vector<4x16x8xf32>
    %58 = vector.extract_strided_slice %31 {offsets = [0, 0, 40], sizes = [4, 16, 8], strides = [1, 1, 1]} : vector<4x16x96xf32> to vector<4x16x8xf32>
    %59 = vector.extract_strided_slice %31 {offsets = [0, 0, 72], sizes = [4, 16, 8], strides = [1, 1, 1]} : vector<4x16x96xf32> to vector<4x16x8xf32>
    "tpu.trace_start"() <{level = 10 : i32, message = "wnd,wmd->wnm"}> : () -> ()
    %cst_27 = arith.constant dense<0.000000e+00> : vector<4x16x16xf32>
    %60 = tpu.matmul %57, %58, %cst_27 {dimension_numbers = #tpu.dot_dimension_numbers<[2], [2], [1], [1], [0, 0, 0, 1, 1, 1], [0], [0]>} : vector<4x16x8xf32>, vector<4x16x8xf32>, vector<4x16x16xf32> -> vector<4x16x16xf32>
    "tpu.trace_stop"() : () -> ()
    %61 = vector.extract_strided_slice %32 {offsets = [1, 0, 0, 0], sizes = [1, 4, 16, 16], strides = [1, 1, 1, 1]} : vector<4x4x16x16xf32> to vector<1x4x16x16xf32>
    %62 = vector.shape_cast %61 : vector<1x4x16x16xf32> to vector<4x16x16xf32>
    %63 = arith.addf %60, %62 : vector<4x16x16xf32>
    %cst_28 = arith.constant dense<0xFF800000> : vector<4x16xf32>
    %64 = vector.multi_reduction <maximumf>, %63, %cst_28 [2] : vector<4x16x16xf32> to vector<4x16xf32>
    %65 = vector.shape_cast %64 : vector<4x16xf32> to vector<4x16x1xf32>
    %66 = vector.broadcast %65 : vector<4x16x1xf32> to vector<4x16x16xf32>
    %67 = arith.subf %63, %66 : vector<4x16x16xf32>
    %68 = math.exp %67 : vector<4x16x16xf32>
    %cst_29 = arith.constant dense<0.000000e+00> : vector<4x16xf32>
    %69 = vector.multi_reduction <add>, %68, %cst_29 [2] : vector<4x16x16xf32> to vector<4x16xf32>
    %70 = vector.shape_cast %69 : vector<4x16xf32> to vector<4x16x1xf32>
    %71 = tpu.reciprocal %70 {approx = true} : vector<4x16x1xf32> -> vector<4x16x1xf32>
    %72 = vector.broadcast %71 : vector<4x16x1xf32> to vector<4x16x16xf32>
    %73 = arith.mulf %68, %72 : vector<4x16x16xf32>
    "tpu.trace_start"() <{level = 10 : i32, message = "wnm,wmd->wnd"}> : () -> ()
    %cst_30 = arith.constant dense<0.000000e+00> : vector<4x16x8xf32>
    %74 = tpu.matmul %73, %59, %cst_30 {dimension_numbers = #tpu.dot_dimension_numbers<[2], [1], [1], [2], [0, 0, 0, 1, 1, 2], [0], [0]>} : vector<4x16x16xf32>, vector<4x16x8xf32>, vector<4x16x8xf32> -> vector<4x16x8xf32>
    "tpu.trace_stop"() : () -> ()
    %75 = vector.shape_cast %74 : vector<4x16x8xf32> to vector<64x8xf32>
    %76 = vector.extract_strided_slice %33 {offsets = [8, 0], sizes = [8, 32], strides = [1, 1]} : vector<32x32xf32> to vector<8x32xf32>
    %cst_31 = arith.constant dense<0.000000e+00> : vector<64x32xf32>
    %77 = tpu.matmul %75, %76, %cst_31 {dimension_numbers = #tpu.dot_dimension_numbers<[1], [0], [0], [1], [0, 0, 1, 1], [], []>} : vector<64x8xf32>, vector<8x32xf32>, vector<64x32xf32> -> vector<64x32xf32>
    %78 = arith.addf %56, %77 : vector<64x32xf32>
    %79 = vector.extract_strided_slice %31 {offsets = [0, 0, 16], sizes = [4, 16, 8], strides = [1, 1, 1]} : vector<4x16x96xf32> to vector<4x16x8xf32>
    %80 = vector.extract_strided_slice %31 {offsets = [0, 0, 48], sizes = [4, 16, 8], strides = [1, 1, 1]} : vector<4x16x96xf32> to vector<4x16x8xf32>
    %81 = vector.extract_strided_slice %31 {offsets = [0, 0, 80], sizes = [4, 16, 8], strides = [1, 1, 1]} : vector<4x16x96xf32> to vector<4x16x8xf32>
    "tpu.trace_start"() <{level = 10 : i32, message = "wnd,wmd->wnm"}> : () -> ()
    %cst_32 = arith.constant dense<0.000000e+00> : vector<4x16x16xf32>
    %82 = tpu.matmul %79, %80, %cst_32 {dimension_numbers = #tpu.dot_dimension_numbers<[2], [2], [1], [1], [0, 0, 0, 1, 1, 1], [0], [0]>} : vector<4x16x8xf32>, vector<4x16x8xf32>, vector<4x16x16xf32> -> vector<4x16x16xf32>
    "tpu.trace_stop"() : () -> ()
    %83 = vector.extract_strided_slice %32 {offsets = [2, 0, 0, 0], sizes = [1, 4, 16, 16], strides = [1, 1, 1, 1]} : vector<4x4x16x16xf32> to vector<1x4x16x16xf32>
    %84 = vector.shape_cast %83 : vector<1x4x16x16xf32> to vector<4x16x16xf32>
    %85 = arith.addf %82, %84 : vector<4x16x16xf32>
    %cst_33 = arith.constant dense<0xFF800000> : vector<4x16xf32>
    %86 = vector.multi_reduction <maximumf>, %85, %cst_33 [2] : vector<4x16x16xf32> to vector<4x16xf32>
    %87 = vector.shape_cast %86 : vector<4x16xf32> to vector<4x16x1xf32>
    %88 = vector.broadcast %87 : vector<4x16x1xf32> to vector<4x16x16xf32>
    %89 = arith.subf %85, %88 : vector<4x16x16xf32>
    %90 = math.exp %89 : vector<4x16x16xf32>
    %cst_34 = arith.constant dense<0.000000e+00> : vector<4x16xf32>
    %91 = vector.multi_reduction <add>, %90, %cst_34 [2] : vector<4x16x16xf32> to vector<4x16xf32>
    %92 = vector.shape_cast %91 : vector<4x16xf32> to vector<4x16x1xf32>
    %93 = tpu.reciprocal %92 {approx = true} : vector<4x16x1xf32> -> vector<4x16x1xf32>
    %94 = vector.broadcast %93 : vector<4x16x1xf32> to vector<4x16x16xf32>
    %95 = arith.mulf %90, %94 : vector<4x16x16xf32>
    "tpu.trace_start"() <{level = 10 : i32, message = "wnm,wmd->wnd"}> : () -> ()
    %cst_35 = arith.constant dense<0.000000e+00> : vector<4x16x8xf32>
    %96 = tpu.matmul %95, %81, %cst_35 {dimension_numbers = #tpu.dot_dimension_numbers<[2], [1], [1], [2], [0, 0, 0, 1, 1, 2], [0], [0]>} : vector<4x16x16xf32>, vector<4x16x8xf32>, vector<4x16x8xf32> -> vector<4x16x8xf32>
    "tpu.trace_stop"() : () -> ()
    %97 = vector.shape_cast %96 : vector<4x16x8xf32> to vector<64x8xf32>
    %98 = vector.extract_strided_slice %33 {offsets = [16, 0], sizes = [8, 32], strides = [1, 1]} : vector<32x32xf32> to vector<8x32xf32>
    %cst_36 = arith.constant dense<0.000000e+00> : vector<64x32xf32>
    %99 = tpu.matmul %97, %98, %cst_36 {dimension_numbers = #tpu.dot_dimension_numbers<[1], [0], [0], [1], [0, 0, 1, 1], [], []>} : vector<64x8xf32>, vector<8x32xf32>, vector<64x32xf32> -> vector<64x32xf32>
    %100 = arith.addf %78, %99 : vector<64x32xf32>
    %101 = vector.extract_strided_slice %31 {offsets = [0, 0, 24], sizes = [4, 16, 8], strides = [1, 1, 1]} : vector<4x16x96xf32> to vector<4x16x8xf32>
    %102 = vector.extract_strided_slice %31 {offsets = [0, 0, 56], sizes = [4, 16, 8], strides = [1, 1, 1]} : vector<4x16x96xf32> to vector<4x16x8xf32>
    %103 = vector.extract_strided_slice %31 {offsets = [0, 0, 88], sizes = [4, 16, 8], strides = [1, 1, 1]} : vector<4x16x96xf32> to vector<4x16x8xf32>
    "tpu.trace_start"() <{level = 10 : i32, message = "wnd,wmd->wnm"}> : () -> ()
    %cst_37 = arith.constant dense<0.000000e+00> : vector<4x16x16xf32>
    %104 = tpu.matmul %101, %102, %cst_37 {dimension_numbers = #tpu.dot_dimension_numbers<[2], [2], [1], [1], [0, 0, 0, 1, 1, 1], [0], [0]>} : vector<4x16x8xf32>, vector<4x16x8xf32>, vector<4x16x16xf32> -> vector<4x16x16xf32>
    "tpu.trace_stop"() : () -> ()
    %105 = vector.extract_strided_slice %32 {offsets = [3, 0, 0, 0], sizes = [1, 4, 16, 16], strides = [1, 1, 1, 1]} : vector<4x4x16x16xf32> to vector<1x4x16x16xf32>
    %106 = vector.shape_cast %105 : vector<1x4x16x16xf32> to vector<4x16x16xf32>
    %107 = arith.addf %104, %106 : vector<4x16x16xf32>
    %cst_38 = arith.constant dense<0xFF800000> : vector<4x16xf32>
    %108 = vector.multi_reduction <maximumf>, %107, %cst_38 [2] : vector<4x16x16xf32> to vector<4x16xf32>
    %109 = vector.shape_cast %108 : vector<4x16xf32> to vector<4x16x1xf32>
    %110 = vector.broadcast %109 : vector<4x16x1xf32> to vector<4x16x16xf32>
    %111 = arith.subf %107, %110 : vector<4x16x16xf32>
    %112 = math.exp %111 : vector<4x16x16xf32>
    %cst_39 = arith.constant dense<0.000000e+00> : vector<4x16xf32>
    %113 = vector.multi_reduction <add>, %112, %cst_39 [2] : vector<4x16x16xf32> to vector<4x16xf32>
    %114 = vector.shape_cast %113 : vector<4x16xf32> to vector<4x16x1xf32>
    %115 = tpu.reciprocal %114 {approx = true} : vector<4x16x1xf32> -> vector<4x16x1xf32>
    %116 = vector.broadcast %115 : vector<4x16x1xf32> to vector<4x16x16xf32>
    %117 = arith.mulf %112, %116 : vector<4x16x16xf32>
    "tpu.trace_start"() <{level = 10 : i32, message = "wnm,wmd->wnd"}> : () -> ()
    %cst_40 = arith.constant dense<0.000000e+00> : vector<4x16x8xf32>
    %118 = tpu.matmul %117, %103, %cst_40 {dimension_numbers = #tpu.dot_dimension_numbers<[2], [1], [1], [2], [0, 0, 0, 1, 1, 2], [0], [0]>} : vector<4x16x16xf32>, vector<4x16x8xf32>, vector<4x16x8xf32> -> vector<4x16x8xf32>
    "tpu.trace_stop"() : () -> ()
    %119 = vector.shape_cast %118 : vector<4x16x8xf32> to vector<64x8xf32>
    %120 = vector.extract_strided_slice %33 {offsets = [24, 0], sizes = [8, 32], strides = [1, 1]} : vector<32x32xf32> to vector<8x32xf32>
    %cst_41 = arith.constant dense<0.000000e+00> : vector<64x32xf32>
    %121 = tpu.matmul %119, %120, %cst_41 {dimension_numbers = #tpu.dot_dimension_numbers<[1], [0], [0], [1], [0, 0, 1, 1], [], []>} : vector<64x8xf32>, vector<8x32xf32>, vector<64x32xf32> -> vector<64x32xf32>
    %122 = arith.addf %100, %121 : vector<64x32xf32>
    %c0_42 = arith.constant 0 : index
    %c0_43 = arith.constant 0 : index
    %123 = vector.load %arg8[%c0_42, %c0_43] : memref<1x32xf32, #tpu.memory_space<vmem>>, vector<1x32xf32>
    %124 = vector.broadcast %123 : vector<1x32xf32> to vector<64x32xf32>
    %125 = arith.addf %122, %124 : vector<64x32xf32>
    %126 = arith.addf %125, %1 : vector<64x32xf32>
    %c0_44 = arith.constant 0 : index
    %c0_45 = arith.constant 0 : index
    %c0_46 = arith.constant 0 : index
    %127 = vector.load %arg9[%c0_44, %c0_45, %c0_46] : memref<1x64x32xf32, #tpu.memory_space<vmem>>, vector<1x64x32xf32>
    %128 = vector.shape_cast %127 : vector<1x64x32xf32> to vector<64x32xf32>
    %129 = vector.shape_cast %126 : vector<64x32xf32> to vector<1x64x32xf32>
    tpu.vector_store %arg9[%c0_44, %c0_45, %c0_46], %129 {strides = array<i32>} : memref<1x64x32xf32, #tpu.memory_space<vmem>>, vector<1x64x32xf32>,
    return
  }
  func.func @transform_0(%arg0: i32) -> (i32, i32, i32) {
    %c0_i32 = arith.constant 0 : i32
    %c0_i32_0 = arith.constant 0 : i32
    %c0_i32_1 = arith.constant 0 : i32
    return %arg0, %c0_i32, %c0_i32_0 : i32, i32, i32
  }
  func.func @transform_1(%arg0: i32) -> (i32, i32) {
    %c0_i32 = arith.constant 0 : i32
    %c0_i32_0 = arith.constant 0 : i32
    %c0_i32_1 = arith.constant 0 : i32
    return %c0_i32, %c0_i32_0 : i32, i32
  }
  func.func @transform_2(%arg0: i32) -> (i32, i32) {
    %c0_i32 = arith.constant 0 : i32
    %c0_i32_0 = arith.constant 0 : i32
    %c0_i32_1 = arith.constant 0 : i32
    return %c0_i32, %c0_i32_0 : i32, i32
  }
  func.func @transform_3(%arg0: i32) -> (i32, i32) {
    %c0_i32 = arith.constant 0 : i32
    %c0_i32_0 = arith.constant 0 : i32
    %c0_i32_1 = arith.constant 0 : i32
    return %c0_i32, %c0_i32_0 : i32, i32
  }
  func.func @transform_4(%arg0: i32) -> (i32, i32) {
    %c0_i32 = arith.constant 0 : i32
    %c0_i32_0 = arith.constant 0 : i32
    %c0_i32_1 = arith.constant 0 : i32
    return %c0_i32, %c0_i32_0 : i32, i32
  }
  func.func @transform_5(%arg0: i32) -> (i32, i32, i32, i32) {
    %c0_i32 = arith.constant 0 : i32
    %c0_i32_0 = arith.constant 0 : i32
    %c0_i32_1 = arith.constant 0 : i32
    %c0_i32_2 = arith.constant 0 : i32
    %c0_i32_3 = arith.constant 0 : i32
    return %c0_i32, %c0_i32_0, %c0_i32_1, %c0_i32_2 : i32, i32, i32, i32
  }
  func.func @transform_6(%arg0: i32) -> (i32, i32) {
    %c0_i32 = arith.constant 0 : i32
    %c0_i32_0 = arith.constant 0 : i32
    %c0_i32_1 = arith.constant 0 : i32
    return %c0_i32, %c0_i32_0 : i32, i32
  }
  func.func @transform_7(%arg0: i32) -> (i32, i32) {
    %c0_i32 = arith.constant 0 : i32
    %c0_i32_0 = arith.constant 0 : i32
    %c0_i32_1 = arith.constant 0 : i32
    return %c0_i32, %c0_i32_0 : i32, i32
  }
  func.func @transform_8(%arg0: i32) -> (i32, i32, i32) {
    %c0_i32 = arith.constant 0 : i32
    %c0_i32_0 = arith.constant 0 : i32
    %c0_i32_1 = arith.constant 0 : i32
    return %arg0, %c0_i32, %c0_i32_0 : i32, i32, i32
  }
}

module attributes {stable_mosaic.version = 11 : i64} {
  func.func @_norm2_mlp_kernel(%arg0: i32, %arg1: memref<1x65x32xf32, #tpu.memory_space<vmem>>, %arg2: memref<1x32xf32, #tpu.memory_space<vmem>>, %arg3: memref<1x32xf32, #tpu.memory_space<vmem>>, %arg4: memref<32x128xf32, #tpu.memory_space<vmem>>, %arg5: memref<1x128xf32, #tpu.memory_space<vmem>>, %arg6: memref<128x32xf32, #tpu.memory_space<vmem>>, %arg7: memref<1x32xf32, #tpu.memory_space<vmem>>, %arg8: memref<1x65x32xf32, #tpu.memory_space<vmem>>) attributes {dimension_semantics = [#tpu.dimension_semantics<parallel>], iteration_bounds = array<i64: 2>, scalar_prefetch = 0 : i64, scratch_operands = 0 : i64, tpu.core_type = #tpu.core_type<tc>, window_params = [{transform_indices = @transform_0, window_bounds = array<i64: 1, 65, 32>}, {pipeline_mode = #tpu.pipeline_mode<synchronous>, transform_indices = @transform_1, window_bounds = array<i64: 1, 32>}, {pipeline_mode = #tpu.pipeline_mode<synchronous>, transform_indices = @transform_2, window_bounds = array<i64: 1, 32>}, {pipeline_mode = #tpu.pipeline_mode<synchronous>, transform_indices = @transform_3, window_bounds = array<i64: 32, 128>}, {pipeline_mode = #tpu.pipeline_mode<synchronous>, transform_indices = @transform_4, window_bounds = array<i64: 1, 128>}, {pipeline_mode = #tpu.pipeline_mode<synchronous>, transform_indices = @transform_5, window_bounds = array<i64: 128, 32>}, {pipeline_mode = #tpu.pipeline_mode<synchronous>, transform_indices = @transform_6, window_bounds = array<i64: 1, 32>}, {transform_indices = @transform_7, window_bounds = array<i64: 1, 65, 32>}]} {
    %c0 = arith.constant 0 : index
    %c0_0 = arith.constant 0 : index
    %c0_1 = arith.constant 0 : index
    %0 = vector.load %arg1[%c0, %c0_0, %c0_1] : memref<1x65x32xf32, #tpu.memory_space<vmem>>, vector<1x65x32xf32>
    %1 = vector.shape_cast %0 : vector<1x65x32xf32> to vector<65x32xf32>
    %cst = arith.constant dense<0.000000e+00> : vector<65xf32>
    %2 = vector.multi_reduction <add>, %1, %cst [1] : vector<65x32xf32> to vector<65xf32>
    %3 = vector.shape_cast %2 : vector<65xf32> to vector<65x1xf32>
    %cst_2 = arith.constant 3.200000e+01 : f32
    %4 = vector.broadcast %cst_2 : f32 to vector<65x1xf32>
    %5 = arith.divf %3, %4 : vector<65x1xf32>
    %6 = vector.broadcast %5 : vector<65x1xf32> to vector<65x32xf32>
    %7 = arith.subf %1, %6 : vector<65x32xf32>
    %8 = arith.mulf %7, %7 : vector<65x32xf32>
    %cst_3 = arith.constant dense<0.000000e+00> : vector<65xf32>
    %9 = vector.multi_reduction <add>, %8, %cst_3 [1] : vector<65x32xf32> to vector<65xf32>
    %10 = vector.shape_cast %9 : vector<65xf32> to vector<65x1xf32>
    %cst_4 = arith.constant 3.200000e+01 : f32
    %11 = vector.broadcast %cst_4 : f32 to vector<65x1xf32>
    %12 = arith.divf %10, %11 : vector<65x1xf32>
    %13 = vector.broadcast %5 : vector<65x1xf32> to vector<65x32xf32>
    %14 = arith.subf %1, %13 : vector<65x32xf32>
    %cst_5 = arith.constant 9.99999974E-6 : f32
    %15 = vector.broadcast %cst_5 : f32 to vector<65x1xf32>
    %16 = arith.addf %12, %15 : vector<65x1xf32>
    %17 = math.rsqrt %16 : vector<65x1xf32>
    %18 = vector.broadcast %17 : vector<65x1xf32> to vector<65x32xf32>
    %19 = arith.mulf %14, %18 : vector<65x32xf32>
    %c0_6 = arith.constant 0 : index
    %c0_7 = arith.constant 0 : index
    %20 = vector.load %arg2[%c0_6, %c0_7] : memref<1x32xf32, #tpu.memory_space<vmem>>, vector<1x32xf32>
    %21 = vector.broadcast %20 : vector<1x32xf32> to vector<65x32xf32>
    %22 = arith.mulf %19, %21 : vector<65x32xf32>
    %c0_8 = arith.constant 0 : index
    %c0_9 = arith.constant 0 : index
    %23 = vector.load %arg3[%c0_8, %c0_9] : memref<1x32xf32, #tpu.memory_space<vmem>>, vector<1x32xf32>
    %24 = vector.broadcast %23 : vector<1x32xf32> to vector<65x32xf32>
    %25 = arith.addf %22, %24 : vector<65x32xf32>
    %c0_10 = arith.constant 0 : index
    %c0_11 = arith.constant 0 : index
    %26 = vector.load %arg4[%c0_10, %c0_11] : memref<32x128xf32, #tpu.memory_space<vmem>>, vector<32x128xf32>
    %cst_12 = arith.constant dense<0.000000e+00> : vector<65x128xf32>
    %27 = tpu.matmul %25, %26, %cst_12 {dimension_numbers = #tpu.dot_dimension_numbers<[1], [0], [0], [1], [0, 0, 1, 1], [], []>} : vector<65x32xf32>, vector<32x128xf32>, vector<65x128xf32> -> vector<65x128xf32>
    %c0_13 = arith.constant 0 : index
    %c0_14 = arith.constant 0 : index
    %28 = vector.load %arg5[%c0_13, %c0_14] : memref<1x128xf32, #tpu.memory_space<vmem>>, vector<1x128xf32>
    %29 = vector.broadcast %28 : vector<1x128xf32> to vector<65x128xf32>
    %30 = arith.addf %27, %29 : vector<65x128xf32>
    %cst_15 = arith.constant 5.000000e-01 : f32
    %31 = vector.broadcast %cst_15 : f32 to vector<65x128xf32>
    %32 = arith.mulf %31, %30 : vector<65x128xf32>
    %cst_16 = arith.constant 0.707106769 : f32
    %33 = vector.broadcast %cst_16 : f32 to vector<65x128xf32>
    %34 = arith.mulf %30, %33 : vector<65x128xf32>
    %35 = math.erf %34 : vector<65x128xf32>
    %cst_17 = arith.constant 1.000000e+00 : f32
    %36 = vector.broadcast %cst_17 : f32 to vector<65x128xf32>
    %37 = arith.addf %36, %35 : vector<65x128xf32>
    %38 = arith.mulf %32, %37 : vector<65x128xf32>
    %c0_18 = arith.constant 0 : index
    %c0_19 = arith.constant 0 : index
    %39 = vector.load %arg6[%c0_18, %c0_19] : memref<128x32xf32, #tpu.memory_space<vmem>>, vector<128x32xf32>
    %cst_20 = arith.constant dense<0.000000e+00> : vector<65x32xf32>
    %40 = tpu.matmul %38, %39, %cst_20 {dimension_numbers = #tpu.dot_dimension_numbers<[1], [0], [0], [1], [0, 0, 1, 1], [], []>} : vector<65x128xf32>, vector<128x32xf32>, vector<65x32xf32> -> vector<65x32xf32>
    %c0_21 = arith.constant 0 : index
    %c0_22 = arith.constant 0 : index
    %41 = vector.load %arg7[%c0_21, %c0_22] : memref<1x32xf32, #tpu.memory_space<vmem>>, vector<1x32xf32>
    %42 = vector.broadcast %41 : vector<1x32xf32> to vector<65x32xf32>
    %43 = arith.addf %40, %42 : vector<65x32xf32>
    %44 = arith.addf %25, %43 : vector<65x32xf32>
    %c0_23 = arith.constant 0 : index
    %c0_24 = arith.constant 0 : index
    %c0_25 = arith.constant 0 : index
    %45 = vector.load %arg8[%c0_23, %c0_24, %c0_25] : memref<1x65x32xf32, #tpu.memory_space<vmem>>, vector<1x65x32xf32>
    %46 = vector.shape_cast %45 : vector<1x65x32xf32> to vector<65x32xf32>
    %47 = vector.shape_cast %44 : vector<65x32xf32> to vector<1x65x32xf32>
    tpu.vector_store %arg8[%c0_23, %c0_24, %c0_25], %47 {strides = array<i32>} : memref<1x65x32xf32, #tpu.memory_space<vmem>>, vector<1x65x32xf32>,
    return
  }
  func.func @transform_0(%arg0: i32) -> (i32, i32, i32) {
    %c0_i32 = arith.constant 0 : i32
    %c0_i32_0 = arith.constant 0 : i32
    %c0_i32_1 = arith.constant 0 : i32
    return %arg0, %c0_i32, %c0_i32_0 : i32, i32, i32
  }
  func.func @transform_1(%arg0: i32) -> (i32, i32) {
    %c0_i32 = arith.constant 0 : i32
    %c0_i32_0 = arith.constant 0 : i32
    %c0_i32_1 = arith.constant 0 : i32
    return %c0_i32, %c0_i32_0 : i32, i32
  }
  func.func @transform_2(%arg0: i32) -> (i32, i32) {
    %c0_i32 = arith.constant 0 : i32
    %c0_i32_0 = arith.constant 0 : i32
    %c0_i32_1 = arith.constant 0 : i32
    return %c0_i32, %c0_i32_0 : i32, i32
  }
  func.func @transform_3(%arg0: i32) -> (i32, i32) {
    %c0_i32 = arith.constant 0 : i32
    %c0_i32_0 = arith.constant 0 : i32
    %c0_i32_1 = arith.constant 0 : i32
    return %c0_i32, %c0_i32_0 : i32, i32
  }
  func.func @transform_4(%arg0: i32) -> (i32, i32) {
    %c0_i32 = arith.constant 0 : i32
    %c0_i32_0 = arith.constant 0 : i32
    %c0_i32_1 = arith.constant 0 : i32
    return %c0_i32, %c0_i32_0 : i32, i32
  }
  func.func @transform_5(%arg0: i32) -> (i32, i32) {
    %c0_i32 = arith.constant 0 : i32
    %c0_i32_0 = arith.constant 0 : i32
    %c0_i32_1 = arith.constant 0 : i32
    return %c0_i32, %c0_i32_0 : i32, i32
  }
  func.func @transform_6(%arg0: i32) -> (i32, i32) {
    %c0_i32 = arith.constant 0 : i32
    %c0_i32_0 = arith.constant 0 : i32
    %c0_i32_1 = arith.constant 0 : i32
    return %c0_i32, %c0_i32_0 : i32, i32
  }
  func.func @transform_7(%arg0: i32) -> (i32, i32, i32) {
    %c0_i32 = arith.constant 0 : i32
    %c0_i32_0 = arith.constant 0 : i32
    %c0_i32_1 = arith.constant 0 : i32
    return %arg0, %c0_i32, %c0_i32_0 : i32, i32, i32
  }
}

</mosaic_0001>

<bundles_post_ra>
// kernel: swin_block_forward.3
= control target key start
LH: loop header
LB: loop body
LE: loop exit
PB: predicated region body
PF: predicated region fallthrough
CT: control target
= control target key end

     0   :  { %s1297_s24 = smov 0   ;;  %s1959_s0 = inlined_call_operand.vmem [shape: f32[2,65,32], index: 0, kind: input, shape index: {}]   ;;  %s1960_s1 = inlined_call_operand.vmem [shape: f32[1,32], index: 1, kind: input, shape index: {}]   ;;  %s1961_s2 = inlined_call_operand.vmem [shape: f32[1,32], index: 2, kind: input, shape index: {}]   ;;  %s1962_s3 = inlined_call_operand.vmem [shape: f32[32,128], index: 3, kind: input, shape index: {}]   ;;  %s1963_s4 = inlined_call_operand.vmem [shape: f32[1,128], index: 4, kind: input, shape index: {}]   ;;  %s1964_s5 = inlined_call_operand.vmem [shape: f32[128,32], index: 5, kind: input, shape index: {}]   ;;  %s1965_s6 = inlined_call_operand.vmem [shape: f32[1,32], index: 6, kind: input, shape index: {}]   ;;  %s1966_s7 = inlined_call_operand.vmem [shape: f32[2,65,32], index: 7, kind: output, shape index: {}]  }
   0x1 LB: > { %s1133_s25 = sadd.s32 4294967295, %s1254_s24   ;;  %p1137_p0 = scmp.ge.s32.totalorder %s1254_s24, 1  ;;  %s1254_s24 = sphi %s1297_s24, %s17_s24  }
   0x2   : > { %p237_p1 = scmp.lt.s32.totalorder %s1254_s24, 3 }
   0x4   : > { %p238_p2 = pnand %p1137_p0, %p237_p1 }
   0x5   : > { %p269_p3 = scmp.lt.s32.totalorder (!%p238_p2), %s1133_s25, 1 }
   0x6   : > { %241 = sbr.rel (%p238_p2) target bundleno = 680 (0x2a8), region = 48 }
   0xb   : > { %s1980_s25 = smov (!%p269_p3, %s1133_s25), 1  ;;  %vm288_vm0 = vcmask 261120   ;;  %vm313_vm1 = vcmask 253952   ;;  %v1256_v18 = vmov 32.0  }
   0xc   : > { %s1196_s26 = smul.u32 72, %s1980_s25  ;;  %1210 = vrcp.f32 %v1256_v18 }
   0xe   : > { %s273_s29 = scalar_lea.vmem %s1959_s0, %s1196_s26  ;;  %s1927_s17 = scalar_lea.vmem %s1966_s7, %s1196_s26 }
   0xf   : > { %v285_v0 = vld [vmem:[%s273_s29 + $0x30] sm:$0xff]  ;;  %v279_v2 = vld [vmem:[%s273_s29] sm:$0xff]  ;;  %v282_v7 = vld [vmem:[%s273_s29 + $0x18] sm:$0xff] }
  0x10   : > { %v281_v1 = vld [vmem:[%s273_s29 + $0x10] sm:$0xff]  ;;  %v307_v3 = vsel %vm288_vm0, %v285_v0, 0.0  ;;  %v289_v5 = vsel %vm288_vm0, %v279_v2, 0.0  ;;  %v283_v6 = vld [vmem:[%s273_s29 + $0x20] sm:$0xff]  ;;  %v280_v8 = vld [vmem:[%s273_s29 + $0x8] sm:$0xff]  ;;  %v298_v10 = vsel %vm288_vm0, %v282_v7, 0.0 }
  0x11   : > { %v295_v4 = vsel %vm288_vm0, %v281_v1, 0.0  ;;  %308 = vadd.xlane.f32.xlu2 %v307_v3  ;;  %290 = vadd.xlane.f32.xlu0 %v289_v5  ;;  %v301_v9 = vsel %vm288_vm0, %v283_v6, 0.0  ;;  %v292_v11 = vsel %vm288_vm0, %v280_v8, 0.0  ;;  %v287_v12 = vld [vmem:[%s273_s29 + $0x40] sm:$0x1]  ;;  %v284_v13 = vld [vmem:[%s273_s29 + $0x28] sm:$0xff] }
  0x12   : > { %296 = vadd.xlane.f32.xlu1 %v295_v4  ;;  %v286_v14 = vld [vmem:[%s273_s29 + $0x38] sm:$0xff]  ;;  %v314_v15 = vsel %vm313_vm1, %v287_v12, 0.0  ;;  %v304_v16 = vsel %vm288_vm0, %v284_v13, 0.0  ;;  %v1211_v19 = vpop.eup %1210 }
  0x13   : > { %v310_v17 = vsel %vm288_vm0, %v286_v14, 0.0  ;;  %v318_v20 = vmul.f32 32.0, %v1211_v19  ;;  %vm322_vm2 = vweird.f32 %v1211_v19 }
  0x15   : > { %v319_v21 = vsub.f32 1.0, %v318_v20 }
  0x17   : > { %v320_v22 = vmul.f32 %v1211_v19, %v319_v21 }
  0x19   : > { %302 = vadd.xlane.f32.xlu2 %v301_v9  ;;  %293 = vadd.xlane.f32.xlu0 %v292_v11  ;;  %v321_v23 = vadd.f32 %v1211_v19, %v320_v22 }
  0x1a   : > { %299 = vadd.xlane.f32.xlu1 %v298_v10  ;;  %v521_v10 = vld [vmem:[%s1962_s3] sm:$0xff] }
  0x1b   : > { %v1322_v24 = vsel %vm322_vm2, %v1211_v19, %v321_v23 }
  0x21   : > { %315 = vadd.xlane.f32.xlu2 %v314_v15  ;;  %311 = vadd.xlane.f32.xlu0 %v310_v17 }
  0x22   : > { %305 = vadd.xlane.f32.xlu1 %v304_v16 }
  0x84   : > { %v309_v25 = vpop.xlane.xlu2 %308  ;;  %v291_v28 = vpop.xlane.xlu0 %290 }
  0x85   : > { %v297_v26 = vpop.xlane.xlu1 %296  ;;  %v324_v29 = vmul.f32 %v1322_v24, %v291_v28  ;;  %v330_v41 = vmul.f32 %v1322_v24, %v309_v25 }
  0x86   : > { %v326_v27 = vmul.f32 %v1322_v24, %v297_v26 }
  0x87   : > { %v1328_v31 = vsub.f32 %v279_v2, %v324_v29  ;;  %v1350_v48 = vsub.f32 %v285_v0, %v330_v41 }
  0x88   : > { %v1326_v30 = vsub.f32 %v281_v1, %v326_v27 }
  0x89   : > { %v342_v33 = vmul.f32 %v1328_v31, %v1328_v31  ;;  %v348_v59 = vmul.f32 %v1350_v48, %v1350_v48 }
  0x8a   : > { %v344_v32 = vmul.f32 %v1326_v30, %v1326_v30 }
  0x8b   : > { %v351_v37 = vsel %vm288_vm0, %v342_v33, 0.0  ;;  %v369_v0 = vsel %vm288_vm0, %v348_v59, 0.0 }
  0x8c   : > { %v357_v34 = vsel %vm288_vm0, %v344_v32, 0.0  ;;  %v303_v35 = vpop.xlane.xlu2 %302  ;;  %352 = vadd.xlane.f32.xlu0 %v351_v37  ;;  %v294_v40 = vpop.xlane.xlu0 %293 }
  0x8d   : > { %358 = vadd.xlane.f32.xlu2 %v357_v34  ;;  %v300_v36 = vpop.xlane.xlu1 %299  ;;  %v328_v38 = vmul.f32 %v1322_v24, %v303_v35  ;;  %v325_v42 = vmul.f32 %v1322_v24, %v294_v40 }
  0x8e   : > { %v327_v39 = vmul.f32 %v1322_v24, %v300_v36 }
  0x8f   : > { %v1340_v43 = vsub.f32 %v283_v6, %v328_v38  ;;  %v1344_v45 = vsub.f32 %v280_v8, %v325_v42  ;;  %v524_v6 = vld [vmem:[%s1962_s3 + $0x18] sm:$0xff]  ;;  %v522_v8 = vld [vmem:[%s1962_s3 + $0x8] sm:$0xff] }
  0x90   : > { %v1342_v44 = vsub.f32 %v282_v7, %v327_v39  ;;  %568 = vmatpush.msra.mxu0 %v524_v6  ;;  %1160 = vmatpush.msra.mxu3 %v524_v6  ;;  %v523_v7 = vld [vmem:[%s1962_s3 + $0x10] sm:$0xff] }
  0x91   : > { %v346_v46 = vmul.f32 %v1340_v43, %v1340_v43  ;;  %v343_v49 = vmul.f32 %v1344_v45, %v1344_v45 }
  0x92   : > { %v345_v47 = vmul.f32 %v1342_v44, %v1342_v44  ;;  %569 = vmatpush.msra.mxu0 %v523_v7  ;;  %1161 = vmatpush.msra.mxu3 %v523_v7 }
  0x93   : > { %v363_v50 = vsel %vm288_vm0, %v346_v46, 0.0  ;;  %v354_v53 = vsel %vm288_vm0, %v343_v49, 0.0 }
  0x94   : > { %v360_v51 = vsel %vm288_vm0, %v345_v47, 0.0  ;;  %v316_v52 = vpop.xlane.xlu2 %315  ;;  %355 = vadd.xlane.f32.xlu1 %v354_v53  ;;  %v312_v56 = vpop.xlane.xlu0 %311  ;;  %570 = vmatpush.msra.mxu0 %v522_v8 }
  0x95   : > { %364 = vadd.xlane.f32.xlu2 %v363_v50  ;;  %v306_v54 = vpop.xlane.xlu1 %305  ;;  %v332_v55 = vmul.f32 %v1322_v24, %v316_v52  ;;  %361 = vadd.xlane.f32.xlu0 %v360_v51  ;;  %v331_v57 = vmul.f32 %v1322_v24, %v312_v56 }
  0x96   : > { %v329_v58 = vmul.f32 %v1322_v24, %v306_v54  ;;  %1162 = vmatpush.msra.mxu3 %v522_v8  ;;  %571 = vmatpush.msra.mxu0 %v521_v10 }
  0x97   : > { %v1362_v60 = vsub.f32 %v287_v12, %v332_v55  ;;  %v1364_v61 = vsub.f32 %v286_v14, %v331_v57  ;;  %v1427_v57 = vld [vmem:[%s1960_s1] ss:$0 sm:$0xff] }
  0x98   : > { %v1368_v63 = vsub.f32 %v284_v13, %v329_v58  ;;  %1163 = vmatpush.msra.mxu3 %v521_v10 }
  0x99   : > { %v350_v62 = vmul.f32 %v1362_v60, %v1362_v60  ;;  %v349_v1 = vmul.f32 %v1364_v61, %v1364_v61 }
  0x9a   : > { %v347_v4 = vmul.f32 %v1368_v63, %v1368_v63 }
  0x9b   : > { %v375_v2 = vsel %vm313_vm1, %v350_v62, 0.0  ;;  %v372_v3 = vsel %vm288_vm0, %v349_v1, 0.0 }
  0x9c   : > { %370 = vadd.xlane.f32.xlu1 %v369_v0  ;;  %v366_v5 = vsel %vm288_vm0, %v347_v4, 0.0 }
  0x9d   : > { %376 = vadd.xlane.f32.xlu2 %v375_v2  ;;  %373 = vadd.xlane.f32.xlu0 %v372_v3  ;;  %v1436_v2 = vld [vmem:[%s1961_s2] ss:$0 sm:$0xff] }
  0xa4   : > { %367 = vadd.xlane.f32.xlu1 %v366_v5 }
  0xff   : > { %v353_v12 = vpop.xlane.xlu0 %352 }
 0x100   : > { %v359_v9 = vpop.xlane.xlu2 %358  ;;  %v378_v13 = vmul.f32 %v353_v12, %v1322_v24 }
 0x101   : > { %v380_v11 = vmul.f32 %v359_v9, %v1322_v24 }
 0x102   : > { %v387_v15 = vadd.f32 1e-05, %v378_v13 }
 0x103   : > { %v1392_v14 = vadd.f32 1e-05, %v380_v11 }
 0x104   : > { %vm402_vm4 = vweird.f32 %v387_v15 }
 0x105   : > { %1212 = vrsqrt.f32 %v1392_v14  ;;  %vm422_vm6 = vweird.f32 %v1392_v14 }
 0x106   : > { %1214 = vrsqrt.f32 %v387_v15 }
 0x107   : > { %v356_v18 = vpop.xlane.xlu1 %355 }
 0x108   : > { %v365_v16 = vpop.xlane.xlu2 %364  ;;  %v362_v19 = vpop.xlane.xlu0 %361  ;;  %v379_v20 = vmul.f32 %v356_v18, %v1322_v24 }
 0x109   : > { %v382_v17 = vmul.f32 %v365_v16, %v1322_v24  ;;  %v381_v21 = vmul.f32 %v362_v19, %v1322_v24 }
 0x10a   : > { %v388_v25 = vadd.f32 1e-05, %v379_v20 }
 0x10b   : > { %v1398_v22 = vpop.eup %1212  ;;  %v1400_v26 = vadd.f32 1e-05, %v381_v21  ;;  %v1404_v29 = vadd.f32 1e-05, %v382_v17 }
 0x10c   : > { %v1215_v23 = vpop.eup %1214  ;;  %v417_v27 = vmul.f32 %v1398_v22, %v1392_v14  ;;  %1216 = vrsqrt.f32 %v388_v25  ;;  %vm423_vm7 = vweird.f32 %v1398_v22  ;;  %vm412_vm9 = vweird.f32 %v388_v25 }
 0x10d   : > { %v397_v28 = vmul.f32 %v1215_v23, %v387_v15  ;;  %1218 = vrsqrt.f32 %v1400_v26  ;;  %vm403_vm3 = vweird.f32 %v1215_v23  ;;  %vm1450_vm10 = vmor %vm422_vm6, %vm423_vm7  ;;  %vm432_vm12 = vweird.f32 %v1400_v26 }
 0x10e   : > { %v418_v34 = vmul.f32 %v1398_v22, %v417_v27  ;;  %1220 = vrsqrt.f32 %v1404_v29  ;;  %vm404_vm5 = vmor %vm402_vm4, %vm403_vm3  ;;  %vm442_vm7 = vweird.f32 %v1404_v29 }
 0x10f   : > { %v398_v32 = vmul.f32 %v1215_v23, %v397_v28  ;;  %v371_v37 = vpop.xlane.xlu1 %370 }
 0x110   : > { %v377_v33 = vpop.xlane.xlu2 %376  ;;  %v374_v38 = vpop.xlane.xlu0 %373  ;;  %v384_v39 = vmul.f32 %v371_v37, %v1322_v24  ;;  %v419_v50 = vmul.f32 0.5, %v418_v34 }
 0x111   : > { %v399_v35 = vmul.f32 0.5, %v398_v32  ;;  %v386_v36 = vmul.f32 %v377_v33, %v1322_v24  ;;  %v385_v47 = vmul.f32 %v374_v38, %v1322_v24 }
 0x112   : > { %v1217_v42 = vpop.eup %1216  ;;  %v1413_v46 = vadd.f32 1e-05, %v384_v39  ;;  %v420_v59 = vsub.f32 1.5, %v419_v50 }
 0x113   : > { %v400_v40 = vsub.f32 1.5, %v399_v35  ;;  %v1411_v41 = vadd.f32 1e-05, %v386_v36  ;;  %v1416_v49 = vpop.eup %1218  ;;  %v407_v52 = vmul.f32 %v1217_v42, %v388_v25  ;;  %v1429_v58 = vadd.f32 1e-05, %v385_v47 }
 0x114   : > { %v427_v53 = vmul.f32 %v1416_v49, %v1400_v26  ;;  %v1421_v54 = vpop.eup %1220  ;;  %vm413_vm8 = vweird.f32 %v1217_v42  ;;  %v421_v9 = vmul.f32 %v1398_v22, %v420_v59  ;;  %vm433_vm13 = vweird.f32 %v1416_v49 }
 0x115   : > { %v401_v51 = vmul.f32 %v1215_v23, %v400_v40  ;;  %1222 = vrsqrt.f32 %v1411_v41  ;;  %v408_v56 = vmul.f32 %v1217_v42, %v407_v52  ;;  %v437_v3 = vmul.f32 %v1421_v54, %v1404_v29  ;;  %vm414_vm11 = vmor %vm412_vm9, %vm413_vm8 }
 0x116   : > { %1224 = vrsqrt.f32 %v1413_v46  ;;  %v428_v4 = vmul.f32 %v1416_v49, %v427_v53  ;;  %v425_v21 = vsel %vm1450_vm10, %v1398_v22, %v421_v9  ;;  %vm462_vm14 = vweird.f32 %v1413_v46  ;;  %vm1482_vm4 = vmor %vm432_vm12, %vm433_vm13 }
 0x117   : > { %v405_v55 = vsel %vm404_vm5, %v1215_v23, %v401_v51  ;;  %v409_v62 = vmul.f32 0.5, %v408_v56  ;;  %v368_v0 = vpop.xlane.xlu1 %367  ;;  %1226 = vrsqrt.f32 %v1429_v58  ;;  %v438_v17 = vmul.f32 %v1421_v54, %v437_v3 }
 0x118   : > { %v486_v1 = vmul.f32 %v405_v55, %v1328_v31  ;;  %v383_v31 = vmul.f32 %v368_v0, %v1322_v24  ;;  %v429_v24 = vmul.f32 0.5, %v428_v4  ;;  %vm472_vm2 = vweird.f32 %v1429_v58 }
 0x119   : > { %v410_v6 = vsub.f32 1.5, %v409_v62  ;;  %v439_v33 = vmul.f32 0.5, %v438_v17  ;;  %v488_v37 = vmul.f32 %v425_v21, %v1326_v30  ;;  %vm443_vm8 = vweird.f32 %v1421_v54  ;;  %v1011_v17 = vld [vmem:[%s1964_s5 + $0x78] sm:$0xff] }
 0x11a   : > { %v499_v7 = vmul.f32 %v1427_v57, %v486_v1  ;;  %v1454_v12 = vadd.f32 1e-05, %v383_v31  ;;  %v430_v25 = vsub.f32 1.5, %v429_v24  ;;  %vm482_vm9 = vweird.f32 %v1411_v41  ;;  %1016 = vmatpush.msra.mxu1 %v1011_v17  ;;  %1164 = vmatpush.msra.mxu2 %v1011_v17 }
 0x11b   : > { %v1443_v5 = vpop.eup %1222  ;;  %v411_v11 = vmul.f32 %v1217_v42, %v410_v6  ;;  %v501_v51 = vmul.f32 %v1427_v57, %v488_v37  ;;  %v440_v53 = vsub.f32 1.5, %v439_v33  ;;  %1165 = vmatpush.msrb.mxu3 %v1011_v17 }
 0x11c   : > { %v1225_v8 = vpop.eup %1224  ;;  %v1457_v13 = vadd.f32 %v1436_v2, %v499_v7  ;;  %v477_v15 = vmul.f32 %v1443_v5, %v1411_v41  ;;  %1228 = vrsqrt.f32 %v1454_v12  ;;  %v431_v38 = vmul.f32 %v1416_v49, %v430_v25 }
 0x11d   : > { %v457_v16 = vmul.f32 %v1225_v8, %v1413_v46  ;;  %v415_v14 = vsel %vm414_vm11, %v1217_v42, %v411_v11  ;;  %v1227_v18 = vpop.eup %1226  ;;  %vm463_vm15 = vweird.f32 %v1225_v8  ;;  %vm483_vm10 = vweird.f32 %v1443_v5  ;;  %vm444_vm11 = vmor %vm442_vm7, %vm443_vm8 }
 0x11e   : > { %1140 = vmatmul.msk.f32.vlgmr.msra.gmra.mxu0 %vm288_vm0, %v1457_v13  ;;  %v487_v20 = vmul.f32 %v415_v14, %v1344_v45  ;;  %v467_v23 = vmul.f32 %v1227_v18, %v1429_v58  ;;  %v478_v27 = vmul.f32 %v1443_v5, %v477_v15  ;;  %vm473_vm3 = vweird.f32 %v1227_v18  ;;  %vm464_vm5 = vmor %vm462_vm14, %vm463_vm15  ;;  %v1008_v14 = vld [vmem:[%s1964_s5 + $0x60] sm:$0xff] }
 0x11f   : > { %v458_v19 = vmul.f32 %v1225_v8, %v457_v16  ;;  %vm1489_vm6 = vmor %vm472_vm2, %vm473_vm3  ;;  %v435_v55 = vsel %vm1482_vm4, %v1416_v49, %v431_v38  ;;  %v441_v1 = vmul.f32 %v1421_v54, %v440_v53  ;;  %vm452_vm13 = vweird.f32 %v1454_v12 }
 0x120   : > { %v500_v32 = vmul.f32 %v1427_v57, %v487_v20  ;;  %v468_v34 = vmul.f32 %v1227_v18, %v467_v23  ;;  %v479_v39 = vmul.f32 0.5, %v478_v27  ;;  %v489_v0 = vmul.f32 %v435_v55, %v1342_v44  ;;  %vm484_vm12 = vmor %vm482_vm9, %vm483_vm10  ;;  %v1007_v20 = vld [vmem:[%s1964_s5 + $0x58] sm:$0xff]  ;;  %v1006_v23 = vld [vmem:[%s1964_s5 + $0x50] sm:$0xff] }
 0x121   : > { %v459_v28 = vmul.f32 0.5, %v458_v19  ;;  %v445_v44 = vsel %vm444_vm11, %v1421_v54, %v441_v1  ;;  %v1005_v27 = vld [vmem:[%s1964_s5 + $0x48] sm:$0xff] }
 0x122   : > { %v1477_v45 = vadd.f32 %v1436_v2, %v500_v32  ;;  %v1229_v22 = vpop.eup %1228  ;;  %v469_v36 = vmul.f32 0.5, %v468_v34  ;;  %v480_v56 = vsub.f32 1.5, %v479_v39  ;;  %v502_v41 = vmul.f32 %v1427_v57, %v489_v0  ;;  %v1004_v32 = vld [vmem:[%s1964_s5 + $0x40] sm:$0xff] }
 0x123   : > { %v460_v35 = vsub.f32 1.5, %v459_v28  ;;  %v447_v42 = vmul.f32 %v1229_v22, %v1454_v12  ;;  %vm453_vm14 = vweird.f32 %v1229_v22  ;;  %v490_v9 = vmul.f32 %v445_v44, %v1340_v43 }
 0x124   : > { %v470_v46 = vsub.f32 1.5, %v469_v36  ;;  %v481_v3 = vmul.f32 %v1443_v5, %v480_v56  ;;  %v1525_v7 = vadd.f32 %v1436_v2, %v502_v41  ;;  %vm454_vm15 = vmor %vm452_vm13, %vm453_vm14 }
 0x125   : > { %v461_v40 = vmul.f32 %v1225_v8, %v460_v35  ;;  %v448_v58 = vmul.f32 %v1229_v22, %v447_v42  ;;  %v503_v54 = vmul.f32 %v1427_v57, %v490_v9  ;;  %v1002_v42 = vld [vmem:[%s1964_s5 + $0x30] sm:$0xff] }
 0x126   : > { %1141 = vmatmul.msk.f32.gmra.mxu0 %vm288_vm0, %v1477_v45  ;;  %v471_v30 = vmul.f32 %v1227_v18, %v470_v46 }
 0x127   : > { %v465_v47 = vsel %vm464_vm5, %v1225_v8, %v461_v40  ;;  %v449_v4 = vmul.f32 0.5, %v448_v58  ;;  %v1539_v24 = vadd.f32 %v1436_v2, %v503_v54  ;;  %v1000_v58 = vld [vmem:[%s1964_s5 + $0x20] sm:$0xff] }
 0x128   : > { %v492_v52 = vmul.f32 %v465_v47, %v1350_v48  ;;  %v475_v59 = vsel %vm1489_vm6, %v1227_v18, %v471_v30  ;;  %v1506_v48 = vadd.f32 %v1436_v2, %v501_v51  ;;  %v1001_v30 = vld [vmem:[%s1964_s5 + $0x28] sm:$0xff] }
 0x129   : > { %v493_v29 = vmul.f32 %v475_v59, %v1364_v61  ;;  %v485_v61 = vsel %vm484_vm12, %v1443_v5, %v481_v3  ;;  %v450_v31 = vsub.f32 1.5, %v449_v4  ;;  %v998_v4 = vld [vmem:[%s1964_s5 + $0x10] sm:$0xff] }
 0x12a   : > { %v505_v62 = vmul.f32 %v1427_v57, %v492_v52  ;;  %v494_v10 = vmul.f32 %v485_v61, %v1362_v60 }
 0x12b   : > { %v506_v6 = vmul.f32 %v1427_v57, %v493_v29  ;;  %v451_v11 = vmul.f32 %v1229_v22, %v450_v31  ;;  %v997_v31 = vld [vmem:[%s1964_s5 + $0x8] sm:$0xff] }
 0x12c   : > { %v1509_v49 = vadd.f32 %v1436_v2, %v505_v62  ;;  %v507_v5 = vmul.f32 %v1427_v57, %v494_v10  ;;  %v999_v62 = vld [vmem:[%s1964_s5 + $0x18] sm:$0xff] }
 0x12d   : > { %v1528_v8 = vadd.f32 %v1436_v2, %v506_v6  ;;  %v455_v12 = vsel %vm454_vm15, %v1229_v22, %v451_v11  ;;  %v1003_v22 = vld [vmem:[%s1964_s5 + $0x38] sm:$0xff] }
 0x12e   : > { %1142 = vmatmul.msk.f32.gmra.mxu0 %vm288_vm0, %v1506_v48  ;;  %1146 = vmatmul.msk.f32.vlgmr.msra.gmra.mxu3 %vm288_vm0, %v1509_v49  ;;  %v1542_v43 = vadd.f32 %v1436_v2, %v507_v5  ;;  %v491_v60 = vmul.f32 %v455_v12, %v1368_v63  ;;  %v1010_v63 = vld [vmem:[%s1964_s5 + $0x70] sm:$0xff]  ;;  %v996_v5 = vld [vmem:[%s1964_s5] sm:$0xff] }
 0x12f   : > { %1017 = vmatpush.msra.mxu1 %v1010_v63  ;;  %1166 = vmatpush.msra.mxu2 %v1010_v63 }
 0x130   : > { %v504_v15 = vmul.f32 %v1427_v57, %v491_v60  ;;  %v1564_v57 = vld [vmem:[%s1963_s4] ss:$0 sm:$0xff]  ;;  %1167 = vmatpush.msrb.mxu3 %v1010_v63 }
 0x132   : > { %v1551_v16 = vadd.f32 %v1436_v2, %v504_v15  ;;  %v1009_v2 = vld [vmem:[%s1964_s5 + $0x68] sm:$0xff] }
 0x133   : > { %1018 = vmatpush.msra.mxu1 %v1009_v2  ;;  %1168 = vmatpush.msra.mxu2 %v1009_v2 }
 0x134   : > { %1169 = vmatpush.msrb.mxu3 %v1009_v2 }
 0x135   : > { %1019 = vmatpush.msra.mxu1 %v1008_v14  ;;  %1170 = vmatpush.msra.mxu2 %v1008_v14 }
 0x136   : > { %1143 = vmatmul.msk.f32.gmra.mxu0 %vm288_vm0, %v1525_v7  ;;  %1147 = vmatmul.msk.f32.gmra.mxu3 %vm288_vm0, %v1528_v8 }
 0x137   : > { %1171 = vmatpush.msrb.mxu3 %v1008_v14  ;;  %1020 = vmatpush.msra.mxu1 %v1007_v20 }
 0x138   : > { %1172 = vmatpush.msra.mxu2 %v1007_v20 }
 0x139   : > { %1173 = vmatpush.msrb.mxu3 %v1007_v20  ;;  %1021 = vmatpush.msra.mxu1 %v1006_v23 }
 0x13a   : > { %1174 = vmatpush.msra.mxu2 %v1006_v23 }
 0x13b   : > { %1175 = vmatpush.msrb.mxu3 %v1006_v23  ;;  %1022 = vmatpush.msra.mxu1 %v1005_v27 }
 0x13c   : > { %1176 = vmatpush.msra.mxu2 %v1005_v27 }
 0x13d   : > { %1177 = vmatpush.msrb.mxu3 %v1005_v27  ;;  %1023 = vmatpush.msra.mxu1 %v1004_v32 }
 0x13e   : > { %1144 = vmatmul.msk.f32.gmra.mxu0 %vm288_vm0, %v1539_v24  ;;  %1148 = vmatmul.msk.f32.gmra.mxu3 %vm288_vm0, %v1542_v43 }
 0x13f   : > { %1178 = vmatpush.msra.mxu2 %v1004_v32  ;;  %1179 = vmatpush.msrb.mxu3 %v1004_v32 }
 0x140   : > { %1024 = vmatpush.msra.mxu1 %v1003_v22 }
 0x141   : > { %1180 = vmatpush.msra.mxu2 %v1003_v22  ;;  %1181 = vmatpush.msrb.mxu3 %v1003_v22 }
 0x142   : > { %1025 = vmatpush.msra.mxu1 %v1002_v42 }
 0x143   : > { %1182 = vmatpush.msra.mxu2 %v1002_v42  ;;  %1183 = vmatpush.msrb.mxu3 %v1002_v42 }
 0x144   : > { %1026 = vmatpush.msra.mxu1 %v1001_v30 }
 0x145   : > { %1184 = vmatpush.msra.mxu2 %v1001_v30  ;;  %1185 = vmatpush.msrb.mxu3 %v1001_v30 }
 0x146   : > { %1145 = vmatmul.msk.f32.gmra.mxu0 %vm288_vm0, %v1551_v16  ;;  %1027 = vmatpush.msra.mxu1 %v1000_v58 }
 0x147   : > { %1186 = vmatpush.msra.mxu2 %v1000_v58  ;;  %1187 = vmatpush.msrb.mxu3 %v1000_v58 }
 0x148   : > { %1028 = vmatpush.msra.mxu1 %v999_v62 }
 0x149   : > { %1188 = vmatpush.msra.mxu2 %v999_v62  ;;  %1189 = vmatpush.msrb.mxu3 %v999_v62 }
 0x14a   : > { %1029 = vmatpush.msra.mxu1 %v998_v4 }
 0x14b   : > { %1190 = vmatpush.msra.mxu2 %v998_v4  ;;  %1191 = vmatpush.msrb.mxu3 %v998_v4 }
 0x14c   : > { %1030 = vmatpush.msra.mxu1 %v997_v31 }
 0x14d   : > { %1192 = vmatpush.msra.mxu2 %v997_v31  ;;  %1193 = vmatpush.msrb.mxu3 %v997_v31 }
 0x14e   : > { %1031 = vmatpush.msra.mxu1 %v996_v5 }
 0x14f   : > { %1194 = vmatpush.msra.mxu2 %v996_v5  ;;  %1195 = vmatpush.msrb.mxu3 %v996_v5 }
 0x19b   : > { %v573_v18 = vpop.f32.mrf.mxu0 }
 0x19c   : > { %v1573_v19 = vadd.f32 %v1564_v57, %v573_v18 }
 0x19e   : > { %v1579_v21 = vmul.f32 0.70710677, %v1573_v19 }
 0x1a0   : > { %v618_v25 = vmul.f32 %v1579_v21, %v1579_v21 }
 0x1a2   : > { %v1589_v28 = vmin.f32 %v618_v25, 16.0 }
 0x1a3   : > { %v576_v33 = vpop.f32.mrf.mxu0 }
 0x1a4   : > { %v620_v34 = vmul.f32 2.1237322e-06, %v1589_v28  ;;  %v1596_v35 = vadd.f32 %v1564_v57, %v576_v33  ;;  %v631_v36 = vmul.f32 3.8918573e-05, %v1589_v28 }
 0x1a6   : > { %v621_v37 = vadd.f32 0.00028619796, %v620_v34  ;;  %v1603_v38 = vmul.f32 0.70710677, %v1596_v35  ;;  %v632_v26 = vadd.f32 0.001143296, %v631_v36 }
 0x1a8   : > { %v622_v39 = vmul.f32 %v621_v37, %v1589_v28  ;;  %v658_v40 = vmul.f32 %v1603_v38, %v1603_v38  ;;  %v633_v46 = vmul.f32 %v632_v26, %v1589_v28 }
 0x1aa   : > { %v623_v47 = vadd.f32 0.0036580483, %v622_v39  ;;  %v1612_v50 = vmin.f32 %v658_v40, 16.0  ;;  %v634_v52 = vadd.f32 0.014752088, %v633_v46 }
 0x1ab   : > { %v579_v51 = vpop.f32.mrf.mxu0 }
 0x1ac   : > { %v624_v53 = vmul.f32 %v623_v47, %v1589_v28  ;;  %v660_v55 = vmul.f32 2.1237322e-06, %v1612_v50  ;;  %v1620_v56 = vadd.f32 %v1564_v57, %v579_v51  ;;  %v635_v59 = vmul.f32 %v634_v52, %v1589_v28 }
 0x1ad   : > { %v671_v61 = vmul.f32 3.8918573e-05, %v1612_v50 }
 0x1ae   : > { %v661_v0 = vadd.f32 0.00028619796, %v660_v55  ;;  %v1630_v29 = vmul.f32 0.70710677, %v1620_v56  ;;  %v636_v1 = vadd.f32 0.112945676, %v635_v59 }
 0x1af   : > { %v625_v3 = vadd.f32 0.05243302, %v624_v53  ;;  %v672_v17 = vadd.f32 0.001143296, %v671_v61 }
 0x1b0   : > { %v698_v41 = vmul.f32 %v1630_v29, %v1630_v29  ;;  %v637_v44 = vmul.f32 %v636_v1, %v1589_v28  ;;  %v662_v9 = vmul.f32 %v661_v0, %v1612_v50 }
 0x1b1   : > { %v591_v6 = vpop.f32.mrf.mxu3  ;;  %v626_v54 = vmul.f32 %v625_v3, %v1589_v28  ;;  %v673_v32 = vmul.f32 %v672_v17, %v1612_v50 }
 0x1b2   : > { %v638_v11 = vadd.f32 0.4994258, %v637_v44  ;;  %v1647_v12 = vmin.f32 %v698_v41, 16.0  ;;  %v663_v63 = vadd.f32 0.0036580483, %v662_v9  ;;  %v1659_v20 = vadd.f32 %v1564_v57, %v591_v6 }
 0x1b3   : > { %v582_v10 = vpop.f32.mrf.mxu0  ;;  %v627_v18 = vadd.f32 0.18741608, %v626_v54  ;;  %v674_v46 = vadd.f32 0.014752088, %v673_v32 }
 0x1b4   : > { %v1650_v60 = vadd.f32 %v1564_v57, %v582_v10  ;;  %v639_v15 = vmul.f32 %v638_v11, %v1589_v28  ;;  %v700_v23 = vmul.f32 2.1237322e-06, %v1647_v12  ;;  %v664_v34 = vmul.f32 %v663_v63, %v1612_v50 }
 0x1b5   : > { %v628_v37 = vmul.f32 %v627_v18, %v1589_v28  ;;  %v1674_v26 = vmul.f32 0.70710677, %v1659_v20  ;;  %v675_v1 = vmul.f32 %v674_v46, %v1612_v50  ;;  %v1707_v9 = vmul.f32 3.8918573e-05, %v1647_v12 }
 0x1b6   : > { %v1654_v2 = vmul.f32 0.70710677, %v1650_v60  ;;  %v1656_v14 = vadd.f32 1.0, %v639_v15  ;;  %v701_v40 = vadd.f32 0.00028619796, %v700_v23 }
 0x1b7   : > { %v665_v52 = vadd.f32 0.05243302, %v664_v34  ;;  %v629_v28 = vadd.f32 1.1283791, %v628_v37  ;;  %v858_v53 = vmul.f32 %v1674_v26, %v1674_v26  ;;  %v676_v18 = vadd.f32 0.112945676, %v675_v1 }
 0x1b8   : > { %v738_v25 = vmul.f32 %v1654_v2, %v1654_v2  ;;  %1230 = vrcp.f32 %v1656_v14  ;;  %v702_v59 = vmul.f32 %v701_v40, %v1647_v12  ;;  %vm646_vm2 = vweird.f32 %v1656_v14 }
 0x1b9   : > { %v594_v27 = vpop.f32.mrf.mxu3  ;;  %v666_v44 = vmul.f32 %v665_v52, %v1612_v50  ;;  %v630_v10 = vmul.f32 %v629_v28, %v1579_v21  ;;  %v1710_v11 = vmin.f32 %v858_v53, 16.0  ;;  %v652_v53 = vand.u32 2147483648, %v1656_v14 }
 0x1ba   : > { %v1667_v33 = vadd.f32 %v1564_v57, %v594_v27  ;;  %v1670_v22 = vmin.f32 %v738_v25, 16.0  ;;  %v703_v17 = vadd.f32 0.0036580483, %v702_v59 }
 0x1bb   : > { %v585_v36 = vpop.f32.mrf.mxu0  ;;  %v667_v21 = vadd.f32 0.18741608, %v666_v44  ;;  %v860_v40 = vmul.f32 2.1237322e-06, %v1710_v11 }
 0x1bc   : > { %v1677_v39 = vmul.f32 0.70710677, %v1667_v33  ;;  %v1680_v42 = vadd.f32 %v1564_v57, %v585_v36  ;;  %v740_v47 = vmul.f32 2.1237322e-06, %v1670_v22  ;;  %v704_v52 = vmul.f32 %v703_v17, %v1647_v12 }
 0x1be   : > { %v898_v30 = vmul.f32 %v1677_v39, %v1677_v39  ;;  %v1685_v51 = vpop.eup %1230  ;;  %v1692_v58 = vmul.f32 0.70710677, %v1680_v42  ;;  %v741_v3 = vadd.f32 0.00028619796, %v740_v47 }
 0x1bf   : > { %v642_v0 = vmul.f32 %v1685_v51, %v1656_v14  ;;  %vm647_vm3 = vweird.f32 %v1685_v51 }
 0x1c0   : > { %v1689_v55 = vmin.f32 %v898_v30, 16.0  ;;  %v778_v6 = vmul.f32 %v1692_v58, %v1692_v58  ;;  %v742_v23 = vmul.f32 %v741_v3, %v1670_v22  ;;  %vm648_vm4 = vmor %vm646_vm2, %vm647_vm3 }
 0x1c1   : > { %v597_v62 = vpop.f32.mrf.mxu3  ;;  %v643_v31 = vsub.f32 1.0, %v642_v0 }
 0x1c2   : > { %v900_v4 = vmul.f32 2.1237322e-06, %v1689_v55  ;;  %v911_v41 = vmul.f32 3.8918573e-05, %v1689_v55  ;;  %v1704_v61 = vadd.f32 %v1564_v57, %v597_v62  ;;  %v1712_v63 = vmin.f32 %v778_v6, 16.0 }
 0x1c3   : > { %v588_v15 = vpop.f32.mrf.mxu0  ;;  %v644_v37 = vmul.f32 %v1685_v51, %v643_v31  ;;  %v743_v59 = vadd.f32 0.0036580483, %v742_v23  ;;  %v861_v6 = vadd.f32 0.00028619796, %v860_v40  ;;  %v653_v23 = vor.u32 1.1754944e-38, %v652_v53 }
 0x1c4   : > { %v901_v54 = vadd.f32 0.00028619796, %v900_v4  ;;  %v912_v5 = vadd.f32 0.001143296, %v911_v41  ;;  %v1719_v32 = vmul.f32 0.70710677, %v1704_v61  ;;  %v1723_v36 = vadd.f32 %v1564_v57, %v588_v15 }
 0x1c5   : > { %v780_v34 = vmul.f32 2.1237322e-06, %v1712_v63  ;;  %v645_v4 = vadd.f32 %v1685_v51, %v644_v37  ;;  %v650_v41 = vand.u32 2147483647, %v1656_v14  ;;  %v668_v14 = vmul.f32 %v667_v21, %v1612_v50 }
 0x1c6   : > { %v902_v25 = vmul.f32 %v901_v54, %v1689_v55  ;;  %v913_v27 = vmul.f32 %v912_v5, %v1689_v55  ;;  %v938_v30 = vmul.f32 %v1719_v32, %v1719_v32  ;;  %v1738_v3 = vmul.f32 0.70710677, %v1723_v36 }
 0x1c7   : > { %v781_v28 = vadd.f32 0.00028619796, %v780_v34  ;;  %v677_v54 = vmul.f32 %v676_v18, %v1612_v50  ;;  %v705_v5 = vadd.f32 0.05243302, %v704_v52  ;;  %v649_v18 = vsel %vm648_vm4, %v1685_v51, %v645_v4 }
 0x1c8   : > { %v903_v46 = vadd.f32 0.0036580483, %v902_v25  ;;  %v914_v47 = vadd.f32 0.014752088, %v913_v27  ;;  %v1734_v0 = vmin.f32 %v938_v30, 16.0  ;;  %v818_v17 = vmul.f32 %v1738_v3, %v1738_v3 }
 0x1c9   : > { %v782_v1 = vmul.f32 %v781_v28, %v1712_v63  ;;  %v744_v25 = vmul.f32 %v743_v59, %v1670_v22  ;;  %vm651_vm5 = vcmp.eq.f32.partialorder %v650_v41, 8.507059e+37  ;;  %v678_v28 = vadd.f32 0.4994258, %v677_v54 }
 0x1ca   : > { %v904_v57 = vmul.f32 %v903_v46, %v1689_v55  ;;  %v915_v62 = vmul.f32 %v914_v47, %v1689_v55  ;;  %v940_v15 = vmul.f32 2.1237322e-06, %v1734_v0  ;;  %v1754_v46 = vmin.f32 %v818_v17, 16.0 }
 0x1cb   : > { %v783_v37 = vadd.f32 0.0036580483, %v782_v1  ;;  %v654_v52 = vsel %vm651_vm5, %v653_v23, %v649_v18  ;;  %v862_v53 = vmul.f32 %v861_v6, %v1710_v11  ;;  %v679_v4 = vmul.f32 %v678_v28, %v1612_v50 }
 0x1cc   : > { %v905_v44 = vadd.f32 0.05243302, %v904_v57  ;;  %v916_v31 = vadd.f32 0.112945676, %v915_v62  ;;  %v941_v40 = vadd.f32 0.00028619796, %v940_v15  ;;  %v655_v1 = vmul.f32 %v654_v52, %v630_v10 }
 0x1cd   : > { %v820_v57 = vmul.f32 2.1237322e-06, %v1754_v46  ;;  %v745_v62 = vadd.f32 0.05243302, %v744_v25  ;;  %v600_v41 = vmul.f32 0.5, %v1573_v19  ;;  %v1769_v17 = vadd.f32 1.0, %v679_v4 }
 0x1ce   : > { %v906_v27 = vmul.f32 %v905_v44, %v1689_v55  ;;  %v917_v34 = vmul.f32 %v916_v31, %v1689_v55  ;;  %v942_v59 = vmul.f32 %v941_v40, %v1734_v0  ;;  %v706_v44 = vmul.f32 %v705_v5, %v1647_v12 }
 0x1cf   : > { %v784_v31 = vmul.f32 %v783_v37, %v1712_v63  ;;  %v712_v21 = vadd.f32 0.001143296, %v1707_v9  ;;  %v1149_v15 = vclamps-f32 %v655_v1, 1.0  ;;  %v669_v23 = vadd.f32 1.1283791, %v668_v14 }
 0x1d0   : > { %v907_v47 = vadd.f32 0.18741608, %v906_v27  ;;  %v918_v30 = vadd.f32 0.4994258, %v917_v34  ;;  %v943_v25 = vadd.f32 0.0036580483, %v942_v59  ;;  %v746_v50 = vmul.f32 %v745_v62, %v1670_v22 }
 0x1d1   : > { %v821_v10 = vadd.f32 0.00028619796, %v820_v57  ;;  %v863_v27 = vadd.f32 0.0036580483, %v862_v53  ;;  %v713_v19 = vmul.f32 %v712_v21, %v1647_v12  ;;  %v1775_v5 = vmul.f32 0.5, %v1596_v35 }
 0x1d2   : > { %v919_v51 = vmul.f32 %v918_v30, %v1689_v55  ;;  %v908_v6 = vmul.f32 %v907_v47, %v1689_v55  ;;  %v1778_v55 = vmul.f32 0.5, %v1620_v56  ;;  %v707_v9 = vadd.f32 0.18741608, %v706_v44 }
 0x1d3   : > { %v1781_v34 = vmul.f32 0.5, %v1650_v60  ;;  %v785_v37 = vadd.f32 0.05243302, %v784_v31  ;;  %v978_v40 = vadd.f32 1.0, %v1149_v15  ;;  %v1785_v47 = vmul.f32 %v669_v23, %v1603_v38 }
 0x1d4   : > { %v1767_v54 = vadd.f32 1.0, %v919_v51  ;;  %v909_v18 = vadd.f32 1.1283791, %v908_v6  ;;  %v1788_v30 = vmul.f32 0.5, %v1667_v33  ;;  %v944_v35 = vmul.f32 %v943_v25, %v1734_v0 }
 0x1d5   : > { %v822_v56 = vmul.f32 %v821_v10, %v1754_v46  ;;  %v1793_v52 = vmul.f32 %v863_v27, %v1710_v11  ;;  %v747_v60 = vadd.f32 0.18741608, %v746_v50  ;;  %v987_v28 = vmul.f32 %v978_v40, %v600_v41 }
 0x1d6   : > { %1232 = vrcp.f32 %v1767_v54  ;;  %v714_v14 = vadd.f32 0.014752088, %v713_v19  ;;  %v708_v53 = vmul.f32 %v707_v9, %v1647_v12  ;;  %v930_v59 = vand.u32 2147483647, %v1767_v54 }
 0x1d7   : > { %1234 = vrcp.f32 %v1769_v17  ;;  %v932_v38 = vand.u32 2147483648, %v1767_v54  ;;  %v751_v57 = vmul.f32 3.8918573e-05, %v1670_v22  ;;  %v910_v62 = vmul.f32 %v909_v18, %v1677_v39  ;;  %1032 = vmatmul.f32.vlgmr.msra.gmra.mxu1 %v987_v28 }
 0x1d8   : > { %v786_v51 = vmul.f32 %v785_v37, %v1712_v63  ;;  %v715_v1 = vmul.f32 %v714_v14, %v1647_v12  ;;  %v791_v4 = vmul.f32 3.8918573e-05, %v1712_v63  ;;  %v945_v44 = vadd.f32 0.05243302, %v944_v35 }
 0x1d9   : > { %v823_v31 = vadd.f32 0.0036580483, %v822_v56  ;;  %v690_v21 = vand.u32 2147483647, %v1769_v17  ;;  %vm926_vm6 = vweird.f32 %v1767_v54  ;;  %v752_v23 = vadd.f32 0.001143296, %v751_v57 }
 0x1da   : > { %v716_v15 = vadd.f32 0.112945676, %v715_v1  ;;  %v792_v25 = vadd.f32 0.001143296, %v791_v4  ;;  %vm1806_vm7 = vcmp.eq.f32.partialorder %v930_v59, 8.507059e+37  ;;  %v933_v27 = vor.u32 1.1754944e-38, %v932_v38 }
 0x1db   : > { %v692_v19 = vand.u32 2147483648, %v1769_v17  ;;  %v753_v18 = vmul.f32 %v752_v23, %v1670_v22  ;;  %vm1815_vm9 = vcmp.eq.f32.partialorder %v690_v21, 8.507059e+37  ;;  %vm686_vm10 = vweird.f32 %v1769_v17 }
 0x1dc   : > { %v1233_v33 = vpop.eup %1232  ;;  %v717_v9 = vmul.f32 %v716_v15, %v1647_v12  ;;  %v793_v37 = vmul.f32 %v792_v25, %v1712_v63  ;;  %v951_v1 = vmul.f32 3.8918573e-05, %v1734_v0  ;;  %v831_v15 = vmul.f32 3.8918573e-05, %v1754_v46 }
 0x1dd   : > { %v922_v41 = vmul.f32 %v1233_v33, %v1767_v54  ;;  %v1235_v6 = vpop.eup %1234  ;;  %vm927_vm8 = vweird.f32 %v1233_v33  ;;  %v754_v14 = vadd.f32 0.014752088, %v753_v18 }
 0x1de   : > { %v682_v50 = vmul.f32 %v1235_v6, %v1769_v17  ;;  %v718_v28 = vadd.f32 0.4994258, %v717_v9  ;;  %v794_v59 = vadd.f32 0.014752088, %v793_v37  ;;  %vm687_vm11 = vweird.f32 %v1235_v6  ;;  %vm928_vm12 = vmor %vm926_vm6, %vm927_vm8 }
 0x1df   : > { %v923_v39 = vsub.f32 1.0, %v922_v41  ;;  %v755_v41 = vmul.f32 %v754_v14, %v1670_v22  ;;  %vm688_vm13 = vmor %vm686_vm10, %vm687_vm11  ;;  %v709_v14 = vadd.f32 1.1283791, %v708_v53  ;;  %v824_v17 = vmul.f32 %v823_v31, %v1754_v46 }
 0x1e0   : > { %v683_v35 = vsub.f32 1.0, %v682_v50  ;;  %v719_v4 = vmul.f32 %v718_v28, %v1647_v12  ;;  %v795_v21 = vmul.f32 %v794_v59, %v1712_v63  ;;  %v952_v50 = vadd.f32 0.001143296, %v951_v1 }
 0x1e1   : > { %v924_v40 = vmul.f32 %v1233_v33, %v923_v39  ;;  %v693_v39 = vor.u32 1.1754944e-38, %v692_v19  ;;  %v756_v18 = vadd.f32 0.112945676, %v755_v41  ;;  %v832_v28 = vadd.f32 0.001143296, %v831_v15 }
 0x1e2   : > { %v684_v57 = vmul.f32 %v1235_v6, %v683_v35  ;;  %v1831_v54 = vadd.f32 1.0, %v719_v4  ;;  %v796_v12 = vadd.f32 0.112945676, %v795_v21  ;;  %v953_v35 = vmul.f32 %v952_v50, %v1734_v0 }
 0x1e3   : > { %v925_v38 = vadd.f32 %v1233_v33, %v924_v40  ;;  %v833_v53 = vmul.f32 %v832_v28, %v1754_v46  ;;  %v825_v21 = vadd.f32 0.05243302, %v824_v17 }
 0x1e4   : > { %v685_v25 = vadd.f32 %v1235_v6, %v684_v57  ;;  %1236 = vrcp.f32 %v1831_v54  ;;  %vm726_vm15 = vweird.f32 %v1831_v54 }
 0x1e5   : > { %v929_v23 = vsel %vm928_vm12, %v1233_v33, %v925_v38  ;;  %v748_v33 = vmul.f32 %v747_v60, %v1670_v22  ;;  %v954_v38 = vadd.f32 0.014752088, %v953_v35  ;;  %v946_v60 = vmul.f32 %v945_v44, %v1734_v0 }
 0x1e6   : > { %v934_v9 = vsel %vm1806_vm7, %v933_v27, %v929_v23  ;;  %v689_v40 = vsel %vm688_vm13, %v1235_v6, %v685_v25  ;;  %v757_v27 = vmul.f32 %v756_v18, %v1670_v22  ;;  %v787_v6 = vadd.f32 0.18741608, %v786_v51 }
 0x1e7   : > { %v935_v37 = vmul.f32 %v934_v9, %v910_v62  ;;  %v694_v19 = vsel %vm1815_vm9, %v693_v39, %v689_v40  ;;  %v797_v62 = vmul.f32 %v796_v12, %v1712_v63  ;;  %v955_v41 = vmul.f32 %v954_v38, %v1734_v0 }
 0x1e8   : > { %v695_v10 = vmul.f32 %v694_v19, %v1785_v47  ;;  %v758_v56 = vadd.f32 0.4994258, %v757_v27  ;;  %v834_v31 = vadd.f32 0.014752088, %v833_v53  ;;  %v871_v47 = vmul.f32 3.8918573e-05, %v1710_v11 }
 0x1e9   : > { %v1156_v59 = vclamps-f32 %v935_v37, 1.0  ;;  %v798_v1 = vadd.f32 0.4994258, %v797_v62  ;;  %v956_v50 = vadd.f32 0.112945676, %v955_v41  ;;  %v788_v18 = vmul.f32 %v787_v6, %v1712_v63 }
 0x1ea   : > { %v1150_v57 = vclamps-f32 %v695_v10, 1.0  ;;  %v759_v23 = vmul.f32 %v758_v56, %v1670_v22  ;;  %v1237_v25 = vpop.eup %1236  ;;  %v835_v44 = vmul.f32 %v834_v31, %v1754_v46  ;;  %v872_v9 = vadd.f32 0.001143296, %v871_v47 }
 0x1eb   : > { %v985_v4 = vadd.f32 1.0, %v1156_v59  ;;  %v799_v51 = vmul.f32 %v798_v1, %v1712_v63  ;;  %v722_v37 = vmul.f32 %v1237_v25, %v1831_v54  ;;  %v957_v22 = vmul.f32 %v956_v50, %v1734_v0 }
 0x1ec   : > { %v979_v15 = vadd.f32 1.0, %v1150_v57  ;;  %v1853_v40 = vadd.f32 1.0, %v759_v23  ;;  %v836_v28 = vadd.f32 0.112945676, %v835_v44  ;;  %v1860_v19 = vadd.f32 0.05243302, %v1793_v52 }
 0x1ed   : > { %v994_v39 = vmul.f32 %v985_v4, %v1788_v30  ;;  %v1855_v35 = vadd.f32 1.0, %v799_v51  ;;  %v873_v30 = vmul.f32 %v872_v9, %v1710_v11  ;;  %v947_v17 = vadd.f32 0.18741608, %v946_v60 }
 0x1ee   : > { %v988_v12 = vmul.f32 %v979_v15, %v1775_v5  ;;  %v723_v63 = vsub.f32 1.0, %v722_v37  ;;  %1238 = vrcp.f32 %v1853_v40  ;;  %v749_v5 = vadd.f32 1.1283791, %v748_v33 }
 0x1ef   : > { %1053 = vmatmul.f32.vlgmr.msrb.gmra.mxu3 %v994_v39  ;;  %v826_v10 = vmul.f32 %v825_v21, %v1754_v46  ;;  %v732_v27 = vand.u32 2147483648, %v1831_v54  ;;  %1240 = vrcp.f32 %v1855_v35  ;;  %vm727_vm14 = vweird.f32 %v1237_v25 }
 0x1f0   : > { %1035 = vmatmul.f32.gmra.mxu1 %v988_v12  ;;  %v724_v62 = vmul.f32 %v1237_v25, %v723_v63  ;;  %v730_v6 = vand.u32 2147483647, %v1831_v54  ;;  %v958_v59 = vadd.f32 0.4994258, %v957_v22  ;;  %v710_v52 = vmul.f32 %v709_v14, %v1630_v29  ;;  %vm728_vm2 = vmor %vm726_vm15, %vm727_vm14 }
 0x1f1   : > { %v789_v38 = vadd.f32 1.1283791, %v788_v18  ;;  %v837_v53 = vmul.f32 %v836_v28, %v1754_v46  ;;  %v874_v60 = vadd.f32 0.014752088, %v873_v30  ;;  %v948_v57 = vmul.f32 %v947_v17, %v1734_v0 }
 0x1f2   : > { %v725_v33 = vadd.f32 %v1237_v25, %v724_v62  ;;  %v959_v56 = vmul.f32 %v958_v59, %v1734_v0  ;;  %v750_v1 = vmul.f32 %v749_v5, %v1654_v2  ;;  %v827_v4 = vadd.f32 0.18741608, %v826_v10 }
 0x1f3   : > { %v733_v41 = vor.u32 1.1754944e-38, %v732_v27  ;;  %v838_v31 = vadd.f32 0.4994258, %v837_v53  ;;  %vm731_vm3 = vcmp.eq.f32.partialorder %v730_v6, 8.507059e+37  ;;  %v875_v14 = vmul.f32 %v874_v60, %v1710_v11 }
 0x1f4   : > { %v1239_v47 = vpop.eup %1238  ;;  %v729_v21 = vsel %vm728_vm2, %v1237_v25, %v725_v33  ;;  %v1873_v29 = vadd.f32 1.0, %v959_v56  ;;  %v790_v23 = vmul.f32 %v789_v38, %v1692_v58  ;;  %v949_v2 = vadd.f32 1.1283791, %v948_v57 }
 0x1f5   : > { %v1241_v15 = vpop.eup %1240  ;;  %v734_v51 = vsel %vm731_vm3, %v733_v41, %v729_v21  ;;  %v762_v54 = vmul.f32 %v1239_v47, %v1853_v40  ;;  %v839_v0 = vmul.f32 %v838_v31, %v1754_v46  ;;  %v828_v25 = vmul.f32 %v827_v4, %v1754_v46 }
 0x1f6   : > { %v735_v39 = vmul.f32 %v734_v51, %v710_v52  ;;  %v802_v50 = vmul.f32 %v1241_v15, %v1855_v35  ;;  %1242 = vrcp.f32 %v1873_v29  ;;  %v770_v9 = vand.u32 2147483647, %v1853_v40 }
 0x1f7   : > { %v763_v44 = vsub.f32 1.0, %v762_v54  ;;  %v772_v18 = vand.u32 2147483648, %v1853_v40  ;;  %v1884_v37 = vadd.f32 1.0, %v839_v0  ;;  %v876_v22 = vadd.f32 0.112945676, %v875_v14 }
 0x1f8   : > { %v1151_v12 = vclamps-f32 %v735_v39, 1.0  ;;  %v803_v58 = vsub.f32 1.0, %v802_v50  ;;  %vm767_vm4 = vweird.f32 %v1239_v47  ;;  %v810_v30 = vand.u32 2147483647, %v1855_v35 }
 0x1f9   : > { %v764_v28 = vmul.f32 %v1239_v47, %v763_v44  ;;  %v812_v17 = vand.u32 2147483648, %v1855_v35  ;;  %vm807_vm5 = vweird.f32 %v1241_v15  ;;  %1244 = vrcp.f32 %v1884_v37 }
 0x1fa   : > { %v980_v63 = vadd.f32 1.0, %v1151_v12  ;;  %v804_v5 = vmul.f32 %v1241_v15, %v803_v58  ;;  %vm766_vm6 = vweird.f32 %v1853_v40  ;;  %vm806_vm7 = vweird.f32 %v1855_v35 }
 0x1fb   : > { %v765_v46 = vadd.f32 %v1239_v47, %v764_v28  ;;  %v877_v10 = vmul.f32 %v876_v22, %v1710_v11  ;;  %vm768_vm8 = vmor %vm766_vm6, %vm767_vm4  ;;  %vm771_vm9 = vcmp.eq.f32.partialorder %v770_v9, 8.507059e+37  ;;  %v773_v6 = vor.u32 1.1754944e-38, %v772_v18 }
 0x1fc   : > { %v1243_v27 = vpop.eup %1242  ;;  %v989_v62 = vmul.f32 %v980_v63, %v1778_v55  ;;  %v805_v59 = vadd.f32 %v1241_v15, %v804_v5  ;;  %vm808_vm10 = vmor %vm806_vm7, %vm807_vm5  ;;  %vm811_vm11 = vcmp.eq.f32.partialorder %v810_v30, 8.507059e+37  ;;  %v813_v38 = vor.u32 1.1754944e-38, %v812_v17 }
 0x1fd   : > { %v769_v52 = vsel %vm768_vm8, %v1239_v47, %v765_v46  ;;  %v962_v53 = vmul.f32 %v1243_v27, %v1873_v29  ;;  %v970_v35 = vand.u32 2147483647, %v1873_v29  ;;  %v878_v57 = vadd.f32 0.4994258, %v877_v10 }
 0x1fe   : > { %1038 = vmatmul.f32.gmra.mxu1 %v989_v62  ;;  %v774_v60 = vsel %vm771_vm9, %v773_v6, %v769_v52  ;;  %v809_v40 = vsel %vm808_vm10, %v1241_v15, %v805_v59  ;;  %v866_v33 = vmul.f32 %v1860_v19, %v1710_v11  ;;  %v950_v31 = vmul.f32 %v949_v2, %v1719_v32 }
 0x1ff   : > { %v775_v55 = vmul.f32 %v774_v60, %v750_v1  ;;  %v814_v56 = vsel %vm811_vm11, %v813_v38, %v809_v40  ;;  %v963_v4 = vsub.f32 1.0, %v962_v53  ;;  %v1245_v41 = vpop.eup %1244  ;;  %v972_v21 = vand.u32 2147483648, %v1873_v29 }
 0x200   : > { %v815_v47 = vmul.f32 %v814_v56, %v790_v23  ;;  %v879_v14 = vmul.f32 %v878_v57, %v1710_v11  ;;  %vm967_vm12 = vweird.f32 %v1243_v27  ;;  %v842_v15 = vmul.f32 %v1245_v41, %v1884_v37 }
 0x201   : > { %v1152_v51 = vclamps-f32 %v775_v55, 1.0  ;;  %v964_v54 = vmul.f32 %v1243_v27, %v963_v4  ;;  %v829_v0 = vadd.f32 1.1283791, %v828_v25  ;;  %vm966_vm13 = vweird.f32 %v1873_v29 }
 0x202   : > { %vm1902_vm14 = vcmp.eq.f32.partialorder %v970_v35, 8.507059e+37  ;;  %v880_v1 = vadd.f32 1.0, %v879_v14  ;;  %v1153_v32 = vclamps-f32 %v815_v47, 1.0  ;;  %v843_v2 = vsub.f32 1.0, %v842_v15  ;;  %vm968_vm15 = vmor %vm966_vm13, %vm967_vm12 }
 0x203   : > { %v981_v39 = vadd.f32 1.0, %v1152_v51  ;;  %v965_v23 = vadd.f32 %v1243_v27, %v964_v54  ;;  %v973_v50 = vor.u32 1.1754944e-38, %v972_v21  ;;  %v850_v44 = vand.u32 2147483647, %v1884_v37 }
 0x204   : > { %v852_v9 = vand.u32 2147483648, %v1884_v37  ;;  %1246 = vrcp.f32 %v880_v1  ;;  %v844_v29 = vmul.f32 %v1245_v41, %v843_v2  ;;  %vm847_vm2 = vweird.f32 %v1245_v41 }
 0x205   : > { %v990_v25 = vmul.f32 %v981_v39, %v1781_v34  ;;  %v969_v18 = vsel %vm968_vm15, %v1243_v27, %v965_v23  ;;  %v867_v12 = vadd.f32 0.18741608, %v866_v33  ;;  %v982_v22 = vadd.f32 1.0, %v1153_v32 }
 0x206   : > { %v974_v58 = vsel %vm1902_vm14, %v973_v50, %v969_v18  ;;  %v845_v30 = vadd.f32 %v1245_v41, %v844_v29  ;;  %vm846_vm3 = vweird.f32 %v1884_v37  ;;  %v604_v17 = vmul.f32 0.5, %v1680_v42 }
 0x207   : > { %1041 = vmatmul.f32.vlgmr.msra.gmra.mxu2 %v990_v25  ;;  %v975_v28 = vmul.f32 %v974_v58, %v950_v31  ;;  %vm848_vm4 = vmor %vm846_vm3, %vm847_vm2  ;;  %v853_v63 = vor.u32 1.1754944e-38, %v852_v9  ;;  %v830_v5 = vmul.f32 %v829_v0, %v1738_v3  ;;  %vm851_vm5 = vcmp.eq.f32.partialorder %v850_v44, 8.507059e+37 }
 0x208   : > { %v849_v46 = vsel %vm848_vm4, %v1245_v41, %v845_v30  ;;  %v868_v27 = vmul.f32 %v867_v12, %v1710_v11  ;;  %v608_v62 = vmul.f32 0.5, %v1704_v61  ;;  %v991_v59 = vmul.f32 %v982_v22, %v604_v17 }
 0x209   : > { %v1157_v34 = vclamps-f32 %v975_v28, 1.0  ;;  %v854_v6 = vsel %vm851_vm5, %v853_v63, %v849_v46  ;;  %v892_v35 = vand.u32 2147483648, %v880_v1  ;;  %v890_v33 = vand.u32 2147483647, %v880_v1 }
 0x20a   : > { %v1247_v10 = vpop.eup %1246  ;;  %v855_v38 = vmul.f32 %v854_v6, %v830_v5  ;;  %v869_v40 = vadd.f32 1.1283791, %v868_v27  ;;  %v605_v11 = vmul.f32 0.5, %v1723_v36  ;;  %vm886_vm7 = vweird.f32 %v880_v1  ;;  %v1209_v36 = vld [vmem:[%s1965_s6] ss:$0 sm:$0xff] }
 0x20b   : > { %v986_v52 = vadd.f32 1.0, %v1157_v34  ;;  %v882_v53 = vmul.f32 %v1247_v10, %v880_v1  ;;  %vm887_vm6 = vweird.f32 %v1247_v10  ;;  %v893_v61 = vor.u32 1.1754944e-38, %v892_v35 }
 0x20c   : > { %v1154_v60 = vclamps-f32 %v855_v38, 1.0  ;;  %vm888_vm8 = vmor %vm886_vm7, %vm887_vm6  ;;  %v870_v56 = vmul.f32 %v869_v40, %v1674_v26  ;;  %vm891_vm9 = vcmp.eq.f32.partialorder %v890_v33, 8.507059e+37  ;;  %v606_v51 = vmul.f32 0.5, %v1659_v20 }
 0x20d   : > { %v995_v37 = vmul.f32 %v986_v52, %v608_v62  ;;  %v883_v42 = vsub.f32 1.0, %v882_v53 }
 0x20e   : > { %v983_v3 = vadd.f32 1.0, %v1154_v60 }
 0x20f   : > { %1044 = vmatmul.f32.gmra.mxu2 %v991_v59  ;;  %1056 = vmatmul.f32.gmra.mxu3 %v995_v37  ;;  %v884_v57 = vmul.f32 %v1247_v10, %v883_v42 }
 0x210   : > { %v992_v4 = vmul.f32 %v983_v3, %v605_v11 }
 0x211   : > { %v885_v55 = vadd.f32 %v1247_v10, %v884_v57 }
 0x213   : > { %v889_v41 = vsel %vm888_vm8, %v1247_v10, %v885_v55 }
 0x214   : > { %v894_v31 = vsel %vm891_vm9, %v893_v61, %v889_v41 }
 0x215   : > { %v895_v47 = vmul.f32 %v894_v31, %v870_v56 }
 0x217   : > { %1047 = vmatmul.f32.gmra.mxu2 %v992_v4  ;;  %v1155_v21 = vclamps-f32 %v895_v47, 1.0 }
 0x219   : > { %v984_v14 = vadd.f32 1.0, %v1155_v21 }
 0x21b   : > { %v993_v54 = vmul.f32 %v984_v14, %v606_v51 }
 0x21f   : > { %1050 = vmatmul.f32.gmra.mxu2 %v993_v54 }
 0x254   : > { %v1033_v15 = vpop.f32.mrf.mxu1 }
 0x255   : > { %v1034_v0 = vadd.f32 %v1209_v36, %v1033_v15 }
 0x257   : > { %v1060_v20 = vadd.f32 %v1034_v0, %v1457_v13 }
 0x259   : > { %1069 = vst.msk [vmem:[%s1927_s17] sm:$0xff] %vm288_vm0, %v1060_v20 }
 0x26d   : > { %v1036_v26 = vpop.f32.mrf.mxu1 }
 0x26e   : > { %v1037_v19 = vadd.f32 %v1209_v36, %v1036_v26 }
 0x270   : > { %v1061_v1 = vadd.f32 %v1037_v19, %v1477_v45 }
 0x272   : > { %1070 = vst.msk [vmem:[%s1927_s17 + $0x8] sm:$0xff] %vm288_vm0, %v1061_v1  ;;  %v1054_v39 = vpop.f32.mrf.mxu3 }
 0x273   : > { %v1055_v32 = vadd.f32 %v1209_v36, %v1054_v39 }
 0x275   : > { %v1067_v23 = vadd.f32 %v1055_v32, %v1528_v8 }
 0x277   : > { %1076 = vst.msk [vmem:[%s1927_s17 + $0x38] sm:$0xff] %vm288_vm0, %v1067_v23 }
 0x27b   : > { %v1039_v2 = vpop.f32.mrf.mxu1 }
 0x27c   : > { %v1040_v50 = vadd.f32 %v1209_v36, %v1039_v2 }
 0x27e   : > { %v1062_v13 = vadd.f32 %v1040_v50, %v1506_v48 }
 0x280   : > { %1071 = vst.msk [vmem:[%s1927_s17 + $0x10] sm:$0xff] %vm288_vm0, %v1062_v13 }
 0x28a   : > { %v1042_v44 = vpop.f32.mrf.mxu2 }
 0x28b   : > { %v1043_v9 = vadd.f32 %v1209_v36, %v1042_v44 }
 0x28d   : > { %v1063_v45 = vadd.f32 %v1043_v9, %v1525_v7 }
 0x28f   : > { %1072 = vst.msk [vmem:[%s1927_s17 + $0x18] sm:$0xff] %vm288_vm0, %v1063_v45 }
 0x292   : > { %v1045_v25 = vpop.f32.mrf.mxu2  ;;  %v1057_v8 = vpop.f32.mrf.mxu3 }
 0x293   : > { %v1046_v18 = vadd.f32 %v1209_v36, %v1045_v25  ;;  %v1058_v29 = vadd.f32 %v1209_v36, %v1057_v8 }
 0x295   : > { %v1064_v12 = vadd.f32 %v1046_v18, %v1539_v24  ;;  %v1068_v58 = vadd.f32 %v1058_v29, %v1542_v43 }
 0x297   : > { %1073 = vst.msk [vmem:[%s1927_s17 + $0x20] sm:$0xff] %vm288_vm0, %v1064_v12 }
 0x298   : > { %1077 = vst.msk [vmem:[%s1927_s17 + $0x40] sm:$0x1] %vm313_vm1, %v1068_v58 }
 0x29a   : > { %v1048_v48 = vpop.f32.mrf.mxu2 }
 0x29b   : > { %v1049_v22 = vadd.f32 %v1209_v36, %v1048_v48 }
 0x29d   : > { %v1065_v28 = vadd.f32 %v1049_v22, %v1551_v16 }
 0x29f   : > { %1074 = vst.msk [vmem:[%s1927_s17 + $0x28] sm:$0xff] %vm288_vm0, %v1065_v28 }
 0x2a2   : > { %v1051_v7 = vpop.f32.mrf.mxu2 }
 0x2a3   : > { %v1052_v30 = vadd.f32 %v1209_v36, %v1051_v7 }
 0x2a5   : > { %v1066_v17 = vadd.f32 %v1052_v30, %v1509_v49 }
 0x2a7   : > { %1075 = vst.msk [vmem:[%s1927_s17 + $0x30] sm:$0xff] %vm288_vm0, %v1066_v17 }
 0x2a8 PF: > { %s17_s24 = sadd.s32 1, %s1254_s24  }
 0x2a9   : > { %p14_p4 = scmp.ge.s32.totalorder %s17_s24, 4  }
 0x2ab   :  { %16 = sbr.rel (!%p14_p4) target bundleno = 1 (0x1), region = 78 }

// kernel: swin_block_forward.2
= control target key start
LH: loop header
LB: loop body
LE: loop exit
PB: predicated region body
PF: predicated region fallthrough
CT: control target
= control target key end

     0   :  { %s2992_s27 = smov 0   ;;  %s3950_s0 = inlined_call_operand.vmem [shape: f32[2,64,32], index: 0, kind: input, shape index: {}]   ;;  %s3951_s1 = inlined_call_operand.vmem [shape: f32[1,32], index: 1, kind: input, shape index: {}]   ;;  %s3952_s2 = inlined_call_operand.vmem [shape: f32[1,32], index: 2, kind: input, shape index: {}]   ;;  %s3953_s3 = inlined_call_operand.vmem [shape: f32[32,96], index: 3, kind: input, shape index: {}]   ;;  %s3954_s4 = inlined_call_operand.vmem [shape: f32[1,96], index: 4, kind: input, shape index: {}]   ;;  %s3955_s5 = inlined_call_operand.vmem [shape: f32[4,4,16,16], index: 5, kind: input, shape index: {}]   ;;  %s3956_s6 = inlined_call_operand.vmem [shape: f32[32,32], index: 6, kind: input, shape index: {}]   ;;  %s3957_s7 = inlined_call_operand.vmem [shape: f32[1,32], index: 7, kind: input, shape index: {}]   ;;  %s3958_s8 = inlined_call_operand.vmem [shape: f32[2,64,32], index: 8, kind: output, shape index: {}]  }
   0x1 LB: > { %s2520_s28 = sadd.s32 4294967295, %s2933_s27   ;;  %p2524_p0 = scmp.ge.s32.totalorder %s2933_s27, 1  ;;  %s2933_s27 = sphi %s2992_s27, %s18_s27  }
   0x2   : > { %p262_p1 = scmp.lt.s32.totalorder %s2933_s27, 3 }
   0x4   : > { %p263_p2 = pnand %p2524_p0, %p262_p1 }
   0x5   : > { %p296_p3 = scmp.lt.s32.totalorder (!%p263_p2), %s2520_s28, 1  ;;  %s2936_s25 = smov (!%p263_p2), 96  }
   0x6   : > { %266 = sbr.rel (%p263_p2) target bundleno = 2890 (0xb4a), region = 52  ;;  %s2937_s20 = smov (!%p263_p2), 64  }
   0x7   : > { %s2938_s21 = smov (!%p263_p2), 88   ;;  %s2939_s22 = smov (!%p263_p2), 120  }
   0x8   : > { %s2940_s13 = smov (!%p263_p2), 80   ;;  %s2941_s14 = smov (!%p263_p2), 56  }
   0x9   : > { %s2942_s15 = smov (!%p263_p2), 112   ;;  %s2943_s24 = smov (!%p263_p2), 48  }
   0xa   : > { %s2945_s26 = smov (!%p263_p2), 72  }
   0xb   : > { %s3962_s28 = smov (!%p296_p3, %s2520_s28), 1  ;;  %vm314_vm0 = vcmask 261120   ;;  %v2935_v14 = vmov 32.0   ;;  %v525_v58 = vld [vmem:[%s3953_s3 + $0x18] sm:$0xff]  ;;  %v524_v59 = vld [vmem:[%s3953_s3 + $0x10] sm:$0xff]  ;;  %v523_v60 = vld [vmem:[%s3953_s3 + $0x8] sm:$0xff] }
   0xc   : > { %s2667_s29 = sshll.u32 %s3962_s28, 6  ;;  %2773 = vrcp.f32 %v2935_v14  ;;  %566 = vmatpush.msra.mxu0 %v525_v58  ;;  %v522_v61 = vld [vmem:[%s3953_s3] sm:$0xff] }
   0xd   : > { %s3008_s10 = scalar_lea.vmem %s3950_s0, %s2667_s29  ;;  %s3901_s23 = scalar_lea.vmem %s3958_s8, %s2667_s29 }
   0xe   : > { %v310_v0 = vld [vmem:[%s3008_s10 + $0x20] sm:$0xff]  ;;  %v308_v1 = vld [vmem:[%s3008_s10 + $0x10] sm:$0xff]  ;;  %v311_v6 = vld [vmem:[%s3008_s10 + $0x28] sm:$0xff]  ;;  %567 = vmatpush.msra.mxu0 %v524_v59 }
   0xf   : > { %v306_v2 = vld [vmem:[%s3008_s10] sm:$0xff]  ;;  %v327_v3 = vsel %vm314_vm0, %v310_v0, 0.0  ;;  %v321_v4 = vsel %vm314_vm0, %v308_v1, 0.0  ;;  %v309_v7 = vld [vmem:[%s3008_s10 + $0x18] sm:$0xff]  ;;  %v307_v8 = vld [vmem:[%s3008_s10 + $0x8] sm:$0xff]  ;;  %v330_v9 = vsel %vm314_vm0, %v311_v6, 0.0 }
  0x10   : > { %v315_v5 = vsel %vm314_vm0, %v306_v2, 0.0  ;;  %328 = vadd.xlane.f32.xlu2 %v327_v3  ;;  %322 = vadd.xlane.f32.xlu1 %v321_v4  ;;  %v324_v10 = vsel %vm314_vm0, %v309_v7, 0.0  ;;  %v318_v11 = vsel %vm314_vm0, %v307_v8, 0.0  ;;  %v312_v12 = vld [vmem:[%s3008_s10 + $0x30] sm:$0xff]  ;;  %v313_v40 = vld [vmem:[%s3008_s10 + $0x38] sm:$0xff] }
  0x11   : > { %316 = vadd.xlane.f32.xlu0 %v315_v5  ;;  %v333_v13 = vsel %vm314_vm0, %v312_v12, 0.0  ;;  %v336_v45 = vsel %vm314_vm0, %v313_v40, 0.0  ;;  %568 = vmatpush.msra.mxu0 %v523_v60 }
  0x12   : > { %v2774_v15 = vpop.eup %2773 }
  0x13   : > { %v340_v16 = vmul.f32 32.0, %v2774_v15  ;;  %vm344_vm1 = vweird.f32 %v2774_v15  ;;  %569 = vmatpush.msra.mxu0 %v522_v61 }
  0x15   : > { %v341_v17 = vsub.f32 1.0, %v340_v16 }
  0x17   : > { %v342_v18 = vmul.f32 %v2774_v15, %v341_v17 }
  0x18   : > { %331 = vadd.xlane.f32.xlu2 %v330_v9  ;;  %325 = vadd.xlane.f32.xlu1 %v324_v10 }
  0x19   : > { %319 = vadd.xlane.f32.xlu0 %v318_v11  ;;  %v343_v19 = vadd.f32 %v2774_v15, %v342_v18 }
  0x1b   : > { %v3024_v20 = vsel %vm344_vm1, %v2774_v15, %v343_v19 }
  0x20   : > { %334 = vadd.xlane.f32.xlu1 %v333_v13 }
  0x83   : > { %v329_v21 = vpop.xlane.xlu2 %328  ;;  %v323_v22 = vpop.xlane.xlu1 %322 }
  0x84   : > { %v348_v23 = vmul.f32 %v3024_v20, %v323_v22  ;;  %v317_v24 = vpop.xlane.xlu0 %316  ;;  %v350_v36 = vmul.f32 %v3024_v20, %v329_v21 }
  0x85   : > { %v346_v25 = vmul.f32 %v3024_v20, %v317_v24 }
  0x86   : > { %v3028_v26 = vsub.f32 %v308_v1, %v348_v23  ;;  %v3049_v43 = vsub.f32 %v310_v0, %v350_v36 }
  0x87   : > { %v3030_v27 = vsub.f32 %v306_v2, %v346_v25 }
  0x88   : > { %v364_v28 = vmul.f32 %v3028_v26, %v3028_v26  ;;  %v366_v51 = vmul.f32 %v3049_v43, %v3049_v43 }
  0x89   : > { %v362_v29 = vmul.f32 %v3030_v27, %v3030_v27 }
  0x8a   : > { %v376_v30 = vsel %vm314_vm0, %v364_v28, 0.0  ;;  %v382_v54 = vsel %vm314_vm0, %v366_v51, 0.0 }
  0x8b   : > { %v332_v31 = vpop.xlane.xlu2 %331  ;;  %377 = vadd.xlane.f32.xlu1 %v376_v30  ;;  %v370_v32 = vsel %vm314_vm0, %v362_v29, 0.0  ;;  %v326_v33 = vpop.xlane.xlu1 %325 }
  0x8c   : > { %v351_v34 = vmul.f32 %v3024_v20, %v332_v31  ;;  %371 = vadd.xlane.f32.xlu0 %v370_v32  ;;  %v320_v35 = vpop.xlane.xlu0 %319  ;;  %v349_v38 = vmul.f32 %v3024_v20, %v326_v33 }
  0x8d   : > { %v347_v37 = vmul.f32 %v3024_v20, %v320_v35  ;;  %v3107_v35 = vld [vmem:[%s3951_s1] ss:$0 sm:$0xff] }
  0x8e   : > { %v3042_v39 = vsub.f32 %v311_v6, %v351_v34  ;;  %v3051_v44 = vsub.f32 %v309_v7, %v349_v38 }
  0x8f   : > { %v3045_v41 = vsub.f32 %v307_v8, %v347_v37 }
  0x90   : > { %v367_v42 = vmul.f32 %v3042_v39, %v3042_v39  ;;  %v365_v52 = vmul.f32 %v3051_v44, %v3051_v44 }
  0x91   : > { %v363_v46 = vmul.f32 %v3045_v41, %v3045_v41 }
  0x92   : > { %v385_v47 = vsel %vm314_vm0, %v367_v42, 0.0  ;;  %v379_v55 = vsel %vm314_vm0, %v365_v52, 0.0  ;;  %v3116_v42 = vld [vmem:[%s3952_s2] ss:$0 sm:$0xff] }
  0x93   : > { %386 = vadd.xlane.f32.xlu1 %v385_v47  ;;  %v373_v48 = vsel %vm314_vm0, %v363_v46, 0.0  ;;  %v335_v49 = vpop.xlane.xlu1 %334 }
  0x94   : > { %337 = vadd.xlane.f32.xlu0 %v336_v45  ;;  %374 = vadd.xlane.f32.xlu2 %v373_v48  ;;  %v352_v50 = vmul.f32 %v3024_v20, %v335_v49 }
  0x96   : > { %v3063_v53 = vsub.f32 %v312_v12, %v352_v50 }
  0x98   : > { %v368_v56 = vmul.f32 %v3063_v53, %v3063_v53 }
  0x9a   : > { %v388_v57 = vsel %vm314_vm0, %v368_v56, 0.0 }
  0x9c   : > { %383 = vadd.xlane.f32.xlu0 %v382_v54  ;;  %380 = vadd.xlane.f32.xlu2 %v379_v55 }
  0xa4   : > { %389 = vadd.xlane.f32.xlu2 %v388_v57 }
  0xfe   : > { %v378_v62 = vpop.xlane.xlu1 %377 }
  0xff   : > { %v396_v63 = vmul.f32 %v378_v62, %v3024_v20  ;;  %v372_v0 = vpop.xlane.xlu0 %371 }
 0x100   : > { %v394_v1 = vmul.f32 %v372_v0, %v3024_v20 }
 0x101   : > { %v3084_v2 = vadd.f32 1e-05, %v396_v63 }
 0x102   : > { %v402_v3 = vadd.f32 1e-05, %v394_v1 }
 0x103   : > { %2775 = vrsqrt.f32 %v3084_v2  ;;  %vm436_vm7 = vweird.f32 %v3084_v2 }
 0x104   : > { %2777 = vrsqrt.f32 %v402_v3  ;;  %vm416_vm3 = vweird.f32 %v402_v3 }
 0x106   : > { %v387_v16 = vpop.xlane.xlu1 %386 }
 0x107   : > { %v375_v4 = vpop.xlane.xlu2 %374  ;;  %v338_v5 = vpop.xlane.xlu0 %337  ;;  %v399_v29 = vmul.f32 %v387_v16, %v3024_v20 }
 0x108   : > { %v395_v6 = vmul.f32 %v375_v4, %v3024_v20  ;;  %v353_v7 = vmul.f32 %v3024_v20, %v338_v5 }
 0x109   : > { %v3089_v8 = vpop.eup %2775  ;;  %v3110_v38 = vadd.f32 1e-05, %v399_v29 }
 0x10a   : > { %v2778_v9 = vpop.eup %2777  ;;  %v403_v10 = vadd.f32 1e-05, %v395_v6  ;;  %v3091_v11 = vsub.f32 %v313_v40, %v353_v7  ;;  %v431_v12 = vmul.f32 %v3089_v8, %v3084_v2  ;;  %vm437_vm8 = vweird.f32 %v3089_v8 }
 0x10b   : > { %v411_v13 = vmul.f32 %v2778_v9, %v402_v3  ;;  %vm417_vm2 = vweird.f32 %v2778_v9  ;;  %vm3125_vm10 = vmor %vm436_vm7, %vm437_vm8 }
 0x10c   : > { %2779 = vrsqrt.f32 %v403_v10  ;;  %v369_v14 = vmul.f32 %v3091_v11, %v3091_v11  ;;  %v432_v18 = vmul.f32 %v3089_v8, %v431_v12  ;;  %vm418_vm4 = vmor %vm416_vm3, %vm417_vm2  ;;  %vm426_vm5 = vweird.f32 %v403_v10 }
 0x10d   : > { %v412_v15 = vmul.f32 %v2778_v9, %v411_v13  ;;  %vm466_vm2 = vweird.f32 %v3110_v38 }
 0x10e   : > { %v391_v17 = vsel %vm314_vm0, %v369_v14, 0.0  ;;  %v433_v31 = vmul.f32 0.5, %v432_v18 }
 0x10f   : > { %v413_v19 = vmul.f32 0.5, %v412_v15  ;;  %v381_v21 = vpop.xlane.xlu2 %380  ;;  %392 = vadd.xlane.f32.xlu0 %v391_v17  ;;  %v384_v22 = vpop.xlane.xlu0 %383 }
 0x110   : > { %v397_v23 = vmul.f32 %v381_v21, %v3024_v20  ;;  %v398_v24 = vmul.f32 %v384_v22, %v3024_v20  ;;  %v434_v45 = vsub.f32 1.5, %v433_v31 }
 0x111   : > { %v414_v25 = vsub.f32 1.5, %v413_v19 }
 0x112   : > { %v2780_v28 = vpop.eup %2779  ;;  %v405_v30 = vadd.f32 1e-05, %v397_v23  ;;  %v3102_v34 = vadd.f32 1e-05, %v398_v24  ;;  %v435_v54 = vmul.f32 %v3089_v8, %v434_v45 }
 0x113   : > { %v415_v32 = vmul.f32 %v2778_v9, %v414_v25  ;;  %v421_v33 = vmul.f32 %v2780_v28, %v403_v10  ;;  %vm427_vm6 = vweird.f32 %v2780_v28 }
 0x114   : > { %2781 = vrsqrt.f32 %v405_v30  ;;  %vm428_vm9 = vmor %vm426_vm5, %vm427_vm6  ;;  %v439_v1 = vsel %vm3125_vm10, %v3089_v8, %v435_v54  ;;  %vm446_vm11 = vweird.f32 %v405_v30  ;;  %vm456_vm14 = vweird.f32 %v3102_v34 }
 0x115   : > { %v419_v36 = vsel %vm418_vm4, %v2778_v9, %v415_v32  ;;  %v422_v37 = vmul.f32 %v2780_v28, %v421_v33  ;;  %2783 = vrsqrt.f32 %v3102_v34  ;;  %v492_v6 = vmul.f32 %v439_v1, %v3028_v26 }
 0x116   : > { %v490_v40 = vmul.f32 %v419_v36, %v3030_v27  ;;  %2785 = vrsqrt.f32 %v3110_v38 }
 0x117   : > { %v423_v46 = vmul.f32 0.5, %v422_v37  ;;  %v390_v47 = vpop.xlane.xlu2 %389  ;;  %v504_v8 = vmul.f32 %v3107_v35, %v492_v6 }
 0x118   : > { %v502_v48 = vmul.f32 %v3107_v35, %v490_v40  ;;  %v400_v27 = vmul.f32 %v390_v47, %v3024_v20 }
 0x119   : > { %v424_v49 = vsub.f32 1.5, %v423_v46  ;;  %v516_v15 = vadd.f32 %v3116_v42, %v504_v8 }
 0x11a   : > { %v2782_v50 = vpop.eup %2781  ;;  %v514_v51 = vadd.f32 %v3116_v42, %v502_v48  ;;  %v408_v61 = vadd.f32 1e-05, %v400_v27 }
 0x11b   : > { %v2784_v52 = vpop.eup %2783  ;;  %v425_v55 = vmul.f32 %v2780_v28, %v424_v49  ;;  %v441_v56 = vmul.f32 %v2782_v50, %v405_v30  ;;  %vm447_vm12 = vweird.f32 %v2782_v50 }
 0x11c   : > { %v451_v58 = vmul.f32 %v2784_v52, %v3102_v34  ;;  %2529 = vmatmul.msk.f32.vlgmr.msra.gmra.mxu0 %vm314_vm0, %v514_v51  ;;  %v2786_v2 = vpop.eup %2785  ;;  %2787 = vrsqrt.f32 %v408_v61  ;;  %vm448_vm13 = vmor %vm446_vm11, %vm447_vm12  ;;  %vm457_vm15 = vweird.f32 %v2784_v52  ;;  %vm476_vm5 = vweird.f32 %v408_v61 }
 0x11d   : > { %v442_v59 = vmul.f32 %v2782_v50, %v441_v56  ;;  %v429_v60 = vsel %vm428_vm9, %v2780_v28, %v425_v55  ;;  %v461_v7 = vmul.f32 %v2786_v2, %v3110_v38  ;;  %vm458_vm1 = vmor %vm456_vm14, %vm457_vm15  ;;  %vm467_vm3 = vweird.f32 %v2786_v2 }
 0x11e   : > { %v491_v62 = vmul.f32 %v429_v60, %v3045_v41  ;;  %v452_v0 = vmul.f32 %v2784_v52, %v451_v58  ;;  %vm468_vm4 = vmor %vm466_vm2, %vm467_vm3  ;;  %vm637_vm11 = vcmask 64512   ;;  %vm780_vm12 = vcmask 130048  }
 0x11f   : > { %v443_v63 = vmul.f32 0.5, %v442_v59  ;;  %v462_v10 = vmul.f32 %v2786_v2, %v461_v7 }
 0x120   : > { %v503_v3 = vmul.f32 %v3107_v35, %v491_v62  ;;  %v453_v9 = vmul.f32 0.5, %v452_v0 }
 0x121   : > { %v444_v4 = vsub.f32 1.5, %v443_v63  ;;  %v463_v16 = vmul.f32 0.5, %v462_v10 }
 0x122   : > { %v515_v5 = vadd.f32 %v3116_v42, %v503_v3  ;;  %v454_v13 = vsub.f32 1.5, %v453_v9  ;;  %v2788_v14 = vpop.eup %2787 }
 0x123   : > { %v445_v41 = vmul.f32 %v2782_v50, %v444_v4  ;;  %v471_v18 = vmul.f32 %v2788_v14, %v408_v61  ;;  %v464_v21 = vsub.f32 1.5, %v463_v16  ;;  %vm477_vm6 = vweird.f32 %v2788_v14 }
 0x124   : > { %2530 = vmatmul.msk.f32.gmra.mxu0 %vm314_vm0, %v515_v5  ;;  %v455_v17 = vmul.f32 %v2784_v52, %v454_v13  ;;  %vm478_vm7 = vmor %vm476_vm5, %vm477_vm6 }
 0x125   : > { %v449_v12 = vsel %vm448_vm13, %v2782_v50, %v445_v41  ;;  %v472_v23 = vmul.f32 %v2788_v14, %v471_v18  ;;  %v465_v28 = vmul.f32 %v2786_v2, %v464_v21 }
 0x126   : > { %v493_v26 = vmul.f32 %v449_v12, %v3051_v44  ;;  %v459_v22 = vsel %vm458_vm1, %v2784_v52, %v455_v17  ;;  %v2771_v52 = vld [vmem:[%s3954_s4] ss:$0 sm:$0xff]  ;;  %v596_v17 = vld [vmem:[%s3955_s5 + $0x8] sm:$0xff] }
 0x127   : > { %v494_v25 = vmul.f32 %v459_v22, %v3049_v43  ;;  %v473_v44 = vmul.f32 0.5, %v472_v23  ;;  %v469_v31 = vsel %vm468_vm4, %v2786_v2, %v465_v28  ;;  %v597_v22 = vld [vmem:[%s3955_s5 + $0x10] sm:$0xff]  ;;  %v598_v28 = vld [vmem:[%s3955_s5 + $0x18] sm:$0xff] }
 0x128   : > { %v505_v19 = vmul.f32 %v3107_v35, %v493_v26  ;;  %v495_v33 = vmul.f32 %v469_v31, %v3042_v39 }
 0x129   : > { %v506_v29 = vmul.f32 %v3107_v35, %v494_v25  ;;  %v474_v30 = vsub.f32 1.5, %v473_v44 }
 0x12a   : > { %v517_v24 = vadd.f32 %v3116_v42, %v505_v19  ;;  %v507_v43 = vmul.f32 %v3107_v35, %v495_v33  ;;  %v601_v33 = vld [vmem:[%s3955_s5 + $0x30] sm:$0xff] }
 0x12b   : > { %v518_v32 = vadd.f32 %v3116_v42, %v506_v29  ;;  %v475_v34 = vmul.f32 %v2788_v14, %v474_v30 }
 0x12c   : > { %2531 = vmatmul.msk.f32.gmra.mxu0 %vm314_vm0, %v516_v15  ;;  %v519_v37 = vadd.f32 %v3116_v42, %v507_v43 }
 0x12d   : > { %v479_v36 = vsel %vm478_vm7, %v2788_v14, %v475_v34  ;;  %v595_v14 = vld [vmem:[%s3955_s5] sm:$0xff] }
 0x12e   : > { %v496_v38 = vmul.f32 %v479_v36, %v3063_v53 }
 0x130   : > { %v508_v40 = vmul.f32 %v3107_v35, %v496_v38 }
 0x132   : > { %v520_v45 = vadd.f32 %v3116_v42, %v508_v40 }
 0x134   : > { %2532 = vmatmul.msk.f32.gmra.mxu0 %vm314_vm0, %v517_v24 }
 0x13c   : > { %2533 = vmatmul.msk.f32.gmra.mxu0 %vm314_vm0, %v518_v32 }
 0x144   : > { %2534 = vmatmul.msk.f32.gmra.mxu0 %vm314_vm0, %v519_v37  ;;  %v602_v37 = vld [vmem:[%s3955_s5 + $0x38] sm:$0xff] }
 0x14c   : > { %2535 = vmatmul.msk.f32.gmra.mxu0 %vm314_vm0, %v520_v45 }
 0x182   : > { %v393_v39 = vpop.xlane.xlu0 %392 }
 0x183   : > { %v401_v46 = vmul.f32 %v393_v39, %v3024_v20 }
 0x185   : > { %v409_v47 = vadd.f32 1e-05, %v401_v46 }
 0x187   : > { %2789 = vrsqrt.f32 %v409_v47  ;;  %vm486_vm9 = vweird.f32 %v409_v47 }
 0x18d   : > { %v2790_v48 = vpop.eup %2789 }
 0x18e   : > { %v481_v49 = vmul.f32 %v2790_v48, %v409_v47  ;;  %vm487_vm8 = vweird.f32 %v2790_v48 }
 0x18f   : > { %vm488_vm10 = vmor %vm486_vm9, %vm487_vm8 }
 0x190   : > { %v482_v50 = vmul.f32 %v2790_v48, %v481_v49 }
 0x192   : > { %v483_v27 = vmul.f32 0.5, %v482_v50 }
 0x194   : > { %v484_v51 = vsub.f32 1.5, %v483_v27 }
 0x196   : > { %v485_v53 = vmul.f32 %v2790_v48, %v484_v51 }
 0x198   : > { %v489_v54 = vsel %vm488_vm10, %v2790_v48, %v485_v53 }
 0x199   : > { %v571_v55 = vpop.f32.mrf.mxu0  ;;  %v497_v56 = vmul.f32 %v489_v54, %v3091_v11 }
 0x19a   : > { %v3166_v20 = vadd.f32 %v2771_v52, %v571_v55 }
 0x19b   : > { %v509_v57 = vmul.f32 %v3107_v35, %v497_v56 }
 0x19c   : > { %633 = vrot.lane.b32.xlu2 %v3166_v20, %s2936_s25 }
 0x19d   : > { %v521_v58 = vadd.f32 %v3116_v42, %v509_v57 }
 0x19f   : > { %2536 = vmatmul.msk.f32.gmra.mxu0 %vm314_vm0, %v521_v58 }
 0x1a1   : > { %v574_v59 = vpop.f32.mrf.mxu0 }
 0x1a2   : > { %v3172_v60 = vadd.f32 %v2771_v52, %v574_v59 }
 0x1a4   : > { %635 = vrot.lane.b32.xlu1 %v3172_v60, %s2936_s25  ;;  %v3248_v48 = vpack.i.bf16 %v3166_v20, %v3172_v60 }
 0x1a9   : > { %v577_v61 = vpop.f32.mrf.mxu0 }
 0x1aa   : > { %v3175_v62 = vadd.f32 %v2771_v52, %v577_v61 }
 0x1ac   : > { %671 = vrot.lane.b32.xlu2 %v3175_v62, %s2936_s25 }
 0x1b1   : > { %v580_v11 = vpop.f32.mrf.mxu0 }
 0x1b2   : > { %v3178_v63 = vadd.f32 %v2771_v52, %v580_v11 }
 0x1b4   : > { %673 = vrot.lane.b32.xlu0 %v3178_v63, %s2936_s25  ;;  %v3262_v51 = vpack.i.bf16 %v3175_v62, %v3178_v63 }
 0x1b9   : > { %v583_v35 = vpop.f32.mrf.mxu0 }
 0x1ba   : > { %v3181_v0 = vadd.f32 %v2771_v52, %v583_v35 }
 0x1bc   : > { %708 = vrot.lane.b32.xlu0 %v3181_v0, %s2936_s25 }
 0x1c1   : > { %v586_v42 = vpop.f32.mrf.mxu0 }
 0x1c2   : > { %v3184_v1 = vadd.f32 %v2771_v52, %v586_v42 }
 0x1c4   : > { %710 = vrot.lane.b32.xlu1 %v3184_v1, %s2936_s25 }
 0x1c9   : > { %v589_v2 = vpop.f32.mrf.mxu0 }
 0x1ca   : > { %v3187_v3 = vadd.f32 %v2771_v52, %v589_v2 }
 0x1cc   : > { %745 = vrot.lane.b32.xlu1 %v3187_v3, %s2936_s25 }
 0x1f6   : > { %v634_v5 = vpop.permute.xlu2 %633 }
 0x206   : > { %v672_v9 = vpop.permute.xlu2 %671 }
 0x216   : > { %v636_v4 = vpop.permute.xlu1 %635 }
 0x217   : > { %2537 = vmatpush.xpose.msk.msra.mxu1 %vm637_vm11, %v636_v4 }
 0x21b   : > { %2538 = vmatpush.xpose.msk.msra.mxu1 %vm637_vm11, %v634_v5 }
 0x21c   : > { %v592_v6 = vpop.f32.mrf.mxu0 }
 0x21d   : > { %v3192_v7 = vadd.f32 %v2771_v52, %v592_v6  ;;  %v600_v6 = vld [vmem:[%s3955_s5 + $0x28] sm:$0xff] }
 0x21e   : > { %2539 = vmatmul.msk.f32.vlgmr.msra.gmra.mxu1 %vm637_vm11, %v3166_v20 }
 0x21f   : > { %747 = vrot.lane.b32.xlu2 %v3192_v7, %s2936_s25  ;;  %v3258_v27 = vpack.i.bf16 %v3187_v3, %v3192_v7  ;;  %s2944_s25 = smov 104  }
 0x226   : > { %2540 = vmatmul.msk.f32.gmra.mxu1 %vm637_vm11, %v3172_v60  ;;  %v674_v41 = vpop.permute.xlu0 %673 }
 0x227   : > { %2541 = vmatpush.xpose.msk.msra.mxu2 %vm637_vm11, %v674_v41 }
 0x22b   : > { %2542 = vmatpush.xpose.msk.msra.mxu2 %vm637_vm11, %v672_v9 }
 0x22e   : > { %2543 = vmatmul.msk.f32.vlgmr.msra.gmra.mxu2 %vm637_vm11, %v3175_v62  ;;  %v709_v10 = vpop.permute.xlu0 %708 }
 0x236   : > { %v711_v8 = vpop.permute.xlu1 %710  ;;  %2544 = vmatmul.msk.f32.gmra.mxu2 %vm637_vm11, %v3178_v63 }
 0x237   : > { %2545 = vmatpush.xpose.msk.msrb.mxu1 %vm637_vm11, %v711_v8 }
 0x23b   : > { %2546 = vmatpush.xpose.msk.msrb.mxu1 %vm637_vm11, %v709_v10 }
 0x23e   : > { %2547 = vmatmul.msk.f32.vlgmr.msrb.gmra.mxu1 %vm637_vm11, %v3181_v0  ;;  %v746_v13 = vpop.permute.xlu1 %745 }
 0x246   : > { %2548 = vmatmul.msk.f32.gmra.mxu1 %vm637_vm11, %v3184_v1 }
 0x279   : > { %v748_v12 = vpop.permute.xlu2 %747 }
 0x27a   : > { %2549 = vmatpush.xpose.msk.msra.mxu1 %vm637_vm11, %v748_v12 }
 0x27e   : > { %2550 = vmatpush.xpose.msk.msra.mxu1 %vm637_vm11, %v746_v13 }
 0x281   : > { %2551 = vmatmul.msk.f32.vlgmr.msra.gmra.mxu1 %vm637_vm11, %v3187_v3 }
 0x289   : > { %2552 = vmatmul.msk.f32.gmra.mxu1 %vm637_vm11, %v3192_v7 }
 0x29b   : > { %v663_v15 = vpop.f32.mrf.mxu1 }
 0x29c   : > { %v664_v26 = vadd.f32 %v663_v15, %v595_v14 }
 0x29e   : > { %v781_v16 = vsel %vm780_vm12, %v664_v26, -inf }
 0x29f   : > { %782 = vmax.xlane.f32.xlu0 %v781_v16 }
 0x2a3   : > { %v666_v18 = vpop.f32.mrf.mxu1 }
 0x2a4   : > { %v667_v19 = vadd.f32 %v666_v18, %v596_v17 }
 0x2a6   : > { %v784_v21 = vsel %vm780_vm12, %v667_v19, -inf }
 0x2a7   : > { %785 = vmax.xlane.f32.xlu2 %v784_v21 }
 0x2b1   : > { %v700_v23 = vpop.f32.mrf.mxu2 }
 0x2b2   : > { %v701_v24 = vadd.f32 %v700_v23, %v597_v22  ;;  %v3318_v23 = vpack.i.bf16 %v3181_v0, %v3184_v1 }
 0x2b4   : > { %v787_v25 = vsel %vm780_vm12, %v701_v24, -inf }
 0x2b5   : > { %788 = vmax.xlane.f32.xlu1 %v787_v25 }
 0x2b9   : > { %v703_v44 = vpop.f32.mrf.mxu2 }
 0x2ba   : > { %v704_v29 = vadd.f32 %v703_v44, %v598_v28 }
 0x2bb   : > { %v3233_v31 = vpop.f32.mrf.mxu1 }
 0x2bc   : > { %v790_v30 = vsel %vm780_vm12, %v704_v29, -inf }
 0x2bd   : > { %791 = vmax.xlane.f32.xlu0 %v790_v30 }
 0x2c3   : > { %v740_v32 = vpop.f32.mrf.mxu1 }
 0x2c4   : > { %v3297_v41 = vadd.f32 %v740_v32, %v600_v6 }
 0x2c6   : > { %v796_v9 = vsel %vm780_vm12, %v3297_v41, -inf }
 0x2fe   : > { %v774_v34 = vpop.f32.mrf.mxu1 }
 0x2ff   : > { %v775_v43 = vadd.f32 %v774_v34, %v601_v33 }
 0x301   : > { %v799_v36 = vsel %vm780_vm12, %v775_v43, -inf }
 0x302   : > { %800 = vmax.xlane.f32.xlu2 %v799_v36 }
 0x306   : > { %v777_v38 = vpop.f32.mrf.mxu1 }
 0x307   : > { %v3242_v40 = vadd.f32 %v777_v38, %v602_v37 }
 0x309   : > { %v802_v45 = vsel %vm780_vm12, %v3242_v40, -inf }
 0x30a   : > { %803 = vmax.xlane.f32.xlu1 %v802_v45 }
 0x312   : > { %v783_v39 = vpop.xlane.xlu0 %782 }
 0x313   : > { %v805_v46 = vsub.f32 %v664_v26, %v783_v39 }
 0x315   : > { %v813_v47 = vmul.f32 1.442695, %v805_v46 }
 0x317   : > { %2791 = vpow2.f32 %v813_v47 }
 0x31a   : > { %2690 = vrot.lane.b32.xlu2 %v3248_v48, %s2937_s20  ;;  %v786_v53 = vpop.xlane.xlu2 %785 }
 0x31b   : > { %v806_v52 = vsub.f32 %v667_v19, %v786_v53 }
 0x31d   : > { %v3252_v49 = vpop.eup %2791  ;;  %v815_v54 = vmul.f32 1.442695, %v806_v52 }
 0x31e   : > { %v829_v50 = vsel %vm780_vm12, %v3252_v49, 0.0 }
 0x31f   : > { %830 = vadd.xlane.f32.xlu0 %v829_v50  ;;  %2793 = vpow2.f32 %v815_v54 }
 0x322   : > { %2700 = vrot.lane.b32.xlu2 %v3258_v27, %s2937_s20 }
 0x323   : > { %2695 = vrot.lane.b32.xlu1 %v3262_v51, %s2937_s20 }
 0x325   : > { %v3278_v56 = vpop.eup %2793 }
 0x326   : > { %v832_v58 = vsel %vm780_vm12, %v3278_v56, 0.0 }
 0x328   : > { %v789_v55 = vpop.xlane.xlu1 %788 }
 0x329   : > { %v807_v57 = vsub.f32 %v701_v24, %v789_v55 }
 0x32a   : > { %1093 = vrot.lane.b32.xlu2 %v3184_v1, %s2938_s21 }
 0x32b   : > { %v817_v59 = vmul.f32 1.442695, %v807_v57 }
 0x32d   : > { %2795 = vpow2.f32 %v817_v59 }
 0x330   : > { %v792_v61 = vpop.xlane.xlu0 %791 }
 0x331   : > { %v808_v11 = vsub.f32 %v704_v29, %v792_v61 }
 0x332   : > { %1087 = vrot.lane.b32.xlu2 %v3181_v0, %s2939_s22 }
 0x333   : > { %1015 = vrot.lane.b32.xlu0 %v3172_v60, %s2938_s21  ;;  %v819_v35 = vmul.f32 1.442695, %v808_v11  ;;  %v3284_v42 = vpop.eup %2795 }
 0x334   : > { %v835_v2 = vsel %vm780_vm12, %v3284_v42, 0.0 }
 0x335   : > { %2797 = vpow2.f32 %v819_v35 }
 0x33a   : > { %1009 = vrot.lane.b32.xlu2 %v3166_v20, %s2939_s22 }
 0x33b   : > { %v3288_v4 = vpop.eup %2797 }
 0x33c   : > { %v838_v5 = vsel %vm780_vm12, %v3288_v4, 0.0 }
 0x342   : > { %1011 = vrot.lane.b32.xlu2 %v3172_v60, %s2939_s22 }
 0x34a   : > { %1126 = vrot.lane.b32.xlu2 %v3187_v3, %s2939_s22 }
 0x34d   : > { %833 = vadd.xlane.f32.xlu1 %v832_v58 }
 0x35d   : > { %836 = vadd.xlane.f32.xlu0 %v835_v2 }
 0x365   : > { %839 = vadd.xlane.f32.xlu0 %v838_v5 }
 0x366   : > { %1091 = vrot.lane.b32.xlu1 %v3181_v0, %s2938_s21 }
 0x36e   : > { %1013 = vrot.lane.b32.xlu1 %v3166_v20, %s2938_s21 }
 0x373   : > { %797 = vmax.xlane.f32.xlu2 %v796_v9 }
 0x375   : > { %v801_v8 = vpop.xlane.xlu2 %800 }
 0x376   : > { %v811_v10 = vsub.f32 %v775_v43, %v801_v8  ;;  %1089 = vrot.lane.b32.xlu1 %v3184_v1, %s2939_s22  ;;  %v599_v43 = vld [vmem:[%s3955_s5 + $0x20] sm:$0xff] }
 0x377   : > { %v738_v36 = vadd.f32 %v3233_v31, %v599_v43 }
 0x378   : > { %v825_v12 = vmul.f32 1.442695, %v811_v10 }
 0x379   : > { %v793_v38 = vsel %vm780_vm12, %v738_v36, -inf }
 0x37a   : > { %2799 = vpow2.f32 %v825_v12 }
 0x37d   : > { %v804_v13 = vpop.xlane.xlu1 %803  ;;  %v2691_v14 = vpop.permute.xlu2 %2690 }
 0x37e   : > { %v812_v15 = vsub.f32 %v3242_v40, %v804_v13  ;;  %1130 = vrot.lane.b32.xlu1 %v3187_v3, %s2938_s21  ;;  %v2692_v26 = vunpack.i.l.bf16 %v2691_v14  ;;  %v2693_v18 = vunpack.i.h.bf16 %v2691_v14 }
 0x380   : > { %v3308_v16 = vpop.eup %2799  ;;  %v827_v17 = vmul.f32 1.442695, %v812_v15  ;;  %895 = vmatpush.msrb.mxu2 %v2692_v26 }
 0x381   : > { %v847_v19 = vsel %vm780_vm12, %v3308_v16, 0.0 }
 0x382   : > { %2801 = vpow2.f32 %v827_v17  ;;  %896 = vmatpush.msrb.mxu2 %v2693_v18  ;;  %848 = vadd.xlane.f32.xlu0 %v847_v19 }
 0x385   : > { %v2701_v44 = vpop.permute.xlu2 %2700 }
 0x386   : > { %v2702_v33 = vunpack.i.l.bf16 %v2701_v44  ;;  %v2703_v34 = vunpack.i.h.bf16 %v2701_v44 }
 0x388   : > { %v3312_v21 = vpop.eup %2801 }
 0x389   : > { %v850_v22 = vsel %vm780_vm12, %v3312_v21, 0.0 }
 0x38a   : > { %851 = vadd.xlane.f32.xlu0 %v850_v22 }
 0x38b   : > { %2705 = vrot.lane.b32.xlu2 %v3318_v23, %s2937_s20 }
 0x38d   : > { %v1094_v40 = vpop.permute.xlu2 %1093 }
 0x392   : > { %v831_v24 = vpop.xlane.xlu0 %830 }
 0x393   : > { %2803 = vrcp.f32 %v831_v24  ;;  %1048 = vrot.lane.b32.xlu2 %v3175_v62, %s2939_s22 }
 0x395   : > { %v2696_v25 = vpop.permute.xlu1 %2695  ;;  %v1088_v45 = vpop.permute.xlu2 %1087 }
 0x396   : > { %v2697_v28 = vunpack.i.l.bf16 %v2696_v25  ;;  %v2698_v29 = vunpack.i.h.bf16 %v2696_v25 }
 0x398   : > { %930 = vmatpush.msra.mxu2 %v2697_v28  ;;  %v609_v28 = vld [vmem:[%s3955_s5 + $0x70] sm:$0xff] }
 0x399   : > { %v2804_v30 = vpop.eup %2803 }
 0x39a   : > { %931 = vmatpush.msra.mxu2 %v2698_v29  ;;  %v861_v32 = vmul.f32 %v2804_v30, %v3252_v49 }
 0x39b   : > { %1050 = vrot.lane.b32.xlu2 %v3178_v63, %s2939_s22 }
 0x39c   : > { %2553 = vmatmul.msk.f32.vlgmr.msrb.gmra.mxu2 %vm780_vm12, %v861_v32 }
 0x39d   : > { %1000 = vmatpush.msrb.mxu2 %v2702_v33  ;;  %v1010_v49 = vpop.permute.xlu2 %1009  ;;  %v610_v33 = vld [vmem:[%s3955_s5 + $0x78] sm:$0xff] }
 0x39e   : > { %1132 = vrot.lane.b32.xlu0 %v3192_v7, %s2938_s21 }
 0x39f   : > { %1001 = vmatpush.msrb.mxu2 %v2703_v34 }
 0x3a5   : > { %v1016_v37 = vpop.permute.xlu0 %1015  ;;  %v1012_v50 = vpop.permute.xlu2 %1011 }
 0x3a6   : > { %1128 = vrot.lane.b32.xlu0 %v3192_v7, %s2939_s22  ;;  %2561 = vmatpush.xpose.msk.msra.mxu3 %vm637_vm11, %v1016_v37 }
 0x3a8   : > { %794 = vmax.xlane.f32.xlu1 %v793_v38 }
 0x3ad   : > { %v1127_v57 = vpop.permute.xlu2 %1126 }
 0x3c0   : > { %v834_v39 = vpop.xlane.xlu1 %833 }
 0x3c1   : > { %2805 = vrcp.f32 %v834_v39 }
 0x3c7   : > { %v2806_v46 = vpop.eup %2805 }
 0x3c8   : > { %v862_v47 = vmul.f32 %v2806_v46, %v3278_v56 }
 0x3ca   : > { %2554 = vmatmul.msk.f32.gmra.mxu2 %vm780_vm12, %v862_v47 }
 0x3d0   : > { %v837_v31 = vpop.xlane.xlu0 %836 }
 0x3d1   : > { %2807 = vrcp.f32 %v837_v31 }
 0x3d7   : > { %v2808_v53 = vpop.eup %2807 }
 0x3d8   : > { %v863_v52 = vmul.f32 %v2808_v53, %v3284_v42  ;;  %v1092_v54 = vpop.permute.xlu1 %1091  ;;  %v840_v55 = vpop.xlane.xlu0 %839 }
 0x3d9   : > { %2809 = vrcp.f32 %v840_v55  ;;  %v607_v55 = vld [vmem:[%s3955_s5 + $0x60] sm:$0xff] }
 0x3da   : > { %2555 = vmatmul.msk.f32.vlgmr.msra.gmra.mxu2 %vm780_vm12, %v863_v52 }
 0x3db   : > { %2569 = vmatpush.xpose.msk.msra.mxu2 %vm637_vm11, %v1094_v40 }
 0x3df   : > { %v2810_v58 = vpop.eup %2809  ;;  %2570 = vmatpush.xpose.msk.msra.mxu2 %vm637_vm11, %v1092_v54 }
 0x3e0   : > { %v1014_v56 = vpop.permute.xlu1 %1013  ;;  %v864_v59 = vmul.f32 %v2810_v58, %v3288_v4 }
 0x3e1   : > { %2562 = vmatpush.xpose.msk.msra.mxu3 %vm637_vm11, %v1014_v56  ;;  %v608_v56 = vld [vmem:[%s3955_s5 + $0x68] sm:$0xff] }
 0x3e2   : > { %2556 = vmatmul.msk.f32.gmra.mxu2 %vm780_vm12, %v864_v59 }
 0x3e4   : > { %2563 = vmatmul.msk.f32.vlgmr.msra.gmra.mxu3 %vm637_vm11, %v1010_v49 }
 0x3e6   : > { %v798_v61 = vpop.xlane.xlu2 %797 }
 0x3e7   : > { %v810_v26 = vsub.f32 %v3297_v41, %v798_v61 }
 0x3e8   : > { %v1090_v10 = vpop.permute.xlu1 %1089 }
 0x3e9   : > { %v823_v18 = vmul.f32 1.442695, %v810_v26 }
 0x3ec   : > { %2564 = vmatmul.msk.f32.gmra.mxu3 %vm637_vm11, %v1012_v50 }
 0x3ee   : > { %v2706_v11 = vpop.permute.xlu2 %2705 }
 0x3ef   : > { %v2707_v35 = vunpack.i.l.bf16 %v2706_v11  ;;  %v2708_v42 = vunpack.i.h.bf16 %v2706_v11 }
 0x3f0   : > { %v1131_v13 = vpop.permute.xlu1 %1130 }
 0x3f1   : > { %965 = vmatpush.msrb.mxu1 %v2707_v35 }
 0x3f3   : > { %966 = vmatpush.msrb.mxu1 %v2708_v42 }
 0x3f5   : > { %v849_v2 = vpop.xlane.xlu0 %848 }
 0x3f6   : > { %2811 = vrcp.f32 %v849_v2 }
 0x3fc   : > { %v2812_v5 = vpop.eup %2811 }
 0x3fd   : > { %v867_v6 = vmul.f32 %v2812_v5, %v3308_v16  ;;  %v852_v4 = vpop.xlane.xlu0 %851 }
 0x3fe   : > { %2813 = vrcp.f32 %v852_v4 }
 0x3ff   : > { %2559 = vmatmul.msk.f32.vlgmr.msrb.gmra.mxu2 %vm780_vm12, %v867_v6 }
 0x404   : > { %v2814_v9 = vpop.eup %2813 }
 0x405   : > { %v868_v8 = vmul.f32 %v2814_v9, %v3312_v21 }
 0x407   : > { %2560 = vmatmul.msk.f32.gmra.mxu2 %vm780_vm12, %v868_v8 }
 0x40f   : > { %2571 = vmatmul.msk.f32.vlgmr.msra.gmra.mxu2 %vm637_vm11, %v1088_v45 }
 0x410   : > { %v1133_v12 = vpop.permute.xlu0 %1132 }
 0x411   : > { %2573 = vmatpush.xpose.msk.msrb.mxu3 %vm637_vm11, %v1133_v12 }
 0x415   : > { %2574 = vmatpush.xpose.msk.msrb.mxu3 %vm637_vm11, %v1131_v13 }
 0x417   : > { %2572 = vmatmul.msk.f32.gmra.mxu2 %vm637_vm11, %v1090_v10 }
 0x418   : > { %2575 = vmatmul.msk.f32.vlgmr.msrb.gmra.mxu3 %vm637_vm11, %v1127_v57  ;;  %v1129_v17 = vpop.permute.xlu0 %1128 }
 0x41b   : > { %v795_v14 = vpop.xlane.xlu1 %794 }
 0x41c   : > { %v809_v15 = vsub.f32 %v738_v36, %v795_v14  ;;  %v1049_v14 = vpop.permute.xlu2 %1048 }
 0x41e   : > { %v821_v16 = vmul.f32 1.442695, %v809_v15 }
 0x41f   : > { %v3385_v47 = vpop.f32.mrf.mxu2 }
 0x420   : > { %2815 = vpow2.f32 %v821_v16  ;;  %2576 = vmatmul.msk.f32.gmra.mxu3 %vm637_vm11, %v1129_v17 }
 0x421   : > { %2817 = vpow2.f32 %v823_v18 }
 0x424   : > { %v1051_v16 = vpop.permute.xlu2 %1050 }
 0x426   : > { %v2816_v19 = vpop.eup %2815 }
 0x427   : > { %v841_v21 = vsel %vm780_vm12, %v2816_v19, 0.0  ;;  %v2818_v22 = vpop.eup %2817 }
 0x428   : > { %842 = vadd.xlane.f32.xlu0 %v841_v21  ;;  %v844_v24 = vsel %vm780_vm12, %v2818_v22, 0.0 }
 0x430   : > { %845 = vadd.xlane.f32.xlu0 %v844_v24 }
 0x444   : > { %1054 = vrot.lane.b32.xlu0 %v3178_v63, %s2938_s21 }
 0x44d   : > { %v3391_v49 = vpop.f32.mrf.mxu2 }
 0x45d   : > { %v3395_v31 = vpop.f32.mrf.mxu2 }
 0x465   : > { %v3399_v50 = vpop.f32.mrf.mxu2 }
 0x467   : > { %v3364_v25 = vpop.f32.mrf.mxu3 }
 0x46f   : > { %v3366_v41 = vpop.f32.mrf.mxu3 }
 0x482   : > { %v3401_v53 = vpop.f32.mrf.mxu2 }
 0x48a   : > { %v3403_v52 = vpop.f32.mrf.mxu2 }
 0x492   : > { %v1120_v54 = vpop.f32.mrf.mxu2 }
 0x493   : > { %v1121_v57 = vadd.f32 %v1120_v54, %v607_v55 }
 0x495   : > { %v1177_v58 = vsel %vm780_vm12, %v1121_v57, -inf }
 0x49a   : > { %v1123_v59 = vpop.f32.mrf.mxu2 }
 0x49b   : > { %v1159_v44 = vpop.f32.mrf.mxu3  ;;  %v843_v29 = vpop.xlane.xlu0 %842  ;;  %v1124_v61 = vadd.f32 %v1123_v59, %v608_v56 }
 0x49c   : > { %v1160_v30 = vadd.f32 %v1159_v44, %v609_v28  ;;  %2819 = vrcp.f32 %v843_v29 }
 0x49d   : > { %v1180_v11 = vsel %vm780_vm12, %v1124_v61, -inf }
 0x49e   : > { %v1183_v32 = vsel %vm780_vm12, %v1160_v30, -inf }
 0x49f   : > { %1184 = vmax.xlane.f32.xlu1 %v1183_v32 }
 0x4a2   : > { %v2820_v34 = vpop.eup %2819 }
 0x4a3   : > { %v865_v43 = vmul.f32 %v2820_v34, %v2816_v19  ;;  %v1162_v36 = vpop.f32.mrf.mxu3  ;;  %v846_v37 = vpop.xlane.xlu0 %845 }
 0x4a4   : > { %v1163_v38 = vadd.f32 %v1162_v36, %v610_v33  ;;  %2821 = vrcp.f32 %v846_v37 }
 0x4a5   : > { %2557 = vmatmul.msk.f32.vlgmr.msrb.gmra.mxu1 %vm780_vm12, %v865_v43 }
 0x4a6   : > { %v1186_v40 = vsel %vm780_vm12, %v1163_v38, -inf }
 0x4a7   : > { %1187 = vmax.xlane.f32.xlu0 %v1186_v40 }
 0x4aa   : > { %v2822_v45 = vpop.eup %2821 }
 0x4ab   : > { %v866_v39 = vmul.f32 %v2822_v45, %v2818_v22 }
 0x4ad   : > { %2558 = vmatmul.msk.f32.gmra.mxu1 %vm780_vm12, %v866_v39 }
 0x4b6   : > { %v1055_v46 = vpop.permute.xlu0 %1054 }
 0x4b7   : > { %2565 = vmatpush.xpose.msk.msra.mxu1 %vm637_vm11, %v1055_v46 }
 0x4b8   : > { %1052 = vrot.lane.b32.xlu1 %v3175_v62, %s2938_s21 }
 0x4bb   : > { %1529 = vrot.lane.b32.xlu0 %v3172_v60, %s2940_s13 }
 0x4c0   : > { %2710 = vrot.lane.b32.xlu1 %v3318_v23, %s2941_s14 }
 0x4c3   : > { %1523 = vrot.lane.b32.xlu0 %v3166_v20, %s2942_s15 }
 0x4c8   : > { %2715 = vrot.lane.b32.xlu1 %v3258_v27, %s2941_s14 }
 0x4d0   : > { %1607 = vrot.lane.b32.xlu1 %v3184_v1, %s2940_s13 }
 0x4d8   : > { %1568 = vrot.lane.b32.xlu1 %v3178_v63, %s2940_s13 }
 0x502   : > { %1178 = vmax.xlane.f32.xlu1 %v1177_v58 }
 0x50a   : > { %1181 = vmax.xlane.f32.xlu1 %v1180_v11 }
 0x512   : > { %v1185_v35 = vpop.xlane.xlu1 %1184 }
 0x513   : > { %v1195_v42 = vsub.f32 %v1160_v30, %v1185_v35  ;;  %v606_v35 = vld [vmem:[%s3955_s5 + $0x58] sm:$0xff] }
 0x515   : > { %v1209_v2 = vmul.f32 1.442695, %v1195_v42 }
 0x517   : > { %2823 = vpow2.f32 %v1209_v2 }
 0x51a   : > { %v1188_v5 = vpop.xlane.xlu0 %1187 }
 0x51b   : > { %v1196_v6 = vsub.f32 %v1163_v38, %v1188_v5 }
 0x51d   : > { %v2824_v4 = vpop.eup %2823  ;;  %v1211_v9 = vmul.f32 1.442695, %v1196_v6  ;;  %v605_v6 = vld [vmem:[%s3955_s5 + $0x50] sm:$0xff] }
 0x51e   : > { %v1231_v8 = vsel %vm780_vm12, %v2824_v4, 0.0 }
 0x51f   : > { %2825 = vpow2.f32 %v1211_v9  ;;  %1232 = vadd.xlane.f32.xlu2 %v1231_v8 }
 0x522   : > { %v3437_v54 = vpop.f32.mrf.mxu1 }
 0x523   : > { %1566 = vrot.lane.b32.xlu1 %v3175_v62, %s2940_s13 }
 0x525   : > { %v2826_v10 = vpop.eup %2825 }
 0x526   : > { %v1234_v12 = vsel %vm780_vm12, %v2826_v10, 0.0 }
 0x527   : > { %1235 = vadd.xlane.f32.xlu0 %v1234_v12 }
 0x52a   : > { %v1053_v13 = vpop.permute.xlu1 %1052 }
 0x52b   : > { %2566 = vmatpush.xpose.msk.msra.mxu1 %vm637_vm11, %v1053_v13 }
 0x52d   : > { %v1530_v18 = vpop.permute.xlu0 %1529 }
 0x52e   : > { %2567 = vmatmul.msk.f32.vlgmr.msra.gmra.mxu1 %vm637_vm11, %v1049_v14 }
 0x532   : > { %v2711_v15 = vpop.permute.xlu1 %2710 }
 0x533   : > { %v2712_v26 = vunpack.i.l.bf16 %v2711_v15  ;;  %v2713_v17 = vunpack.i.h.bf16 %v2711_v15 }
 0x535   : > { %1349 = vmatpush.msrb.mxu2 %v2712_v26  ;;  %v1524_v40 = vpop.permute.xlu0 %1523 }
 0x536   : > { %2568 = vmatmul.msk.f32.gmra.mxu1 %vm637_vm11, %v1051_v16 }
 0x537   : > { %1527 = vrot.lane.b32.xlu2 %v3166_v20, %s2940_s13  ;;  %1350 = vmatpush.msrb.mxu2 %v2713_v17 }
 0x539   : > { %2601 = vmatpush.xpose.msk.msra.mxu2 %vm637_vm11, %v1530_v18 }
 0x53a   : > { %v2716_v19 = vpop.permute.xlu1 %2715 }
 0x53b   : > { %v2717_v21 = vunpack.i.l.bf16 %v2716_v19  ;;  %1603 = vrot.lane.b32.xlu0 %v3184_v1, %s2942_s15  ;;  %v2718_v22 = vunpack.i.h.bf16 %v2716_v19 }
 0x53d   : > { %1384 = vmatpush.msra.mxu3 %v2717_v21 }
 0x53f   : > { %1525 = vrot.lane.b32.xlu2 %v3172_v60, %s2942_s15  ;;  %1385 = vmatpush.msra.mxu3 %v2718_v22 }
 0x542   : > { %v3427_v24 = vpop.permute.xlu1 %1607 }
 0x547   : > { %1605 = vrot.lane.b32.xlu2 %v3181_v0, %s2940_s13 }
 0x54a   : > { %v1569_v28 = vpop.permute.xlu1 %1568 }
 0x54b   : > { %2605 = vmatpush.xpose.msk.msrb.mxu3 %vm637_vm11, %v1569_v28 }
 0x54f   : > { %1601 = vrot.lane.b32.xlu2 %v3181_v0, %s2942_s15 }
 0x575   : > { %v1179_v44 = vpop.xlane.xlu1 %1178 }
 0x576   : > { %v1193_v29 = vsub.f32 %v1121_v57, %v1179_v44 }
 0x578   : > { %v1205_v30 = vmul.f32 1.442695, %v1193_v29 }
 0x57a   : > { %2827 = vpow2.f32 %v1205_v30 }
 0x57d   : > { %v1182_v32 = vpop.xlane.xlu1 %1181 }
 0x57e   : > { %v1194_v33 = vsub.f32 %v1124_v61, %v1182_v32  ;;  %v3445_v61 = vpop.f32.mrf.mxu1 }
 0x580   : > { %v2828_v34 = vpop.eup %2827  ;;  %v1207_v43 = vmul.f32 1.442695, %v1194_v33 }
 0x581   : > { %v1225_v36 = vsel %vm780_vm12, %v2828_v34, 0.0 }
 0x582   : > { %2829 = vpow2.f32 %v1207_v43  ;;  %1226 = vadd.xlane.f32.xlu2 %v1225_v36 }
 0x588   : > { %v2830_v37 = vpop.eup %2829 }
 0x589   : > { %v1228_v38 = vsel %vm780_vm12, %v2830_v37, 0.0 }
 0x58a   : > { %1229 = vadd.xlane.f32.xlu1 %v1228_v38 }
 0x592   : > { %v1233_v45 = vpop.xlane.xlu2 %1232 }
 0x593   : > { %2831 = vrcp.f32 %v1233_v45 }
 0x595   : > { %v1567_v39 = vpop.permute.xlu1 %1566 }
 0x596   : > { %2606 = vmatpush.xpose.msk.msrb.mxu3 %vm637_vm11, %v1567_v39 }
 0x599   : > { %v2832_v46 = vpop.eup %2831 }
 0x59a   : > { %v1251_v55 = vmul.f32 %v2832_v46, %v2824_v4  ;;  %v1528_v57 = vpop.permute.xlu2 %1527  ;;  %1562 = vrot.lane.b32.xlu2 %v3175_v62, %s2942_s15  ;;  %v1236_v58 = vpop.xlane.xlu0 %1235 }
 0x59b   : > { %2833 = vrcp.f32 %v1236_v58  ;;  %2602 = vmatpush.xpose.msk.msra.mxu2 %vm637_vm11, %v1528_v57  ;;  %v613_v58 = vld [vmem:[%s3955_s5 + $0x90] sm:$0xff] }
 0x59c   : > { %2583 = vmatmul.msk.f32.vlgmr.msra.gmra.mxu3 %vm780_vm12, %v1251_v55 }
 0x5a1   : > { %v2834_v56 = vpop.eup %2833 }
 0x5a2   : > { %1646 = vrot.lane.b32.xlu2 %v3192_v7, %s2940_s13  ;;  %v1252_v59 = vmul.f32 %v2834_v56, %v2826_v10  ;;  %v1526_v8 = vpop.permute.xlu2 %1525 }
 0x5a3   : > { %1564 = vrot.lane.b32.xlu1 %v3178_v63, %s2942_s15 }
 0x5a4   : > { %2584 = vmatmul.msk.f32.gmra.mxu3 %vm780_vm12, %v1252_v59 }
 0x5aa   : > { %1640 = vrot.lane.b32.xlu2 %v3187_v3, %s2942_s15  ;;  %v1606_v10 = vpop.permute.xlu2 %1605 }
 0x5ab   : > { %1644 = vrot.lane.b32.xlu1 %v3187_v3, %s2940_s13  ;;  %v1081_v11 = vpop.f32.mrf.mxu1 }
 0x5ac   : > { %v1082_v4 = vadd.f32 %v1081_v11, %v605_v6 }
 0x5ad   : > { %v1604_v28 = vpop.permute.xlu0 %1603 }
 0x5ae   : > { %v1171_v9 = vsel %vm780_vm12, %v1082_v4, -inf }
 0x5b2   : > { %v1602_v12 = vpop.permute.xlu2 %1601 }
 0x5b3   : > { %1642 = vrot.lane.b32.xlu1 %v3192_v7, %s2942_s15  ;;  %v1084_v42 = vpop.f32.mrf.mxu1  ;;  %s2946_s15 = smov 40  }
 0x5b4   : > { %v1085_v2 = vadd.f32 %v1084_v42, %v606_v35 }
 0x5b6   : > { %v1174_v5 = vsel %vm780_vm12, %v1085_v2, -inf }
 0x5b7   : > { %1175 = vmax.xlane.f32.xlu0 %v1174_v5  ;;  %v614_v5 = vld [vmem:[%s3955_s5 + $0x98] sm:$0xff] }
 0x5cb   : > { %2720 = vrot.lane.b32.xlu0 %v3262_v51, %s2941_s14 }
 0x5d3   : > { %1172 = vmax.xlane.f32.xlu2 %v1171_v9  ;;  %2730 = vrot.lane.b32.xlu0 %v3318_v23, %s2943_s24 }
 0x5db   : > { %1980 = vrot.lane.b32.xlu0 %v3166_v20, %s2944_s25 }
 0x5e3   : > { %2025 = vrot.lane.b32.xlu0 %v3178_v63, %s2945_s26 }
 0x5eb   : > { %2023 = vrot.lane.b32.xlu0 %v3175_v62, %s2945_s26 }
 0x5f3   : > { %1982 = vrot.lane.b32.xlu0 %v3172_v60, %s2944_s25 }
 0x5f5   : > { %v1227_v13 = vpop.xlane.xlu2 %1226 }
 0x5f6   : > { %2835 = vrcp.f32 %v1227_v13 }
 0x5fc   : > { %v2836_v14 = vpop.eup %2835 }
 0x5fd   : > { %v1249_v15 = vmul.f32 %v2836_v14, %v2828_v34  ;;  %v1563_v26 = vpop.permute.xlu2 %1562  ;;  %v1230_v16 = vpop.xlane.xlu1 %1229 }
 0x5fe   : > { %2837 = vrcp.f32 %v1230_v16  ;;  %2607 = vmatmul.msk.f32.vlgmr.msrb.gmra.mxu3 %vm637_vm11, %v1563_v26  ;;  %v616_v26 = vld [vmem:[%s3955_s5 + $0xa8] sm:$0xff] }
 0x5ff   : > { %2581 = vmatmul.msk.f32.vlgmr.msrb.gmra.mxu2 %vm780_vm12, %v1249_v15 }
 0x600   : > { %2609 = vmatpush.xpose.msk.msrb.mxu2 %vm637_vm11, %v3427_v24 }
 0x604   : > { %v2838_v17 = vpop.eup %2837  ;;  %2610 = vmatpush.xpose.msk.msrb.mxu2 %vm637_vm11, %v1606_v10 }
 0x605   : > { %v1647_v18 = vpop.permute.xlu2 %1646  ;;  %v1250_v19 = vmul.f32 %v2838_v17, %v2830_v37  ;;  %v618_v17 = vld [vmem:[%s3955_s5 + $0xb8] sm:$0xff] }
 0x606   : > { %2613 = vmatpush.xpose.msk.msra.mxu3 %vm637_vm11, %v1647_v18 }
 0x607   : > { %2582 = vmatmul.msk.f32.gmra.mxu2 %vm780_vm12, %v1250_v19 }
 0x60d   : > { %v1641_v24 = vpop.permute.xlu2 %1640 }
 0x60f   : > { %2603 = vmatmul.msk.f32.vlgmr.msra.gmra.mxu2 %vm637_vm11, %v1524_v40 }
 0x615   : > { %v1565_v21 = vpop.permute.xlu1 %1564 }
 0x616   : > { %2608 = vmatmul.msk.f32.gmra.mxu3 %vm637_vm11, %v1565_v21 }
 0x617   : > { %2604 = vmatmul.msk.f32.gmra.mxu2 %vm637_vm11, %v1526_v8 }
 0x61d   : > { %v1645_v22 = vpop.permute.xlu1 %1644 }
 0x61e   : > { %2614 = vmatpush.xpose.msk.msra.mxu3 %vm637_vm11, %v1645_v22 }
 0x61f   : > { %2611 = vmatmul.msk.f32.vlgmr.msrb.gmra.mxu2 %vm637_vm11, %v1602_v12  ;;  %v3493_v55 = vpop.f32.mrf.mxu3  ;;  %v617_v12 = vld [vmem:[%s3955_s5 + $0xb0] sm:$0xff] }
 0x621   : > { %2615 = vmatmul.msk.f32.vlgmr.msra.gmra.mxu3 %vm637_vm11, %v1641_v24 }
 0x625   : > { %v1643_v44 = vpop.permute.xlu1 %1642 }
 0x627   : > { %2612 = vmatmul.msk.f32.gmra.mxu2 %vm637_vm11, %v1604_v28  ;;  %v3495_v57 = vpop.f32.mrf.mxu3  ;;  %v627_v28 = vld [vmem:[%s3956_s6] sm:$0xff] }
 0x629   : > { %2616 = vmatmul.msk.f32.gmra.mxu3 %vm637_vm11, %v1643_v44 }
 0x62a   : > { %v1176_v29 = vpop.xlane.xlu0 %1175 }
 0x62b   : > { %v1192_v36 = vsub.f32 %v1085_v2, %v1176_v29 }
 0x62d   : > { %v1203_v38 = vmul.f32 1.442695, %v1192_v36 }
 0x63d   : > { %v2721_v30 = vpop.permute.xlu0 %2720 }
 0x63e   : > { %v2722_v32 = vunpack.i.l.bf16 %v2721_v30  ;;  %v2723_v33 = vunpack.i.h.bf16 %v2721_v30 }
 0x640   : > { %1314 = vmatpush.msrb.mxu1 %v2722_v32 }
 0x642   : > { %1315 = vmatpush.msrb.mxu1 %v2723_v33 }
 0x644   : > { %1497 = vmatpush.msra.mxu1 %v627_v28 }
 0x646   : > { %v1173_v34 = vpop.xlane.xlu2 %1172 }
 0x647   : > { %v1191_v43 = vsub.f32 %v1082_v4, %v1173_v34 }
 0x649   : > { %v1201_v37 = vmul.f32 1.442695, %v1191_v43 }
 0x64b   : > { %2839 = vpow2.f32 %v1201_v37 }
 0x64c   : > { %2841 = vpow2.f32 %v1203_v38 }
 0x651   : > { %v2840_v40 = vpop.eup %2839 }
 0x652   : > { %v1219_v45 = vsel %vm780_vm12, %v2840_v40, 0.0  ;;  %v2842_v39 = vpop.eup %2841 }
 0x653   : > { %1220 = vadd.xlane.f32.xlu1 %v1219_v45  ;;  %v1222_v46 = vsel %vm780_vm12, %v2842_v39, 0.0 }
 0x65b   : > { %1223 = vadd.xlane.f32.xlu1 %v1222_v46  ;;  %v2731_v46 = vpop.permute.xlu0 %2730 }
 0x681   : > { %v1595_v56 = vpop.f32.mrf.mxu3 }
 0x682   : > { %v1596_v59 = vadd.f32 %v1595_v56, %v613_v58  ;;  %v3500_v11 = vpop.f32.mrf.mxu2 }
 0x684   : > { %v1685_v35 = vsel %vm780_vm12, %v1596_v59, -inf }
 0x685   : > { %1686 = vmax.xlane.f32.xlu2 %v1685_v35 }
 0x68a   : > { %v3503_v42 = vpop.f32.mrf.mxu2 }
 0x692   : > { %v3505_v2 = vpop.f32.mrf.mxu2 }
 0x699   : > { %v1598_v6 = vpop.f32.mrf.mxu3 }
 0x69a   : > { %v3510_v4 = vadd.f32 %v1598_v6, %v614_v5  ;;  %v3512_v9 = vpop.f32.mrf.mxu2  ;;  %v2732_v5 = vunpack.i.l.bf16 %v2731_v46  ;;  %v2733_v6 = vunpack.i.h.bf16 %v2731_v46 }
 0x69c   : > { %v1688_v8 = vsel %vm780_vm12, %v3510_v4, -inf }
 0x69d   : > { %1689 = vmax.xlane.f32.xlu1 %v1688_v8 }
 0x6a2   : > { %v1634_v10 = vpop.f32.mrf.mxu2 }
 0x6a4   : > { %v1673_v13 = vpop.f32.mrf.mxu3 }
 0x6a5   : > { %v3519_v14 = vadd.f32 %v1673_v13, %v617_v12 }
 0x6a7   : > { %v1697_v15 = vsel %vm780_vm12, %v3519_v14, -inf }
 0x6a8   : > { %1698 = vmax.xlane.f32.xlu2 %v1697_v15  ;;  %v612_v15 = vld [vmem:[%s3955_s5 + $0x88] sm:$0xff] }
 0x6aa   : > { %v1637_v16 = vpop.f32.mrf.mxu2 }
 0x6ab   : > { %v3529_v18 = vadd.f32 %v1637_v16, %v616_v26  ;;  %v1560_v26 = vadd.f32 %v3512_v9, %v612_v15  ;;  %v1981_v9 = vpop.permute.xlu0 %1980 }
 0x6ac   : > { %v1676_v19 = vpop.f32.mrf.mxu3 }
 0x6ad   : > { %v1677_v21 = vadd.f32 %v1676_v19, %v618_v17  ;;  %v1694_v22 = vsel %vm780_vm12, %v3529_v18, -inf  ;;  %v1682_v16 = vsel %vm780_vm12, %v1560_v26, -inf }
 0x6ae   : > { %1695 = vmax.xlane.f32.xlu0 %v1694_v22 }
 0x6af   : > { %v1700_v24 = vsel %vm780_vm12, %v1677_v21, -inf }
 0x6b0   : > { %1701 = vmax.xlane.f32.xlu1 %v1700_v24 }
 0x6c2   : > { %2019 = vrot.lane.b32.xlu0 %v3175_v62, %s2944_s25  ;;  %v615_v62 = vld [vmem:[%s3955_s5 + $0xa0] sm:$0xff] }
 0x6c3   : > { %v3554_v43 = vadd.f32 %v1634_v10, %v615_v62 }
 0x6c6   : > { %v1221_v44 = vpop.xlane.xlu1 %1220 }
 0x6c7   : > { %2843 = vrcp.f32 %v1221_v44 }
 0x6c9   : > { %2725 = vrot.lane.b32.xlu1 %v3248_v48, %s2943_s24 }
 0x6cd   : > { %v2844_v29 = vpop.eup %2843 }
 0x6ce   : > { %v1247_v30 = vmul.f32 %v2844_v29, %v2840_v40  ;;  %v1224_v32 = vpop.xlane.xlu1 %1223 }
 0x6cf   : > { %2845 = vrcp.f32 %v1224_v32 }
 0x6d0   : > { %2579 = vmatmul.msk.f32.vlgmr.msrb.gmra.mxu1 %vm780_vm12, %v1247_v30 }
 0x6d1   : > { %1986 = vrot.lane.b32.xlu1 %v3172_v60, %s2945_s26 }
 0x6d5   : > { %v2846_v33 = vpop.eup %2845 }
 0x6d6   : > { %v1248_v34 = vmul.f32 %v2846_v33, %v2842_v39  ;;  %v603_v33 = vld [vmem:[%s3955_s5 + $0x40] sm:$0xff] }
 0x6d8   : > { %2580 = vmatmul.msk.f32.gmra.mxu1 %vm780_vm12, %v1248_v34  ;;  %v3631_v34 = vadd.f32 %v3364_v25, %v603_v33 }
 0x6e0   : > { %2593 = vmatmul.msk.f32.vlgmr.msra.gmra.mxu1 %vm637_vm11, %v3385_v47  ;;  %v1691_v47 = vsel %vm780_vm12, %v3554_v43, -inf }
 0x6e8   : > { %2594 = vmatmul.msk.f32.gmra.mxu1 %vm637_vm11, %v3391_v49 }
 0x6f0   : > { %2595 = vmatmul.msk.f32.gmra.mxu1 %vm637_vm11, %v3395_v31 }
 0x6f8   : > { %v1687_v60 = vpop.xlane.xlu2 %1686  ;;  %2596 = vmatmul.msk.f32.gmra.mxu1 %vm637_vm11, %v3399_v50 }
 0x6f9   : > { %v1705_v36 = vsub.f32 %v1596_v59, %v1687_v60  ;;  %v611_v59 = vld [vmem:[%s3955_s5 + $0x80] sm:$0xff]  ;;  %v1165_v60 = vsel %vm780_vm12, %v3631_v34, -inf }
 0x6fb   : > { %v1715_v37 = vmul.f32 1.442695, %v1705_v36  ;;  %1692 = vmax.xlane.f32.xlu1 %v1691_v47 }
 0x6fd   : > { %2847 = vpow2.f32 %v1715_v37 }
 0x700   : > { %2597 = vmatmul.msk.f32.gmra.mxu1 %vm637_vm11, %v3437_v54 }
 0x703   : > { %v3562_v49 = vpop.eup %2847 }
 0x704   : > { %v1733_v31 = vsel %vm780_vm12, %v3562_v49, 0.0 }
 0x705   : > { %1734 = vadd.xlane.f32.xlu2 %v1733_v31 }
 0x708   : > { %2598 = vmatmul.msk.f32.gmra.mxu1 %vm637_vm11, %v3445_v61 }
 0x710   : > { %2599 = vmatmul.msk.f32.gmra.mxu1 %vm637_vm11, %v3401_v53  ;;  %v1690_v50 = vpop.xlane.xlu1 %1689 }
 0x711   : > { %v1706_v45 = vsub.f32 %v3510_v4, %v1690_v50  ;;  %v3589_v4 = vadd.f32 %v3505_v2, %v611_v59 }
 0x713   : > { %v1717_v39 = vmul.f32 1.442695, %v1706_v45  ;;  %v1679_v13 = vsel %vm780_vm12, %v3589_v4, -inf }
 0x714   : > { %1984 = vrot.lane.b32.xlu1 %v3166_v20, %s2945_s26 }
 0x718   : > { %2600 = vmatmul.msk.f32.gmra.mxu1 %vm637_vm11, %v3403_v52 }
 0x71b   : > { %v1699_v8 = vpop.xlane.xlu2 %1698 }
 0x71c   : > { %v1709_v12 = vsub.f32 %v3519_v14, %v1699_v8 }
 0x71d   : > { %2735 = vrot.lane.b32.xlu2 %v3262_v51, %s2943_s24 }
 0x71e   : > { %v1723_v2 = vmul.f32 1.442695, %v1709_v12 }
 0x723   : > { %v1702_v54 = vpop.xlane.xlu1 %1701 }
 0x724   : > { %v1710_v38 = vsub.f32 %v1677_v21, %v1702_v54  ;;  %v3618_v21 = vpop.permute.xlu0 %2025 }
 0x726   : > { %v1725_v40 = vmul.f32 1.442695, %v1710_v38 }
 0x728   : > { %2849 = vpow2.f32 %v1725_v40 }
 0x729   : > { %2851 = vpow2.f32 %v1717_v39 }
 0x72a   : > { %2853 = vpow2.f32 %v1723_v2 }
 0x72e   : > { %v3577_v61 = vpop.eup %2849 }
 0x72f   : > { %v1748_v53 = vsel %vm780_vm12, %v3577_v61, 0.0  ;;  %v3581_v20 = vpop.eup %2851 }
 0x730   : > { %1749 = vadd.xlane.f32.xlu0 %v1748_v53  ;;  %v1736_v56 = vsel %vm780_vm12, %v3581_v20, 0.0  ;;  %v3602_v14 = vpop.eup %2853 }
 0x731   : > { %v1745_v17 = vsel %vm780_vm12, %v3602_v14, 0.0 }
 0x73b   : > { %v2726_v52 = vpop.permute.xlu1 %2725 }
 0x73c   : > { %v2727_v58 = vunpack.i.l.bf16 %v2726_v52  ;;  %v2728_v35 = vunpack.i.h.bf16 %v2726_v52 }
 0x73e   : > { %1737 = vadd.xlane.f32.xlu1 %v1736_v56  ;;  %1793 = vmatpush.msra.mxu2 %v2727_v58 }
 0x740   : > { %1794 = vmatpush.msra.mxu2 %v2728_v35 }
 0x742   : > { %1863 = vmatpush.msrb.mxu2 %v2732_v5 }
 0x743   : > { %v1987_v10 = vpop.permute.xlu1 %1986 }
 0x744   : > { %1864 = vmatpush.msrb.mxu2 %v2733_v6  ;;  %2103 = vrot.lane.b32.xlu0 %v3192_v7, %s2945_s26 }
 0x745   : > { %2633 = vmatpush.xpose.msk.msrb.mxu1 %vm637_vm11, %v1987_v10 }
 0x746   : > { %1680 = vmax.xlane.f32.xlu2 %v1679_v13 }
 0x74d   : > { %v3635_v36 = vpop.f32.mrf.mxu1 }
 0x74e   : > { %1683 = vmax.xlane.f32.xlu2 %v1682_v16 }
 0x756   : > { %1746 = vadd.xlane.f32.xlu2 %v1745_v17 }
 0x757   : > { %2740 = vrot.lane.b32.xlu1 %v3258_v27, %s2943_s24 }
 0x75f   : > { %2064 = vrot.lane.b32.xlu1 %v3184_v1, %s2945_s26 }
 0x767   : > { %2062 = vrot.lane.b32.xlu1 %v3181_v0, %s2945_s26 }
 0x76e   : > { %2021 = vrot.lane.b32.xlu2 %v3178_v63, %s2944_s25  ;;  %v1693_v22 = vpop.xlane.xlu1 %1692 }
 0x76f   : > { %2060 = vrot.lane.b32.xlu1 %v3184_v1, %s2944_s25  ;;  %v3622_v1 = vpop.permute.xlu0 %2023  ;;  %v1707_v56 = vsub.f32 %v3554_v43, %v1693_v22 }
 0x777   : > { %2097 = vrot.lane.b32.xlu1 %v3187_v3, %s2944_s25  ;;  %v1983_v32 = vpop.permute.xlu0 %1982 }
 0x778   : > { %v1735_v19 = vpop.xlane.xlu2 %1734 }
 0x779   : > { %2855 = vrcp.f32 %v1735_v19 }
 0x77f   : > { %v2856_v28 = vpop.eup %2855  ;;  %v1696_v62 = vpop.xlane.xlu0 %1695 }
 0x780   : > { %v2736_v24 = vpop.permute.xlu2 %2735  ;;  %v1761_v30 = vmul.f32 %v2856_v28, %v3562_v49  ;;  %v3639_v49 = vpop.f32.mrf.mxu1  ;;  %v1708_v10 = vsub.f32 %v3529_v18, %v1696_v62 }
 0x781   : > { %v2737_v44 = vunpack.i.l.bf16 %v2736_v24  ;;  %v2738_v29 = vunpack.i.h.bf16 %v2736_v24 }
 0x782   : > { %v1721_v2 = vmul.f32 1.442695, %v1708_v10 }
 0x783   : > { %1828 = vmatpush.msrb.mxu3 %v2737_v44 }
 0x785   : > { %1829 = vmatpush.msrb.mxu3 %v2738_v29 }
 0x786   : > { %2619 = vmatmul.msk.f32.vlgmr.msrb.gmra.mxu3 %vm780_vm12, %v1761_v30  ;;  %v1985_v63 = vpop.permute.xlu1 %1984 }
 0x787   : > { %2634 = vmatpush.xpose.msk.msrb.mxu1 %vm637_vm11, %v1985_v63  ;;  %v3637_v47 = vpop.permute.xlu0 %2019 }
 0x788   : > { %v3642_v25 = vpop.f32.mrf.mxu1 }
 0x78a   : > { %2635 = vmatmul.msk.f32.vlgmr.msrb.gmra.mxu1 %vm637_vm11, %v1981_v9 }
 0x790   : > { %v3647_v46 = vpop.f32.mrf.mxu1 }
 0x792   : > { %2636 = vmatmul.msk.f32.gmra.mxu1 %vm637_vm11, %v1983_v32  ;;  %v619_v32 = vld [vmem:[%s3955_s5 + $0xc0] sm:$0xff] }
 0x798   : > { %v3657_v13 = vpop.f32.mrf.mxu1 }
 0x7a0   : > { %v3665_v19 = vpop.f32.mrf.mxu1 }
 0x7a1   : > { %1166 = vmax.xlane.f32.xlu1 %v1165_v60 }
 0x7a3   : > { %v1750_v37 = vpop.xlane.xlu0 %1749 }
 0x7a8   : > { %v3671_v44 = vpop.f32.mrf.mxu1 }
 0x7b0   : > { %v3673_v29 = vpop.f32.mrf.mxu1 }
 0x7b1   : > { %v1738_v31 = vpop.xlane.xlu1 %1737 }
 0x7b2   : > { %2857 = vrcp.f32 %v1738_v31 }
 0x7b6   : > { %v2104_v50 = vpop.permute.xlu0 %2103 }
 0x7b7   : > { %2645 = vmatpush.xpose.msk.msra.mxu1 %vm637_vm11, %v2104_v50 }
 0x7b8   : > { %v2858_v54 = vpop.eup %2857  ;;  %v3675_v30 = vpop.f32.mrf.mxu1 }
 0x7b9   : > { %v1681_v38 = vpop.xlane.xlu2 %1680  ;;  %v1762_v40 = vmul.f32 %v2858_v54, %v3581_v20  ;;  %v1719_v20 = vmul.f32 1.442695, %v1707_v56 }
 0x7ba   : > { %v1703_v45 = vsub.f32 %v3589_v4, %v1681_v38 }
 0x7bb   : > { %2620 = vmatmul.msk.f32.gmra.mxu3 %vm780_vm12, %v1762_v40 }
 0x7bc   : > { %v1711_v53 = vmul.f32 1.442695, %v1703_v45 }
 0x7be   : > { %2859 = vpow2.f32 %v1711_v53  ;;  %v604_v53 = vld [vmem:[%s3955_s5 + $0x48] sm:$0xff] }
 0x7c1   : > { %v1684_v39 = vpop.xlane.xlu2 %1683 }
 0x7c2   : > { %v1704_v52 = vsub.f32 %v1560_v26, %v1684_v39  ;;  %v1046_v39 = vadd.f32 %v3366_v41, %v604_v53 }
 0x7c4   : > { %v3649_v58 = vpop.eup %2859  ;;  %v1713_v59 = vmul.f32 1.442695, %v1704_v52  ;;  %v1168_v52 = vsel %vm780_vm12, %v1046_v39, -inf }
 0x7c5   : > { %v1727_v35 = vsel %vm780_vm12, %v3649_v58, 0.0 }
 0x7c6   : > { %2861 = vpow2.f32 %v1713_v59  ;;  %1728 = vadd.xlane.f32.xlu2 %v1727_v35 }
 0x7c9   : > { %v1747_v5 = vpop.xlane.xlu2 %1746  ;;  %v2741_v6 = vpop.permute.xlu1 %2740 }
 0x7ca   : > { %2863 = vrcp.f32 %v1747_v5  ;;  %v2742_v4 = vunpack.i.l.bf16 %v2741_v6  ;;  %v2743_v12 = vunpack.i.h.bf16 %v2741_v6 }
 0x7cb   : > { %2865 = vpow2.f32 %v1719_v20 }
 0x7cc   : > { %v3654_v8 = vpop.eup %2861  ;;  %1898 = vmatpush.msra.mxu3 %v2742_v4  ;;  %2867 = vrcp.f32 %v1750_v37 }
 0x7cd   : > { %v1730_v43 = vsel %vm780_vm12, %v3654_v8, 0.0  ;;  %2869 = vpow2.f32 %v1721_v2 }
 0x7ce   : > { %1731 = vadd.xlane.f32.xlu2 %v1730_v43  ;;  %1899 = vmatpush.msra.mxu3 %v2743_v12 }
 0x7d0   : > { %v2864_v15 = vpop.eup %2863 }
 0x7d1   : > { %v1765_v26 = vmul.f32 %v2864_v15, %v3602_v14  ;;  %v2065_v16 = vpop.permute.xlu1 %2064  ;;  %v2866_v17 = vpop.eup %2865 }
 0x7d2   : > { %2641 = vmatpush.xpose.msk.msrb.mxu3 %vm637_vm11, %v2065_v16  ;;  %v1739_v18 = vsel %vm780_vm12, %v2866_v17, 0.0  ;;  %v2868_v9 = vpop.eup %2867  ;;  %v2022_v56 = vpop.permute.xlu2 %2021 }
 0x7d3   : > { %2623 = vmatmul.msk.f32.vlgmr.msra.gmra.mxu3 %vm780_vm12, %v1765_v26  ;;  %v1766_v24 = vmul.f32 %v2868_v9, %v3577_v61  ;;  %v2870_v28 = vpop.eup %2869  ;;  %v3681_v61 = vpop.f32.mrf.mxu1 }
 0x7d4   : > { %v1742_v14 = vsel %vm780_vm12, %v2870_v28, 0.0 }
 0x7d6   : > { %1740 = vadd.xlane.f32.xlu2 %v1739_v18 }
 0x7d9   : > { %v2063_v22 = vpop.permute.xlu1 %2062 }
 0x7da   : > { %2642 = vmatpush.xpose.msk.msrb.mxu3 %vm637_vm11, %v2063_v22 }
 0x7db   : > { %2624 = vmatmul.msk.f32.gmra.mxu3 %vm780_vm12, %v1766_v24 }
 0x7de   : > { %1743 = vadd.xlane.f32.xlu2 %v1742_v14 }
 0x7e1   : > { %v2061_v63 = vpop.permute.xlu1 %2060 }
 0x7f6   : > { %2058 = vrot.lane.b32.xlu2 %v3181_v0, %s2944_s25  ;;  %v2098_v0 = vpop.permute.xlu1 %2097 }
 0x7fe   : > { %2101 = vrot.lane.b32.xlu2 %v3187_v3, %s2945_s26  ;;  %v620_v3 = vld [vmem:[%s3955_s5 + $0xc8] sm:$0xff] }
 0x806   : > { %2099 = vrot.lane.b32.xlu2 %v3192_v7, %s2944_s25 }
 0x807   : > { %v2013_v33 = vpop.f32.mrf.mxu1 }
 0x808   : > { %v3688_v62 = vadd.f32 %v2013_v33, %v619_v32 }
 0x809   : > { %v3731_v14 = vpop.f32.mrf.mxu3 }
 0x80a   : > { %v2136_v60 = vsel %vm780_vm12, %v3688_v62, -inf }
 0x80b   : > { %2137 = vmax.xlane.f32.xlu1 %v2136_v60 }
 0x80f   : > { %v2016_v37 = vpop.f32.mrf.mxu1 }
 0x810   : > { %v3695_v31 = vadd.f32 %v2016_v37, %v620_v3 }
 0x812   : > { %v2139_v50 = vsel %vm780_vm12, %v3695_v31, -inf }
 0x813   : > { %2140 = vmax.xlane.f32.xlu1 %v2139_v50 }
 0x814   : > { %v1167_v7 = vpop.xlane.xlu1 %1166 }
 0x815   : > { %v1189_v54 = vsub.f32 %v3631_v34, %v1167_v7 }
 0x817   : > { %v1197_v38 = vmul.f32 1.442695, %v1189_v54  ;;  %v623_v54 = vld [vmem:[%s3955_s5 + $0xe0] sm:$0xff] }
 0x819   : > { %2871 = vpow2.f32 %v1197_v38 }
 0x81f   : > { %v2872_v40 = vpop.eup %2871 }
 0x820   : > { %v1213_v45 = vsel %vm780_vm12, %v2872_v40, 0.0 }
 0x821   : > { %1214 = vadd.xlane.f32.xlu0 %v1213_v45 }
 0x82f   : > { %1169 = vmax.xlane.f32.xlu2 %v1168_v52 }
 0x839   : > { %v1729_v59 = vpop.xlane.xlu2 %1728 }
 0x83a   : > { %2873 = vrcp.f32 %v1729_v59 }
 0x840   : > { %v2874_v35 = vpop.eup %2873 }
 0x841   : > { %v1759_v34 = vmul.f32 %v2874_v35, %v3649_v58  ;;  %v1732_v20 = vpop.xlane.xlu2 %1731 }
 0x842   : > { %2875 = vrcp.f32 %v1732_v20 }
 0x843   : > { %2617 = vmatmul.msk.f32.vlgmr.msra.gmra.mxu2 %vm780_vm12, %v1759_v34 }
 0x844   : > { %2637 = vmatpush.xpose.msk.msra.mxu2 %vm637_vm11, %v3618_v21 }
 0x847   : > { %2745 = vrot.lane.b32.xlu2 %v3248_v48, %s2941_s14 }
 0x848   : > { %v2876_v41 = vpop.eup %2875  ;;  %2638 = vmatpush.xpose.msk.msra.mxu2 %vm637_vm11, %v3622_v1 }
 0x849   : > { %v1741_v5 = vpop.xlane.xlu2 %1740  ;;  %v1760_v6 = vmul.f32 %v2876_v41, %v3654_v8 }
 0x84a   : > { %2877 = vrcp.f32 %v1741_v5 }
 0x84b   : > { %2618 = vmatmul.msk.f32.gmra.mxu2 %vm780_vm12, %v1760_v6 }
 0x850   : > { %v2878_v58 = vpop.eup %2877 }
 0x851   : > { %v1763_v4 = vmul.f32 %v2878_v58, %v2866_v17  ;;  %v1744_v10 = vpop.xlane.xlu2 %1743 }
 0x852   : > { %2879 = vrcp.f32 %v1744_v10 }
 0x853   : > { %2621 = vmatmul.msk.f32.vlgmr.msrb.gmra.mxu2 %vm780_vm12, %v1763_v4  ;;  %v621_v4 = vld [vmem:[%s3955_s5 + $0xd0] sm:$0xff] }
 0x858   : > { %v2880_v21 = vpop.eup %2879 }
 0x859   : > { %v2059_v12 = vpop.permute.xlu2 %2058  ;;  %v1764_v43 = vmul.f32 %v2880_v21, %v2870_v28  ;;  %v626_v21 = vld [vmem:[%s3955_s5 + $0xf8] sm:$0xff] }
 0x85a   : > { %2643 = vmatmul.msk.f32.vlgmr.msrb.gmra.mxu3 %vm637_vm11, %v2059_v12 }
 0x85b   : > { %2622 = vmatmul.msk.f32.gmra.mxu2 %vm780_vm12, %v1764_v43 }
 0x861   : > { %v2102_v1 = vpop.permute.xlu2 %2101 }
 0x862   : > { %2644 = vmatmul.msk.f32.gmra.mxu3 %vm637_vm11, %v2061_v63  ;;  %2646 = vmatpush.xpose.msk.msra.mxu1 %vm637_vm11, %v2102_v1  ;;  %v3733_v63 = vpop.f32.mrf.mxu3 }
 0x863   : > { %2639 = vmatmul.msk.f32.vlgmr.msra.gmra.mxu2 %vm637_vm11, %v3637_v47 }
 0x865   : > { %2647 = vmatmul.msk.f32.vlgmr.msra.gmra.mxu1 %vm637_vm11, %v2098_v0 }
 0x869   : > { %v2100_v8 = vpop.permute.xlu2 %2099 }
 0x86a   : > { %v3737_v33 = vpop.f32.mrf.mxu3 }
 0x86b   : > { %2640 = vmatmul.msk.f32.gmra.mxu2 %vm637_vm11, %v2022_v56 }
 0x86d   : > { %2648 = vmatmul.msk.f32.gmra.mxu1 %vm637_vm11, %v2100_v8 }
 0x872   : > { %v3741_v3 = vpop.f32.mrf.mxu3 }
 0x87e   : > { %v2138_v0 = vpop.xlane.xlu1 %2137 }
 0x87f   : > { %v2160_v50 = vsub.f32 %v3688_v62, %v2138_v0  ;;  %v624_v62 = vld [vmem:[%s3955_s5 + $0xe8] sm:$0xff] }
 0x881   : > { %v2168_v7 = vmul.f32 1.442695, %v2160_v50 }
 0x886   : > { %v2141_v59 = vpop.xlane.xlu1 %2140 }
 0x887   : > { %v2161_v5 = vsub.f32 %v3695_v31, %v2141_v59 }
 0x889   : > { %v2170_v43 = vmul.f32 1.442695, %v2161_v5 }
 0x894   : > { %v1215_v15 = vpop.xlane.xlu0 %1214 }
 0x895   : > { %2881 = vrcp.f32 %v1215_v15 }
 0x89b   : > { %v2882_v18 = vpop.eup %2881 }
 0x89c   : > { %v1245_v28 = vmul.f32 %v2882_v18, %v2872_v40 }
 0x8a2   : > { %v1170_v2 = vpop.xlane.xlu2 %1169 }
 0x8a3   : > { %v1190_v26 = vsub.f32 %v1046_v39, %v1170_v2  ;;  %v625_v39 = vld [vmem:[%s3955_s5 + $0xf0] sm:$0xff] }
 0x8a5   : > { %v1199_v16 = vmul.f32 1.442695, %v1190_v26 }
 0x8a7   : > { %2883 = vpow2.f32 %v1199_v16  ;;  %v622_v16 = vld [vmem:[%s3955_s5 + $0xd8] sm:$0xff] }
 0x8a8   : > { %2885 = vpow2.f32 %v2168_v7 }
 0x8a9   : > { %2887 = vpow2.f32 %v2170_v43 }
 0x8aa   : > { %v2746_v17 = vpop.permute.xlu2 %2745 }
 0x8ab   : > { %v2747_v9 = vunpack.i.l.bf16 %v2746_v17  ;;  %v2748_v47 = vunpack.i.h.bf16 %v2746_v17 }
 0x8ad   : > { %v3726_v22 = vpop.eup %2883  ;;  %1279 = vmatpush.msrb.mxu0 %v2747_v9 }
 0x8ae   : > { %v1216_v24 = vsel %vm780_vm12, %v3726_v22, 0.0  ;;  %v3760_v35 = vpop.eup %2885 }
 0x8af   : > { %1217 = vadd.xlane.f32.xlu0 %v1216_v24  ;;  %1280 = vmatpush.msrb.mxu0 %v2748_v47  ;;  %v2184_v58 = vsel %vm780_vm12, %v3760_v35, 0.0  ;;  %v3782_v2 = vpop.eup %2887  ;;  %v628_v47 = vld [vmem:[%s3956_s6 + $0x8] sm:$0xff] }
 0x8b0   : > { %2577 = vmatmul.msk.f32.vlgmr.msrb.gmra.mxu0 %vm780_vm12, %v1245_v28  ;;  %v2187_v26 = vsel %vm780_vm12, %v3782_v2, 0.0 }
 0x8b1   : > { %1432 = vmatpush.msra.mxu0 %v628_v47 }
 0x8c6   : > { %v3735_v32 = vpop.f32.mrf.mxu2 }
 0x8ce   : > { %v3739_v60 = vpop.f32.mrf.mxu2 }
 0x8d6   : > { %v3743_v37 = vpop.f32.mrf.mxu2 }
 0x8dd   : > { %v2091_v38 = vpop.f32.mrf.mxu3 }
 0x8de   : > { %v2092_v40 = vadd.f32 %v2091_v38, %v623_v54  ;;  %v3749_v45 = vpop.f32.mrf.mxu2 }
 0x8e0   : > { %v2148_v53 = vsel %vm780_vm12, %v2092_v40, -inf }
 0x8e1   : > { %2149 = vmax.xlane.f32.xlu0 %v2148_v53 }
 0x8e2   : > { %v2130_v52 = vpop.f32.mrf.mxu1 }
 0x8e3   : > { %v3755_v56 = vadd.f32 %v2130_v52, %v625_v39 }
 0x8e5   : > { %v2094_v34 = vpop.f32.mrf.mxu3  ;;  %v2154_v20 = vsel %vm780_vm12, %v3755_v56, -inf }
 0x8e6   : > { %v3764_v41 = vadd.f32 %v2094_v34, %v624_v62  ;;  %2155 = vmax.xlane.f32.xlu2 %v2154_v20  ;;  %v2052_v10 = vpop.f32.mrf.mxu2 }
 0x8e7   : > { %v2053_v31 = vadd.f32 %v2052_v10, %v621_v4 }
 0x8e8   : > { %v2151_v6 = vsel %vm780_vm12, %v3764_v41, -inf }
 0x8e9   : > { %2152 = vmax.xlane.f32.xlu1 %v2151_v6  ;;  %2185 = vadd.xlane.f32.xlu0 %v2184_v58  ;;  %v2142_v15 = vsel %vm780_vm12, %v2053_v31, -inf }
 0x8ea   : > { %v2133_v12 = vpop.f32.mrf.mxu1 }
 0x8eb   : > { %v3777_v1 = vadd.f32 %v2133_v12, %v626_v21 }
 0x8ed   : > { %v2157_v8 = vsel %vm780_vm12, %v3777_v1, -inf }
 0x8ee   : > { %v2055_v17 = vpop.f32.mrf.mxu2 }
 0x8ef   : > { %v2056_v18 = vadd.f32 %v2055_v17, %v622_v16 }
 0x8f1   : > { %2158 = vmax.xlane.f32.xlu1 %v2157_v8  ;;  %2143 = vmax.xlane.f32.xlu0 %v2142_v15  ;;  %v2145_v9 = vsel %vm780_vm12, %v2056_v18, -inf }
 0x8f9   : > { %2188 = vadd.xlane.f32.xlu1 %v2187_v26 }
 0x901   : > { %2146 = vmax.xlane.f32.xlu1 %v2145_v9 }
 0x905   : > { %2750 = vrot.lane.b32.xlu0 %v3248_v48, %s2946_s15 }
 0x922   : > { %v1218_v24 = vpop.xlane.xlu0 %1217 }
 0x923   : > { %2889 = vrcp.f32 %v1218_v24 }
 0x929   : > { %v2890_v28 = vpop.eup %2889 }
 0x92a   : > { %v1246_v0 = vmul.f32 %v2890_v28, %v3726_v22 }
 0x92c   : > { %2578 = vmatmul.msk.f32.gmra.mxu0 %vm780_vm12, %v1246_v0 }
 0x92d   : > { %v1282_v50 = vpop.f32.mrf.mxu0 }
 0x934   : > { %2585 = vmatmul.msk.f32.vlgmr.msra.gmra.mxu0 %vm637_vm11, %v1282_v50 }
 0x954   : > { %v2150_v7 = vpop.xlane.xlu0 %2149 }
 0x955   : > { %v2164_v54 = vsub.f32 %v2092_v40, %v2150_v7 }
 0x957   : > { %v2176_v38 = vmul.f32 1.442695, %v2164_v54 }
 0x959   : > { %2891 = vpow2.f32 %v2176_v38  ;;  %v2156_v6 = vpop.xlane.xlu2 %2155 }
 0x95a   : > { %v2166_v10 = vsub.f32 %v3755_v56, %v2156_v6 }
 0x95c   : > { %v2186_v48 = vpop.xlane.xlu0 %2185  ;;  %v2153_v53 = vpop.xlane.xlu1 %2152  ;;  %v2180_v15 = vmul.f32 1.442695, %v2166_v10 }
 0x95f   : > { %v3798_v39 = vpop.eup %2891 }
 0x960   : > { %v2196_v52 = vsel %vm780_vm12, %v3798_v39, 0.0 }
 0x961   : > { %2197 = vadd.xlane.f32.xlu2 %v2196_v52 }
 0x964   : > { %v2144_v62 = vpop.xlane.xlu0 %2143  ;;  %v2159_v59 = vpop.xlane.xlu1 %2158 }
 0x965   : > { %v2162_v22 = vsub.f32 %v2053_v31, %v2144_v62  ;;  %v2167_v56 = vsub.f32 %v3777_v1, %v2159_v59 }
 0x967   : > { %v2172_v34 = vmul.f32 1.442695, %v2162_v22 }
 0x969   : > { %2893 = vpow2.f32 %v2172_v34 }
 0x96a   : > { %2895 = vrcp.f32 %v2186_v48 }
 0x96c   : > { %v2189_v20 = vpop.xlane.xlu1 %2188 }
 0x96f   : > { %v3802_v5 = vpop.eup %2893 }
 0x970   : > { %v2190_v40 = vsel %vm780_vm12, %v3802_v5, 0.0  ;;  %v2896_v43 = vpop.eup %2895 }
 0x971   : > { %2191 = vadd.xlane.f32.xlu1 %v2190_v40  ;;  %v2216_v26 = vmul.f32 %v2896_v43, %v3760_v35 }
 0x974   : > { %v2147_v58 = vpop.xlane.xlu1 %2146 }
 0x975   : > { %v2163_v4 = vsub.f32 %v2056_v18, %v2147_v58 }
 0x977   : > { %v2174_v21 = vmul.f32 1.442695, %v2163_v4  ;;  %v2751_v12 = vpop.permute.xlu0 %2750 }
 0x978   : > { %v2752_v8 = vunpack.i.l.bf16 %v2751_v12  ;;  %v2753_v31 = vunpack.i.h.bf16 %v2751_v12 }
 0x979   : > { %2897 = vpow2.f32 %v2174_v21  ;;  %2760 = vrot.lane.b32.xlu2 %v3318_v23, %s2946_s15  ;;  %v2182_v23 = vmul.f32 1.442695, %v2167_v56 }
 0x97a   : > { %2899 = vrcp.f32 %v2189_v20  ;;  %2250 = vmatpush.msrb.mxu2 %v2752_v8 }
 0x97b   : > { %2901 = vpow2.f32 %v2180_v15 }
 0x97c   : > { %2251 = vmatpush.msrb.mxu2 %v2753_v31  ;;  %2903 = vpow2.f32 %v2182_v23 }
 0x97d   : > { %2649 = vmatmul.msk.f32.vlgmr.msrb.gmra.mxu2 %vm780_vm12, %v2216_v26 }
 0x97f   : > { %v3811_v16 = vpop.eup %2897 }
 0x980   : > { %v2900_v17 = vpop.eup %2899  ;;  %v2193_v18 = vsel %vm780_vm12, %v3811_v16, 0.0 }
 0x981   : > { %2765 = vrot.lane.b32.xlu2 %v3258_v27, %s2946_s15  ;;  %2194 = vadd.xlane.f32.xlu0 %v2193_v18  ;;  %v2217_v9 = vmul.f32 %v2900_v17, %v3782_v2  ;;  %v2902_v35 = vpop.eup %2901  ;;  %v2165_v27 = vsub.f32 %v3764_v41, %v2153_v53  ;;  %v629_v41 = vld [vmem:[%s3956_s6 + $0x10] sm:$0xff]  ;;  %v3892_v18 = vld [vmem:[%s3957_s7] ss:$0 sm:$0xff] }
 0x982   : > { %v2202_v47 = vsel %vm780_vm12, %v2902_v35, 0.0  ;;  %v3823_v1 = vpop.eup %2903  ;;  %1946 = vmatpush.msrb.mxu0 %v629_v41  ;;  %v2920_v41 = vld [vmem:[%s3008_s10 + $0x8] sm:$0xff] }
 0x983   : > { %v2205_v24 = vsel %vm780_vm12, %v3823_v1, 0.0  ;;  %v2178_v28 = vmul.f32 1.442695, %v2165_v27 }
 0x985   : > { %2650 = vmatmul.msk.f32.gmra.mxu2 %vm780_vm12, %v2217_v9  ;;  %2905 = vpow2.f32 %v2178_v28 }
 0x989   : > { %2203 = vadd.xlane.f32.xlu0 %v2202_v47 }
 0x98a   : > { %2755 = vrot.lane.b32.xlu1 %v3262_v51, %s2946_s15 }
 0x98b   : > { %v3829_v0 = vpop.eup %2905 }
 0x98c   : > { %v2199_v51 = vsel %vm780_vm12, %v3829_v0, 0.0 }
 0x991   : > { %2206 = vadd.xlane.f32.xlu0 %v2205_v24  ;;  %v2919_v24 = vld [vmem:[%s3008_s10] sm:$0xff] }
 0x9a9   : > { %v1285_v2 = vpop.f32.mrf.mxu0 }
 0x9aa   : > { %2586 = vmatmul.msk.f32.gmra.mxu0 %vm637_vm11, %v1285_v2 }
 0x9b1   : > { %v1434_v10 = vpop.f32.mrf.mxu0 }
 0x9b2   : > { %2587 = vmatmul.msk.f32.gmra.mxu0 %vm637_vm11, %v3635_v36  ;;  %v1500_v56 = vadd.f32 %v3642_v25, %v1434_v10 }
 0x9b4   : > { %2200 = vadd.xlane.f32.xlu1 %v2199_v51 }
 0x9ba   : > { %2588 = vmatmul.msk.f32.gmra.mxu0 %vm637_vm11, %v3639_v49 }
 0x9c2   : > { %2589 = vmatmul.msk.f32.gmra.mxu0 %vm637_vm11, %v3500_v11 }
 0x9ca   : > { %2590 = vmatmul.msk.f32.gmra.mxu0 %vm637_vm11, %v3503_v42 }
 0x9d2   : > { %2591 = vmatmul.msk.f32.gmra.mxu0 %vm637_vm11, %v3493_v55 }
 0x9d4   : > { %v2198_v36 = vpop.xlane.xlu2 %2197 }
 0x9d5   : > { %2907 = vrcp.f32 %v2198_v36 }
 0x9da   : > { %2592 = vmatmul.msk.f32.gmra.mxu0 %vm637_vm11, %v3495_v57 }
 0x9db   : > { %v2908_v50 = vpop.eup %2907 }
 0x9dc   : > { %v2761_v49 = vpop.permute.xlu2 %2760  ;;  %v2220_v38 = vmul.f32 %v2908_v50, %v3798_v39 }
 0x9dd   : > { %v2762_v7 = vunpack.i.l.bf16 %v2761_v49  ;;  %v2763_v54 = vunpack.i.h.bf16 %v2761_v49 }
 0x9df   : > { %2320 = vmatpush.msrb.mxu1 %v2762_v7 }
 0x9e1   : > { %2321 = vmatpush.msrb.mxu1 %v2763_v54 }
 0x9e2   : > { %2625 = vmatmul.msk.f32.vlgmr.msrb.gmra.mxu0 %vm637_vm11, %v3735_v32  ;;  %2653 = vmatmul.msk.f32.vlgmr.msrb.gmra.mxu1 %vm780_vm12, %v2220_v38 }
 0x9e4   : > { %v2766_v11 = vpop.permute.xlu2 %2765  ;;  %v2192_v57 = vpop.xlane.xlu1 %2191 }
 0x9e5   : > { %v2767_v55 = vunpack.i.l.bf16 %v2766_v11  ;;  %v2768_v42 = vunpack.i.h.bf16 %v2766_v11  ;;  %2909 = vrcp.f32 %v2192_v57 }
 0x9e7   : > { %2355 = vmatpush.msra.mxu2 %v2767_v55 }
 0x9e9   : > { %2356 = vmatpush.msra.mxu2 %v2768_v42 }
 0x9ea   : > { %2626 = vmatmul.msk.f32.gmra.mxu0 %vm637_vm11, %v3739_v60 }
 0x9eb   : > { %v2910_v39 = vpop.eup %2909 }
 0x9ec   : > { %v2218_v59 = vmul.f32 %v2910_v39, %v3802_v5 }
 0x9f2   : > { %2627 = vmatmul.msk.f32.gmra.mxu0 %vm637_vm11, %v3731_v14  ;;  %v630_v14 = vld [vmem:[%s3956_s6 + $0x18] sm:$0xff] }
 0x9f4   : > { %v2195_v48 = vpop.xlane.xlu0 %2194 }
 0x9fa   : > { %2628 = vmatmul.msk.f32.gmra.mxu0 %vm637_vm11, %v3733_v63 }
 0x9fc   : > { %v2204_v32 = vpop.xlane.xlu0 %2203  ;;  %v2756_v53 = vpop.permute.xlu1 %2755 }
 0x9fd   : > { %2911 = vrcp.f32 %v2204_v32  ;;  %v2757_v52 = vunpack.i.l.bf16 %v2756_v53  ;;  %v2758_v62 = vunpack.i.h.bf16 %v2756_v53  ;;  %v2921_v32 = vld [vmem:[%s3008_s10 + $0x10] sm:$0xff] }
 0x9fe   : > { %2913 = vrcp.f32 %v2195_v48 }
 0x9ff   : > { %2285 = vmatpush.msra.mxu3 %v2757_v52 }
 0xa00   : > { %v2253_v40 = vpop.f32.mrf.mxu2 }
 0xa01   : > { %2286 = vmatpush.msra.mxu3 %v2758_v62 }
 0xa02   : > { %2629 = vmatmul.msk.f32.gmra.mxu0 %vm637_vm11, %v3743_v37  ;;  %2651 = vmatmul.msk.f32.vlgmr.msra.gmra.mxu3 %vm780_vm12, %v2218_v59 }
 0xa03   : > { %v2912_v63 = vpop.eup %2911  ;;  %2403 = vmatpush.msrb.mxu3 %v630_v14 }
 0xa04   : > { %v2222_v60 = vmul.f32 %v2912_v63, %v2902_v35  ;;  %v2207_v22 = vpop.xlane.xlu0 %2206  ;;  %v2914_v34 = vpop.eup %2913  ;;  %v2922_v63 = vld [vmem:[%s3008_s10 + $0x18] sm:$0xff] }
 0xa05   : > { %2915 = vrcp.f32 %v2207_v22  ;;  %v2219_v20 = vmul.f32 %v2914_v34, %v3811_v16 }
 0xa06   : > { %2655 = vmatmul.msk.f32.vlgmr.msra.gmra.mxu2 %vm780_vm12, %v2222_v60 }
 0xa08   : > { %v2256_v6 = vpop.f32.mrf.mxu2 }
 0xa0a   : > { %2630 = vmatmul.msk.f32.gmra.mxu0 %vm637_vm11, %v3749_v45  ;;  %2652 = vmatmul.msk.f32.gmra.mxu3 %vm780_vm12, %v2219_v20 }
 0xa0b   : > { %v2916_v5 = vpop.eup %2915 }
 0xa0c   : > { %v2223_v37 = vmul.f32 %v2916_v5, %v3823_v1  ;;  %v2923_v5 = vld [vmem:[%s3008_s10 + $0x20] sm:$0xff] }
 0xa0e   : > { %2656 = vmatmul.msk.f32.gmra.mxu2 %vm780_vm12, %v2223_v37 }
 0xa12   : > { %2631 = vmatmul.msk.f32.gmra.mxu0 %vm637_vm11, %v3737_v33  ;;  %2657 = vmatmul.msk.f32.vlgmr.msrb.gmra.mxu3 %vm637_vm11, %v2253_v40 }
 0xa1a   : > { %2632 = vmatmul.msk.f32.gmra.mxu0 %vm637_vm11, %v3741_v3  ;;  %2658 = vmatmul.msk.f32.gmra.mxu3 %vm637_vm11, %v2256_v6 }
 0xa27   : > { %v2201_v45 = vpop.xlane.xlu1 %2200  ;;  %v1437_v21 = vpop.f32.mrf.mxu0 }
 0xa28   : > { %2917 = vrcp.f32 %v2201_v45  ;;  %v1503_v1 = vadd.f32 %v3647_v46, %v1437_v21 }
 0xa2e   : > { %v2918_v58 = vpop.eup %2917 }
 0xa2f   : > { %v2221_v4 = vmul.f32 %v2918_v58, %v3829_v0  ;;  %v1440_v12 = vpop.f32.mrf.mxu0 }
 0xa30   : > { %v1506_v54 = vadd.f32 %v3657_v13, %v1440_v12  ;;  %v2924_v12 = vld [vmem:[%s3008_s10 + $0x28] sm:$0xff] }
 0xa31   : > { %2654 = vmatmul.msk.f32.gmra.mxu1 %vm780_vm12, %v2221_v4 }
 0xa37   : > { %v1443_v43 = vpop.f32.mrf.mxu0 }
 0xa38   : > { %v1509_v48 = vadd.f32 %v3665_v19, %v1443_v43 }
 0xa3f   : > { %v1446_v33 = vpop.f32.mrf.mxu0 }
 0xa40   : > { %v1512_v14 = vadd.f32 %v3671_v44, %v1446_v33 }
 0xa47   : > { %v3880_v8 = vpop.f32.mrf.mxu0 }
 0xa48   : > { %v1515_v6 = vadd.f32 %v3673_v29, %v3880_v8 }
 0xa4f   : > { %v3882_v31 = vpop.f32.mrf.mxu0 }
 0xa50   : > { %v1518_v21 = vadd.f32 %v3675_v30, %v3882_v31 }
 0xa57   : > { %v3884_v3 = vpop.f32.mrf.mxu0 }
 0xa5f   : > { %v1948_v16 = vpop.f32.mrf.mxu0  ;;  %v2323_v23 = vpop.f32.mrf.mxu1 }
 0xa60   : > { %v1972_v17 = vadd.f32 %v1948_v16, %v1500_v56  ;;  %v1521_v16 = vadd.f32 %v3681_v61, %v3884_v3  ;;  %v2925_v56 = vld [vmem:[%s3008_s10 + $0x30] sm:$0xff] }
 0xa67   : > { %v1951_v25 = vpop.f32.mrf.mxu0 }
 0xa68   : > { %v1973_v28 = vadd.f32 %v1951_v25, %v1503_v1 }
 0xa6f   : > { %v1954_v7 = vpop.f32.mrf.mxu0 }
 0xa70   : > { %v1974_v38 = vadd.f32 %v1954_v7, %v1506_v54 }
 0xa77   : > { %v1957_v42 = vpop.f32.mrf.mxu0 }
 0xa78   : > { %v1975_v39 = vadd.f32 %v1957_v42, %v1509_v48 }
 0xa7f   : > { %v1960_v59 = vpop.f32.mrf.mxu0 }
 0xa80   : > { %v1976_v22 = vadd.f32 %v1960_v59, %v1512_v14 }
 0xa85   : > { %v2288_v15 = vpop.f32.mrf.mxu3 }
 0xa86   : > { %2659 = vmatmul.msk.f32.gmra.mxu3 %vm637_vm11, %v2288_v15 }
 0xa87   : > { %v1963_v40 = vpop.f32.mrf.mxu0 }
 0xa88   : > { %v1977_v44 = vadd.f32 %v1963_v40, %v1515_v6 }
 0xa89   : > { %v2358_v50 = vpop.f32.mrf.mxu2 }
 0xa8d   : > { %v2291_v26 = vpop.f32.mrf.mxu3 }
 0xa8e   : > { %2660 = vmatmul.msk.f32.gmra.mxu3 %vm637_vm11, %v2291_v26 }
 0xa8f   : > { %v1966_v4 = vpop.f32.mrf.mxu0 }
 0xa90   : > { %v1978_v33 = vadd.f32 %v1966_v4, %v1518_v21 }
 0xa91   : > { %v2361_v46 = vpop.f32.mrf.mxu2 }
 0xa95   : > { %v2405_v9 = vpop.f32.mrf.mxu3 }
 0xa96   : > { %v2429_v35 = vadd.f32 %v2405_v9, %v1972_v17  ;;  %2661 = vmatmul.msk.f32.gmra.mxu3 %vm637_vm11, %v2323_v23 }
 0xa97   : > { %v1969_v26 = vpop.f32.mrf.mxu0 }
 0xa98   : > { %v2441_v47 = vadd.f32 %v3892_v18, %v2429_v35  ;;  %v1979_v23 = vadd.f32 %v1969_v26, %v1521_v16  ;;  %v2926_v35 = vld [vmem:[%s3008_s10 + $0x38] sm:$0xff] }
 0xa9a   : > { %v2449_v27 = vadd.f32 %v2919_v24, %v2441_v47 }
 0xa9c   : > { %2457 = vst.msk [vmem:[%s3901_s23] sm:$0xff] %vm314_vm0, %v2449_v27 }
 0xa9d   : > { %v2408_v2 = vpop.f32.mrf.mxu3 }
 0xa9e   : > { %v2430_v0 = vadd.f32 %v2408_v2, %v1973_v28 }
 0xaa0   : > { %v2442_v51 = vadd.f32 %v3892_v18, %v2430_v0 }
 0xaa2   : > { %v2450_v36 = vadd.f32 %v2920_v41, %v2442_v51 }
 0xaa4   : > { %2458 = vst.msk [vmem:[%s3901_s23 + $0x8] sm:$0xff] %vm314_vm0, %v2450_v36 }
 0xaae   : > { %v2326_v49 = vpop.f32.mrf.mxu1 }
 0xaaf   : > { %2662 = vmatmul.msk.f32.gmra.mxu3 %vm637_vm11, %v2326_v49 }
 0xab7   : > { %2663 = vmatmul.msk.f32.gmra.mxu3 %vm637_vm11, %v2358_v50 }
 0xabf   : > { %2664 = vmatmul.msk.f32.gmra.mxu3 %vm637_vm11, %v2361_v46 }
 0xb09   : > { %v2411_v11 = vpop.f32.mrf.mxu3 }
 0xb0a   : > { %v2431_v55 = vadd.f32 %v2411_v11, %v1974_v38 }
 0xb0c   : > { %v2443_v57 = vadd.f32 %v3892_v18, %v2431_v55 }
 0xb0e   : > { %v2451_v53 = vadd.f32 %v2921_v32, %v2443_v57 }
 0xb10   : > { %2459 = vst.msk [vmem:[%s3901_s23 + $0x10] sm:$0xff] %vm314_vm0, %v2451_v53 }
 0xb11   : > { %v2414_v52 = vpop.f32.mrf.mxu3 }
 0xb12   : > { %v2432_v62 = vadd.f32 %v2414_v52, %v1975_v39 }
 0xb14   : > { %v2444_v13 = vadd.f32 %v3892_v18, %v2432_v62 }
 0xb16   : > { %v2452_v60 = vadd.f32 %v2922_v63, %v2444_v13 }
 0xb18   : > { %2460 = vst.msk [vmem:[%s3901_s23 + $0x18] sm:$0xff] %vm314_vm0, %v2452_v60 }
 0xb19   : > { %v2417_v19 = vpop.f32.mrf.mxu3 }
 0xb1a   : > { %v2433_v34 = vadd.f32 %v2417_v19, %v1976_v22 }
 0xb1c   : > { %v2445_v20 = vadd.f32 %v3892_v18, %v2433_v34 }
 0xb1e   : > { %v2453_v37 = vadd.f32 %v2923_v5, %v2445_v20 }
 0xb20   : > { %2461 = vst.msk [vmem:[%s3901_s23 + $0x20] sm:$0xff] %vm314_vm0, %v2453_v37 }
 0xb32   : > { %v2420_v45 = vpop.f32.mrf.mxu3 }
 0xb33   : > { %v2434_v58 = vadd.f32 %v2420_v45, %v1977_v44 }
 0xb35   : > { %v2446_v10 = vadd.f32 %v3892_v18, %v2434_v58 }
 0xb37   : > { %v2454_v43 = vadd.f32 %v2924_v12, %v2446_v10 }
 0xb39   : > { %2462 = vst.msk [vmem:[%s3901_s23 + $0x28] sm:$0xff] %vm314_vm0, %v2454_v43 }
 0xb3a   : > { %v2423_v15 = vpop.f32.mrf.mxu3 }
 0xb3b   : > { %v2435_v29 = vadd.f32 %v2423_v15, %v1978_v33 }
 0xb3d   : > { %v2447_v8 = vadd.f32 %v3892_v18, %v2435_v29 }
 0xb3f   : > { %v2455_v17 = vadd.f32 %v2925_v56, %v2447_v8 }
 0xb41   : > { %2463 = vst.msk [vmem:[%s3901_s23 + $0x30] sm:$0xff] %vm314_vm0, %v2455_v17 }
 0xb42   : > { %v2426_v30 = vpop.f32.mrf.mxu3 }
 0xb43   : > { %v2436_v31 = vadd.f32 %v2426_v30, %v1979_v23 }
 0xb45   : > { %v2448_v9 = vadd.f32 %v3892_v18, %v2436_v31 }
 0xb47   : > { %v2456_v47 = vadd.f32 %v2926_v35, %v2448_v9 }
 0xb49   : > { %2464 = vst.msk [vmem:[%s3901_s23 + $0x38] sm:$0xff] %vm314_vm0, %v2456_v47 }
 0xb4a PF: > { %s18_s27 = sadd.s32 1, %s2933_s27  }
 0xb4b   : > { %p15_p4 = scmp.ge.s32.totalorder %s18_s27, 4  }
 0xb4d   :  { %17 = sbr.rel (!%p15_p4) target bundleno = 1 (0x1), region = 82 }

</bundles_post_ra>
